<compile_context>
chip_gen: v7x
topology: tpu7x:2x2x1
jax: 0.10.0
libtpu: 0.0.40
codegen_flags: <defaults>
</compile_context>

<pallas_src>
import functools

import jax
import jax.numpy as jnp
from jax.experimental import pallas as pl
from jax.experimental.pallas import tpu as pltpu


def _leaky(x):
    # LeakyReLU(negative_slope=0.1)
    return jnp.where(x >= 0, x, 0.1 * x)


def _round_up(v, m):
    return (v + m - 1) // m * m


def _bottleneck_kernel(x_ref, w1_ref, s1_ref, b1_ref, w2_ref, s2_ref, b2_ref,
                       o_ref, ypad_ref, slab_ref, *, W, TH, PAD, add):
    """One grid step = one image (axis 0) x one row-tile of TH rows (axis 1).

    x_ref    : (1, (H+2)*W, C1p)  bf16  -- whole image, row-padded, row-flattened
    w1_ref   : (C1p, Cmp)         bf16
    w2_ref   : (9*Cmp, C2p)       bf16  -- im2col weight (tap-major)
    s*/b*    : (1, C)             f32   -- folded eval-mode BatchNorm
    o_ref    : (1, TH*W, C2p)     f32
    ypad_ref : (2*PAD + TH*W, Cmp) bf16 scratch (flattened rows + halo margins)
    slab_ref : (TH*W, 9*Cmp)      bf16 scratch (im2col patches)
    """
    i = pl.program_id(1)                       # row-tile index
    TILE = TH * W                              # output positions this step
    HALO = (TH + 2) * W                        # cv1 rows computed (1-row halo each side)
    Cm = ypad_ref.shape[-1]
    MARGIN = PAD - W                           # >= 1, only read at masked positions

    # ---- cv1: 1x1 conv == channel matmul (bf16 MXU, f32 acc) + BN + LeakyReLU ----
    x_start = i * TILE
    if TILE % 8 == 0:
        x_start = pl.multiple_of(x_start, 8)
    xw = x_ref[0, pl.ds(x_start, HALO), :]                          # (HALO, C1p) bf16
    y1 = jnp.dot(xw, w1_ref[...], preferred_element_type=jnp.float32)
    y1 = _leaky(y1 * s1_ref[...] + b1_ref[...])                     # f32
    ypad_ref[pl.ds(PAD - W, HALO), :] = y1.astype(jnp.bfloat16)

    # Zero the small unwritten margins (hygiene only -- any read that lands there
    # is a column-wrap position and gets masked to zero anyway).
    zmargin = jnp.zeros((MARGIN, Cm), jnp.bfloat16)
    ypad_ref[pl.ds(0, MARGIN), :] = zmargin
    ypad_ref[pl.ds(PAD + (TH + 1) * W, MARGIN), :] = zmargin

    # At the image top/bottom the 3x3 conv pads y1 with zeros, not cv1(zero-x).
    zrow = jnp.zeros((W, Cm), jnp.bfloat16)

    @pl.when(i == 0)
    def _():
        ypad_ref[pl.ds(PAD - W, W), :] = zrow          # row above the image

    @pl.when(i == pl.num_programs(1) - 1)
    def _():
        ypad_ref[pl.ds(PAD + TH * W, W), :] = zrow     # row below the image

    # ---- im2col: 9 shifted views of y1 -> (TILE, 9*Cm) slab ----
    col = jax.lax.broadcasted_iota(jnp.int32, (TILE, 1), 0) % W
    ok_l = col >= 1            # dx = -1 does not wrap a row
    ok_r = col < (W - 1)       # dx = +1 does not wrap a row
    zpatch = jnp.zeros((TILE, Cm), jnp.bfloat16)
    t = 0
    for dy in (-1, 0, 1):
        for dx in (-1, 0, 1):
            off = dy * W + dx                                   # static
            patch = ypad_ref[pl.ds(PAD + off, TILE), :]         # y1[h+dy, w+dx]
            if dx == -1:
                patch = jnp.where(ok_l, patch, zpatch)
            elif dx == 1:
                patch = jnp.where(ok_r, patch, zpatch)
            slab_ref[:, pl.ds(t * Cm, Cm)] = patch
            t += 1

    # ---- cv2: 3x3 conv == ONE wide-K matmul + BN + LeakyReLU (+ shortcut) ----
    acc = jnp.dot(slab_ref[...], w2_ref[...], preferred_element_type=jnp.float32)
    y2 = _leaky(acc * s2_ref[...] + b2_ref[...])                 # f32
    if add:
        xs_start = i * TILE + W                                  # tile's own rows in xpad
        if TILE % 8 == 0 and W % 8 == 0:
            xs_start = pl.multiple_of(xs_start, 8)
        y2 = y2 + x_ref[0, pl.ds(xs_start, TILE), :].astype(jnp.float32)
    o_ref[0] = y2.astype(o_ref.dtype)


def bottleneck_forward(x_nchw, params, *, shortcut=True, tile_rows=None):
    """Pallas forward.  x_nchw: (N, C1, H, W) float32.  params in natural layout."""
    w1, s1, b1, w2, s2, b2 = params            # w1:(C_,C1) s1/b1:(C_,) w2:(C2,C_,3,3)
    N, C1, H, W = x_nchw.shape
    C_ = w1.shape[0]
    C2 = w2.shape[0]
    add = shortcut and (C1 == C2)

    # lane-dense channel padding
    C1p = _round_up(C1, 128)
    Cmp = _round_up(C_, 128)
    C2p = _round_up(C2, 128)

    # ---- spatial row tile (halo is recomputed per tile) ----
    if tile_rows is None:
        target = max(1, 2048 // max(W, 1))     # ~2k flattened rows per tile
        tile_rows = H                          # single tile always legal
        for th in range(1, H + 1):
            if H % th == 0 and th <= target and (th * W) % 8 == 0:
                tile_rows = th
    else:
        if H % tile_rows != 0:
            raise ValueError("tile_rows must divide H")
        if tile_rows != H and (tile_rows * W) % 8 != 0:
            raise ValueError("tile_rows * W must be a multiple of 8")
    TH = tile_rows
    num_tiles = H // TH
    PAD = _round_up(W + 1, 8)                  # halo margin in flattened-row space

    # ---- params -> padded kernel layout (bf16 weights, f32 folded BN) ----
    w1k = jnp.zeros((C1p, Cmp), jnp.bfloat16).at[:C1, :C_].set(
        w1.T.astype(jnp.bfloat16))
    s1k = jnp.zeros((1, Cmp), jnp.float32).at[0, :C_].set(s1.astype(jnp.float32))
    b1k = jnp.zeros((1, Cmp), jnp.float32).at[0, :C_].set(b1.astype(jnp.float32))
    w2hwio = jnp.transpose(w2, (2, 3, 1, 0))                    # (3,3,C_,C2)
    w2k = jnp.pad(w2hwio, ((0, 0), (0, 0), (0, Cmp - C_), (0, C2p - C2)))
    w2k = w2k.reshape(9 * Cmp, C2p).astype(jnp.bfloat16)        # tap-major im2col weight
    s2k = jnp.zeros((1, C2p), jnp.float32).at[0, :C2].set(s2.astype(jnp.float32))
    b2k = jnp.zeros((1, C2p), jnp.float32).at[0, :C2].set(b2.astype(jnp.float32))

    # ---- x: NCHW -> NHWC, pad channels + 1 row top/bottom, flatten rows, bf16 ----
    xh = jnp.transpose(x_nchw, (0, 2, 3, 1))                    # (N,H,W,C1)
    xh = jnp.pad(xh, ((0, 0), (1, 1), (0, 0), (0, C1p - C1)))   # (N,H+2,W,C1p)
    xk = xh.reshape(N, (H + 2) * W, C1p).astype(jnp.bfloat16)

    kernel = functools.partial(_bottleneck_kernel, W=W, TH=TH, PAD=PAD, add=add)

    flops = 2 * N * H * W * (C1p * Cmp + 9 * Cmp * C2p)
    bytes_accessed = (xk.size * 2 + w1k.size * 2 + w2k.size * 2
                      + (s1k.size + b1k.size + s2k.size + b2k.size) * 4
                      + N * H * W * C2p * 4)
    cost = pl.CostEstimate(flops=flops, transcendentals=0,
                           bytes_accessed=bytes_accessed)

    out = pl.pallas_call(
        kernel,
        out_shape=jax.ShapeDtypeStruct((N, H * W, C2p), jnp.float32),
        grid_spec=pltpu.PrefetchScalarGridSpec(
            num_scalar_prefetch=0,
            grid=(N, num_tiles),
            in_specs=[
                # whole (row-padded) image stays resident across the row-tile axis
                pl.BlockSpec((1, (H + 2) * W, C1p), lambda n, i: (n, 0, 0)),
                pl.BlockSpec((C1p, Cmp), lambda n, i: (0, 0)),      # w1
                pl.BlockSpec((1, Cmp), lambda n, i: (0, 0)),        # bn1 scale
                pl.BlockSpec((1, Cmp), lambda n, i: (0, 0)),        # bn1 bias
                pl.BlockSpec((9 * Cmp, C2p), lambda n, i: (0, 0)),  # w2 (im2col)
                pl.BlockSpec((1, C2p), lambda n, i: (0, 0)),        # bn2 scale
                pl.BlockSpec((1, C2p), lambda n, i: (0, 0)),        # bn2 bias
            ],
            out_specs=pl.BlockSpec((1, TH * W, C2p), lambda n, i: (n, i, 0)),
            scratch_shapes=[
                pltpu.VMEM((2 * PAD + TH * W, Cmp), jnp.bfloat16),  # padded y1
                pltpu.VMEM((TH * W, 9 * Cmp), jnp.bfloat16),        # im2col slab
            ],
        ),
        compiler_params=pltpu.CompilerParams(
            dimension_semantics=("parallel", "parallel"),
            vmem_limit_bytes=64 * 1024 * 1024),
        cost_estimate=cost,
    )(xk, w1k, s1k, b1k, w2k, s2k, b2k)

    # (N, H*W, C2p) -> NCHW (drop channel padding)
    out = out[:, :, :C2].reshape(N, H, W, C2)
    return jnp.transpose(out, (0, 3, 1, 2))


def init_params(key, c1, c2, e=0.5):
    """Deterministic synthetic params; BatchNorm (eval mode) folded to scale/bias."""
    c_ = int(c2 * e)
    ks = jax.random.split(key, 10)
    eps = 1e-5
    # cv1: Conv2d(c1, c_, 1) weight squeezed to (c_, c1)
    w1 = 0.3 * jax.random.normal(ks[0], (c_, c1), jnp.float32)
    g1 = 1.0 + 0.1 * jax.random.normal(ks[1], (c_,), jnp.float32)
    be1 = 0.1 * jax.random.normal(ks[2], (c_,), jnp.float32)
    m1 = 0.1 * jax.random.normal(ks[3], (c_,), jnp.float32)
    v1 = 0.5 + jax.random.uniform(ks[4], (c_,), jnp.float32)
    s1 = g1 / jnp.sqrt(v1 + eps)
    b1 = be1 - m1 * s1
    # cv2: Conv2d(c_, c2, 3) weight (c2, c_, 3, 3)
    w2 = 0.3 * jax.random.normal(ks[5], (c2, c_, 3, 3), jnp.float32)
    g2 = 1.0 + 0.1 * jax.random.normal(ks[6], (c2,), jnp.float32)
    be2 = 0.1 * jax.random.normal(ks[7], (c2,), jnp.float32)
    m2 = 0.1 * jax.random.normal(ks[8], (c2,), jnp.float32)
    v2 = 0.5 + jax.random.uniform(ks[9], (c2,), jnp.float32)
    s2 = g2 / jnp.sqrt(v2 + eps)
    b2 = be2 - m2 * s2
    return (w1, s1, b1, w2, s2, b2)


def bottleneck_ref(x_nchw, params, *, shortcut=True):
    """Plain-JAX f32 reference (same folded-BN parameterization)."""
    w1, s1, b1, w2, s2, b2 = params
    N, C1, H, W = x_nchw.shape
    C2 = w2.shape[0]
    x = jnp.transpose(x_nchw, (0, 2, 3, 1))                     # NHWC
    y1 = jnp.einsum('nhwc,dc->nhwd', x, w1, precision='highest')
    y1 = _leaky(y1 * s1 + b1)
    y1p = jnp.pad(y1, ((0, 0), (1, 1), (1, 1), (0, 0)))
    wh = jnp.transpose(w2, (2, 3, 1, 0))                        # (3,3,C_,C2)
    acc = jnp.zeros((N, H, W, C2), jnp.float32)
    for ky in range(3):
        for kx in range(3):
            acc = acc + jnp.einsum('nhwc,cd->nhwd',
                                   y1p[:, ky:ky + H, kx:kx + W, :],
                                   wh[ky, kx], precision='highest')
    y2 = _leaky(acc * s2 + b2)
    if shortcut and C1 == C2:
        y2 = y2 + x
    return jnp.transpose(y2, (0, 3, 1, 2))


if __name__ == "__main__":
    key = jax.random.PRNGKey(0)
    kx, kp = jax.random.split(key)

    N, C1, C2, H, W = 2, 8, 8, 16, 16
    x = jax.random.normal(kx, (N, C1, H, W), jnp.float32)
    params = init_params(kp, C1, C2, e=0.5)

    ref = bottleneck_ref(x, params, shortcut=True)

    # multi-tile path (exercises the row-halo / border handling)
    out_tiled = jax.block_until_ready(
        bottleneck_forward(x, params, shortcut=True, tile_rows=8))
    # default (single-tile) path
    out_full = jax.block_until_ready(
        bottleneck_forward(x, params, shortcut=True))

    assert out_tiled.shape == (N, C2, H, W), out_tiled.shape
    assert out_full.shape == (N, C2, H, W), out_full.shape

    err_t = float(jnp.max(jnp.abs(out_tiled - ref)))
    err_f = float(jnp.max(jnp.abs(out_full - ref)))
    # bf16 MXU inputs (f32 accumulation / BN / shortcut) -> bf16-level tolerance
    assert jnp.allclose(out_tiled, ref, atol=5e-2, rtol=5e-2), f"max_err={err_t}"
    assert jnp.allclose(out_full, ref, atol=5e-2, rtol=5e-2), f"max_err={err_f}"

    print("KERNEL_OK")
</pallas_src>

<mosaic_0001>
module attributes {stable_mosaic.version = 11 : i64} {
  func.func @_bottleneck_kernel(%arg0: i32, %arg1: i32, %arg2: memref<1x288x128xbf16, #tpu.memory_space<vmem>>, %arg3: memref<128x128xbf16, #tpu.memory_space<vmem>>, %arg4: memref<1x128xf32, #tpu.memory_space<vmem>>, %arg5: memref<1x128xf32, #tpu.memory_space<vmem>>, %arg6: memref<1152x128xbf16, #tpu.memory_space<vmem>>, %arg7: memref<1x128xf32, #tpu.memory_space<vmem>>, %arg8: memref<1x128xf32, #tpu.memory_space<vmem>>, %arg9: memref<1x128x128xf32, #tpu.memory_space<vmem>>, %arg10: memref<176x128xbf16, #tpu.memory_space<vmem>>, %arg11: memref<128x1152xbf16, #tpu.memory_space<vmem>>) attributes {dimension_semantics = [#tpu.dimension_semantics<parallel>, #tpu.dimension_semantics<parallel>], iteration_bounds = array<i64: 2, 2>, scalar_prefetch = 0 : i64, scratch_operands = 2 : i64, tpu.core_type = #tpu.core_type<tc>, window_params = [{transform_indices = @transform_0, window_bounds = array<i64: 1, 288, 128>}, {pipeline_mode = #tpu.pipeline_mode<synchronous>, transform_indices = @transform_1, window_bounds = array<i64: 128, 128>}, {pipeline_mode = #tpu.pipeline_mode<synchronous>, transform_indices = @transform_2, window_bounds = array<i64: 1, 128>}, {pipeline_mode = #tpu.pipeline_mode<synchronous>, transform_indices = @transform_3, window_bounds = array<i64: 1, 128>}, {pipeline_mode = #tpu.pipeline_mode<synchronous>, transform_indices = @transform_4, window_bounds = array<i64: 1152, 128>}, {pipeline_mode = #tpu.pipeline_mode<synchronous>, transform_indices = @transform_5, window_bounds = array<i64: 1, 128>}, {pipeline_mode = #tpu.pipeline_mode<synchronous>, transform_indices = @transform_6, window_bounds = array<i64: 1, 128>}, {transform_indices = @transform_7, window_bounds = array<i64: 1, 128, 128>}]} {
    %c128_i32 = arith.constant 128 : i32
    %0 = arith.muli %arg1, %c128_i32 : i32
    %1 = tpu.assume_multiple %0, 8 : i32
    %c0 = arith.constant 0 : index
    %2 = arith.index_cast %1 : i32 to index
    %c0_0 = arith.constant 0 : index
    %3 = vector.load %arg2[%c0, %2, %c0_0] : memref<1x288x128xbf16, #tpu.memory_space<vmem>>, vector<1x160x128xbf16>
    %4 = vector.shape_cast %3 : vector<1x160x128xbf16> to vector<160x128xbf16>
    %c0_1 = arith.constant 0 : index
    %c0_2 = arith.constant 0 : index
    %5 = vector.load %arg3[%c0_1, %c0_2] : memref<128x128xbf16, #tpu.memory_space<vmem>>, vector<128x128xbf16>
    %cst = arith.constant dense<0.000000e+00> : vector<160x128xf32>
    %6 = tpu.matmul %4, %5, %cst {dimension_numbers = #tpu.dot_dimension_numbers<[1], [0], [0], [1], [0, 0, 1, 1], [], []>} : vector<160x128xbf16>, vector<128x128xbf16>, vector<160x128xf32> -> vector<160x128xf32>
    %c0_3 = arith.constant 0 : index
    %c0_4 = arith.constant 0 : index
    %7 = vector.load %arg4[%c0_3, %c0_4] : memref<1x128xf32, #tpu.memory_space<vmem>>, vector<1x128xf32>
    %8 = vector.broadcast %7 : vector<1x128xf32> to vector<160x128xf32>
    %9 = arith.mulf %6, %8 : vector<160x128xf32>
    %c0_5 = arith.constant 0 : index
    %c0_6 = arith.constant 0 : index
    %10 = vector.load %arg5[%c0_5, %c0_6] : memref<1x128xf32, #tpu.memory_space<vmem>>, vector<1x128xf32>
    %11 = vector.broadcast %10 : vector<1x128xf32> to vector<160x128xf32>
    %12 = arith.addf %9, %11 : vector<160x128xf32>
    %cst_7 = arith.constant 0.000000e+00 : f32
    %13 = vector.broadcast %cst_7 : f32 to vector<160x128xf32>
    %14 = arith.cmpf oge, %12, %13 : vector<160x128xf32>
    %cst_8 = arith.constant 1.000000e-01 : f32
    %15 = vector.broadcast %cst_8 : f32 to vector<160x128xf32>
    %16 = arith.mulf %15, %12 : vector<160x128xf32>
    %17 = arith.select %14, %12, %16 : vector<160x128xi1>, vector<160x128xf32>
    %18 = arith.truncf %17 : vector<160x128xf32> to vector<160x128xbf16>
    %c8 = arith.constant 8 : index
    %c0_9 = arith.constant 0 : index
    %19 = vector.load %arg10[%c8, %c0_9] : memref<176x128xbf16, #tpu.memory_space<vmem>>, vector<160x128xbf16>
    tpu.vector_store %arg10[%c8, %c0_9], %18 {strides = array<i32>} : memref<176x128xbf16, #tpu.memory_space<vmem>>, vector<160x128xbf16>,
    %cst_10 = arith.constant 0.000000e+00 : bf16
    %20 = vector.broadcast %cst_10 : bf16 to vector<8x128xbf16>
    %c0_11 = arith.constant 0 : index
    %c0_12 = arith.constant 0 : index
    %21 = vector.load %arg10[%c0_11, %c0_12] : memref<176x128xbf16, #tpu.memory_space<vmem>>, vector<8x128xbf16>
    tpu.vector_store %arg10[%c0_11, %c0_12], %20 {strides = array<i32>} : memref<176x128xbf16, #tpu.memory_space<vmem>>, vector<8x128xbf16>,
    %c168 = arith.constant 168 : index
    %c0_13 = arith.constant 0 : index
    %22 = vector.load %arg10[%c168, %c0_13] : memref<176x128xbf16, #tpu.memory_space<vmem>>, vector<8x128xbf16>
    tpu.vector_store %arg10[%c168, %c0_13], %20 {strides = array<i32>} : memref<176x128xbf16, #tpu.memory_space<vmem>>, vector<8x128xbf16>,
    %cst_14 = arith.constant 0.000000e+00 : bf16
    %23 = vector.broadcast %cst_14 : bf16 to vector<16x128xbf16>
    %c0_i32 = arith.constant 0 : i32
    %24 = arith.cmpi eq, %arg1, %c0_i32 : i32
    %25 = arith.extui %24 : i1 to i32
    %c0_i32_15 = arith.constant 0 : i32
    %26 = arith.cmpi ne, %25, %c0_i32_15 : i32
    scf.if %26 {
      %c8_62 = arith.constant 8 : index
      %c0_63 = arith.constant 0 : index
      %113 = vector.load %arg10[%c8_62, %c0_63] : memref<176x128xbf16, #tpu.memory_space<vmem>>, vector<16x128xbf16>
      tpu.vector_store %arg10[%c8_62, %c0_63], %23 {strides = array<i32>} : memref<176x128xbf16, #tpu.memory_space<vmem>>, vector<16x128xbf16>,
    } else {
    }
    %c1_i32 = arith.constant 1 : i32
    %27 = arith.cmpi eq, %arg1, %c1_i32 : i32
    %28 = arith.extui %27 : i1 to i32
    %c0_i32_16 = arith.constant 0 : i32
    %29 = arith.cmpi ne, %28, %c0_i32_16 : i32
    scf.if %29 {
      %c152 = arith.constant 152 : index
      %c0_62 = arith.constant 0 : index
      %113 = vector.load %arg10[%c152, %c0_62] : memref<176x128xbf16, #tpu.memory_space<vmem>>, vector<16x128xbf16>
      tpu.vector_store %arg10[%c152, %c0_62], %23 {strides = array<i32>} : memref<176x128xbf16, #tpu.memory_space<vmem>>, vector<16x128xbf16>,
    } else {
    }
    %30 = tpu.iota {dimensions = array<i32: 0>} : vector<128x1xi32>
    %c16_i32 = arith.constant 16 : i32
    %c0_i32_17 = arith.constant 0 : i32
    %31 = arith.cmpi eq, %c16_i32, %c0_i32_17 : i32
    %c1_i32_18 = arith.constant 1 : i32
    %32 = arith.select %31, %c1_i32_18, %c16_i32 : i32
    %33 = vector.broadcast %32 : i32 to vector<128x1xi32>
    %34 = arith.remsi %30, %33 : vector<128x1xi32>
    %c0_i32_19 = arith.constant 0 : i32
    %35 = vector.broadcast %c0_i32_19 : i32 to vector<128x1xi32>
    %36 = arith.cmpi ne, %34, %35 : vector<128x1xi32>
    %c0_i32_20 = arith.constant 0 : i32
    %37 = vector.broadcast %c0_i32_20 : i32 to vector<128x1xi32>
    %38 = arith.cmpi slt, %34, %37 : vector<128x1xi32>
    %c0_i32_21 = arith.constant 0 : i32
    %39 = arith.cmpi slt, %32, %c0_i32_21 : i32
    %40 = vector.broadcast %39 : i1 to vector<128x1xi1>
    %41 = vector.broadcast %40 : vector<128x1xi1> to vector<128x1xi1>
    %42 = arith.xori %38, %41 : vector<128x1xi1>
    %43 = arith.andi %42, %36 : vector<128x1xi1>
    %44 = vector.broadcast %32 : i32 to vector<128x1xi32>
    %45 = arith.addi %34, %44 : vector<128x1xi32>
    %46 = arith.select %43, %45, %34 : vector<128x1xi1>, vector<128x1xi32>
    %c1_i32_22 = arith.constant 1 : i32
    %47 = vector.broadcast %c1_i32_22 : i32 to vector<128x1xi32>
    %48 = arith.cmpi sge, %46, %47 : vector<128x1xi32>
    %c15_i32 = arith.constant 15 : i32
    %49 = vector.broadcast %c15_i32 : i32 to vector<128x1xi32>
    %50 = arith.cmpi slt, %46, %49 : vector<128x1xi32>
    %cst_23 = arith.constant 0.000000e+00 : bf16
    %51 = vector.broadcast %cst_23 : bf16 to vector<128x128xbf16>
    %c7 = arith.constant 7 : index
    %c0_24 = arith.constant 0 : index
    %52 = vector.load %arg10[%c7, %c0_24] : memref<176x128xbf16, #tpu.memory_space<vmem>>, vector<128x128xbf16>
    %53 = vector.shape_cast %48 : vector<128x1xi1> to vector<128x1xi1>
    %54 = vector.broadcast %53 : vector<128x1xi1> to vector<128x128xi1>
    %55 = arith.select %54, %52, %51 : vector<128x128xi1>, vector<128x128xbf16>
    %c0_25 = arith.constant 0 : index
    %c0_26 = arith.constant 0 : index
    %56 = vector.load %arg11[%c0_25, %c0_26] : memref<128x1152xbf16, #tpu.memory_space<vmem>>, vector<128x128xbf16>
    tpu.vector_store %arg11[%c0_25, %c0_26], %55 {strides = array<i32>} : memref<128x1152xbf16, #tpu.memory_space<vmem>>, vector<128x128xbf16>,
    %c8_27 = arith.constant 8 : index
    %c0_28 = arith.constant 0 : index
    %57 = vector.load %arg10[%c8_27, %c0_28] : memref<176x128xbf16, #tpu.memory_space<vmem>>, vector<128x128xbf16>
    %c0_29 = arith.constant 0 : index
    %c128 = arith.constant 128 : index
    %58 = vector.load %arg11[%c0_29, %c128] : memref<128x1152xbf16, #tpu.memory_space<vmem>>, vector<128x128xbf16>
    tpu.vector_store %arg11[%c0_29, %c128], %57 {strides = array<i32>} : memref<128x1152xbf16, #tpu.memory_space<vmem>>, vector<128x128xbf16>,
    %c9 = arith.constant 9 : index
    %c0_30 = arith.constant 0 : index
    %59 = vector.load %arg10[%c9, %c0_30] : memref<176x128xbf16, #tpu.memory_space<vmem>>, vector<128x128xbf16>
    %60 = vector.shape_cast %50 : vector<128x1xi1> to vector<128x1xi1>
    %61 = vector.broadcast %60 : vector<128x1xi1> to vector<128x128xi1>
    %62 = arith.select %61, %59, %51 : vector<128x128xi1>, vector<128x128xbf16>
    %c0_31 = arith.constant 0 : index
    %c256 = arith.constant 256 : index
    %63 = vector.load %arg11[%c0_31, %c256] : memref<128x1152xbf16, #tpu.memory_space<vmem>>, vector<128x128xbf16>
    tpu.vector_store %arg11[%c0_31, %c256], %62 {strides = array<i32>} : memref<128x1152xbf16, #tpu.memory_space<vmem>>, vector<128x128xbf16>,
    %c23 = arith.constant 23 : index
    %c0_32 = arith.constant 0 : index
    %64 = vector.load %arg10[%c23, %c0_32] : memref<176x128xbf16, #tpu.memory_space<vmem>>, vector<128x128xbf16>
    %65 = vector.shape_cast %48 : vector<128x1xi1> to vector<128x1xi1>
    %66 = vector.broadcast %65 : vector<128x1xi1> to vector<128x128xi1>
    %67 = arith.select %66, %64, %51 : vector<128x128xi1>, vector<128x128xbf16>
    %c0_33 = arith.constant 0 : index
    %c384 = arith.constant 384 : index
    %68 = vector.load %arg11[%c0_33, %c384] : memref<128x1152xbf16, #tpu.memory_space<vmem>>, vector<128x128xbf16>
    tpu.vector_store %arg11[%c0_33, %c384], %67 {strides = array<i32>} : memref<128x1152xbf16, #tpu.memory_space<vmem>>, vector<128x128xbf16>,
    %c24 = arith.constant 24 : index
    %c0_34 = arith.constant 0 : index
    %69 = vector.load %arg10[%c24, %c0_34] : memref<176x128xbf16, #tpu.memory_space<vmem>>, vector<128x128xbf16>
    %c0_35 = arith.constant 0 : index
    %c512 = arith.constant 512 : index
    %70 = vector.load %arg11[%c0_35, %c512] : memref<128x1152xbf16, #tpu.memory_space<vmem>>, vector<128x128xbf16>
    tpu.vector_store %arg11[%c0_35, %c512], %69 {strides = array<i32>} : memref<128x1152xbf16, #tpu.memory_space<vmem>>, vector<128x128xbf16>,
    %c25 = arith.constant 25 : index
    %c0_36 = arith.constant 0 : index
    %71 = vector.load %arg10[%c25, %c0_36] : memref<176x128xbf16, #tpu.memory_space<vmem>>, vector<128x128xbf16>
    %72 = vector.shape_cast %50 : vector<128x1xi1> to vector<128x1xi1>
    %73 = vector.broadcast %72 : vector<128x1xi1> to vector<128x128xi1>
    %74 = arith.select %73, %71, %51 : vector<128x128xi1>, vector<128x128xbf16>
    %c0_37 = arith.constant 0 : index
    %c640 = arith.constant 640 : index
    %75 = vector.load %arg11[%c0_37, %c640] : memref<128x1152xbf16, #tpu.memory_space<vmem>>, vector<128x128xbf16>
    tpu.vector_store %arg11[%c0_37, %c640], %74 {strides = array<i32>} : memref<128x1152xbf16, #tpu.memory_space<vmem>>, vector<128x128xbf16>,
    %c39 = arith.constant 39 : index
    %c0_38 = arith.constant 0 : index
    %76 = vector.load %arg10[%c39, %c0_38] : memref<176x128xbf16, #tpu.memory_space<vmem>>, vector<128x128xbf16>
    %77 = vector.shape_cast %48 : vector<128x1xi1> to vector<128x1xi1>
    %78 = vector.broadcast %77 : vector<128x1xi1> to vector<128x128xi1>
    %79 = arith.select %78, %76, %51 : vector<128x128xi1>, vector<128x128xbf16>
    %c0_39 = arith.constant 0 : index
    %c768 = arith.constant 768 : index
    %80 = vector.load %arg11[%c0_39, %c768] : memref<128x1152xbf16, #tpu.memory_space<vmem>>, vector<128x128xbf16>
    tpu.vector_store %arg11[%c0_39, %c768], %79 {strides = array<i32>} : memref<128x1152xbf16, #tpu.memory_space<vmem>>, vector<128x128xbf16>,
    %c40 = arith.constant 40 : index
    %c0_40 = arith.constant 0 : index
    %81 = vector.load %arg10[%c40, %c0_40] : memref<176x128xbf16, #tpu.memory_space<vmem>>, vector<128x128xbf16>
    %c0_41 = arith.constant 0 : index
    %c896 = arith.constant 896 : index
    %82 = vector.load %arg11[%c0_41, %c896] : memref<128x1152xbf16, #tpu.memory_space<vmem>>, vector<128x128xbf16>
    tpu.vector_store %arg11[%c0_41, %c896], %81 {strides = array<i32>} : memref<128x1152xbf16, #tpu.memory_space<vmem>>, vector<128x128xbf16>,
    %c41 = arith.constant 41 : index
    %c0_42 = arith.constant 0 : index
    %83 = vector.load %arg10[%c41, %c0_42] : memref<176x128xbf16, #tpu.memory_space<vmem>>, vector<128x128xbf16>
    %84 = vector.shape_cast %50 : vector<128x1xi1> to vector<128x1xi1>
    %85 = vector.broadcast %84 : vector<128x1xi1> to vector<128x128xi1>
    %86 = arith.select %85, %83, %51 : vector<128x128xi1>, vector<128x128xbf16>
    %c0_43 = arith.constant 0 : index
    %c1024 = arith.constant 1024 : index
    %87 = vector.load %arg11[%c0_43, %c1024] : memref<128x1152xbf16, #tpu.memory_space<vmem>>, vector<128x128xbf16>
    tpu.vector_store %arg11[%c0_43, %c1024], %86 {strides = array<i32>} : memref<128x1152xbf16, #tpu.memory_space<vmem>>, vector<128x128xbf16>,
    %c0_44 = arith.constant 0 : index
    %c0_45 = arith.constant 0 : index
    %88 = vector.load %arg11[%c0_44, %c0_45] : memref<128x1152xbf16, #tpu.memory_space<vmem>>, vector<128x1152xbf16>
    %c0_46 = arith.constant 0 : index
    %c0_47 = arith.constant 0 : index
    %89 = vector.load %arg6[%c0_46, %c0_47] : memref<1152x128xbf16, #tpu.memory_space<vmem>>, vector<1152x128xbf16>
    %cst_48 = arith.constant dense<0.000000e+00> : vector<128x128xf32>
    %90 = tpu.matmul %88, %89, %cst_48 {dimension_numbers = #tpu.dot_dimension_numbers<[1], [0], [0], [1], [0, 0, 1, 1], [], []>} : vector<128x1152xbf16>, vector<1152x128xbf16>, vector<128x128xf32> -> vector<128x128xf32>
    %c0_49 = arith.constant 0 : index
    %c0_50 = arith.constant 0 : index
    %91 = vector.load %arg7[%c0_49, %c0_50] : memref<1x128xf32, #tpu.memory_space<vmem>>, vector<1x128xf32>
    %92 = vector.broadcast %91 : vector<1x128xf32> to vector<128x128xf32>
    %93 = arith.mulf %90, %92 : vector<128x128xf32>
    %c0_51 = arith.constant 0 : index
    %c0_52 = arith.constant 0 : index
    %94 = vector.load %arg8[%c0_51, %c0_52] : memref<1x128xf32, #tpu.memory_space<vmem>>, vector<1x128xf32>
    %95 = vector.broadcast %94 : vector<1x128xf32> to vector<128x128xf32>
    %96 = arith.addf %93, %95 : vector<128x128xf32>
    %cst_53 = arith.constant 0.000000e+00 : f32
    %97 = vector.broadcast %cst_53 : f32 to vector<128x128xf32>
    %98 = arith.cmpf oge, %96, %97 : vector<128x128xf32>
    %cst_54 = arith.constant 1.000000e-01 : f32
    %99 = vector.broadcast %cst_54 : f32 to vector<128x128xf32>
    %100 = arith.mulf %99, %96 : vector<128x128xf32>
    %101 = arith.select %98, %96, %100 : vector<128x128xi1>, vector<128x128xf32>
    %c128_i32_55 = arith.constant 128 : i32
    %102 = arith.muli %arg1, %c128_i32_55 : i32
    %c16_i32_56 = arith.constant 16 : i32
    %103 = arith.addi %102, %c16_i32_56 : i32
    %104 = tpu.assume_multiple %103, 8 : i32
    %c0_57 = arith.constant 0 : index
    %105 = arith.index_cast %104 : i32 to index
    %c0_58 = arith.constant 0 : index
    %106 = vector.load %arg2[%c0_57, %105, %c0_58] : memref<1x288x128xbf16, #tpu.memory_space<vmem>>, vector<1x128x128xbf16>
    %107 = vector.shape_cast %106 : vector<1x128x128xbf16> to vector<128x128xbf16>
    %108 = arith.extf %107 : vector<128x128xbf16> to vector<128x128xf32>
    %109 = arith.addf %101, %108 : vector<128x128xf32>
    %c0_59 = arith.constant 0 : index
    %c0_60 = arith.constant 0 : index
    %c0_61 = arith.constant 0 : index
    %110 = vector.load %arg9[%c0_59, %c0_60, %c0_61] : memref<1x128x128xf32, #tpu.memory_space<vmem>>, vector<1x128x128xf32>
    %111 = vector.shape_cast %110 : vector<1x128x128xf32> to vector<128x128xf32>
    %112 = vector.shape_cast %109 : vector<128x128xf32> to vector<1x128x128xf32>
    tpu.vector_store %arg9[%c0_59, %c0_60, %c0_61], %112 {strides = array<i32>} : memref<1x128x128xf32, #tpu.memory_space<vmem>>, vector<1x128x128xf32>,
    return
  }
  func.func @transform_0(%arg0: i32, %arg1: i32) -> (i32, i32, i32) {
    %c0_i32 = arith.constant 0 : i32
    %c0_i32_0 = arith.constant 0 : i32
    %c0_i32_1 = arith.constant 0 : i32
    return %arg0, %c0_i32, %c0_i32_0 : i32, i32, i32
  }
  func.func @transform_1(%arg0: i32, %arg1: i32) -> (i32, i32) {
    %c0_i32 = arith.constant 0 : i32
    %c0_i32_0 = arith.constant 0 : i32
    %c0_i32_1 = arith.constant 0 : i32
    return %c0_i32, %c0_i32_0 : i32, i32
  }
  func.func @transform_2(%arg0: i32, %arg1: i32) -> (i32, i32) {
    %c0_i32 = arith.constant 0 : i32
    %c0_i32_0 = arith.constant 0 : i32
    %c0_i32_1 = arith.constant 0 : i32
    return %c0_i32, %c0_i32_0 : i32, i32
  }
  func.func @transform_3(%arg0: i32, %arg1: i32) -> (i32, i32) {
    %c0_i32 = arith.constant 0 : i32
    %c0_i32_0 = arith.constant 0 : i32
    %c0_i32_1 = arith.constant 0 : i32
    return %c0_i32, %c0_i32_0 : i32, i32
  }
  func.func @transform_4(%arg0: i32, %arg1: i32) -> (i32, i32) {
    %c0_i32 = arith.constant 0 : i32
    %c0_i32_0 = arith.constant 0 : i32
    %c0_i32_1 = arith.constant 0 : i32
    return %c0_i32, %c0_i32_0 : i32, i32
  }
  func.func @transform_5(%arg0: i32, %arg1: i32) -> (i32, i32) {
    %c0_i32 = arith.constant 0 : i32
    %c0_i32_0 = arith.constant 0 : i32
    %c0_i32_1 = arith.constant 0 : i32
    return %c0_i32, %c0_i32_0 : i32, i32
  }
  func.func @transform_6(%arg0: i32, %arg1: i32) -> (i32, i32) {
    %c0_i32 = arith.constant 0 : i32
    %c0_i32_0 = arith.constant 0 : i32
    %c0_i32_1 = arith.constant 0 : i32
    return %c0_i32, %c0_i32_0 : i32, i32
  }
  func.func @transform_7(%arg0: i32, %arg1: i32) -> (i32, i32, i32) {
    %c0_i32 = arith.constant 0 : i32
    %c0_i32_0 = arith.constant 0 : i32
    return %arg0, %arg1, %c0_i32 : i32, i32, i32
  }
}

</mosaic_0001>

<bundles_post_ra>
// kernel: tpu_custom_call.1
= control target key start
LH: loop header
LB: loop body
LE: loop exit
PB: predicated region body
PF: predicated region fallthrough
CT: control target
= control target key end

     0   :  { %s6251_s0 = inlined_call_operand.hbm [shape: bf16[2,288,128], index: 0, kind: input, shape index: {}]   ;;  %s6252_s1 = inlined_call_operand.hbm [shape: bf16[128,128], index: 1, kind: input, shape index: {}]   ;;  %s6253_s2 = inlined_call_operand.hbm [shape: f32[1,128], index: 2, kind: input, shape index: {}]   ;;  %s6254_s3 = inlined_call_operand.hbm [shape: f32[1,128], index: 3, kind: input, shape index: {}]   ;;  %s6255_s4 = inlined_call_operand.hbm [shape: bf16[1152,128], index: 4, kind: input, shape index: {}]   ;;  %s6256_s5 = inlined_call_operand.hbm [shape: f32[1,128], index: 5, kind: input, shape index: {}]   ;;  %s6257_s6 = inlined_call_operand.hbm [shape: f32[1,128], index: 6, kind: input, shape index: {}]   ;;  %s6258_s7 = inlined_call_operand.hbm [shape: f32[2,256,128], index: 7, kind: output, shape index: {}]  }
   0x1   :  { %6275 = sst [smem:[#allocation27_spill]] %s6251_s0 }
   0x2   :  { %6276 = sst [smem:[#allocation28_spill]] %s6252_s1 }
   0x3   :  { %6277 = sst [smem:[#allocation29_spill]] %s6253_s2 }
   0x4   :  { %6278 = sst [smem:[#allocation30_spill]] %s6254_s3 }
   0x5   :  { %6279 = sst [smem:[#allocation31_spill]] %s6255_s4 }
   0x6   :  { %6280 = sst [smem:[#allocation32_spill]] %s6258_s7 }
   0x7   :  { %12 = vsyncpa [#allocation5], 0 }
   0x8   :  { %14 = vsyncpa [#allocation5 + $0x1], 0 }
   0x9   :  { %15 = vsyncpa [#allocation8], 0 }
   0xa   :  { %16 = vsyncpa [#allocation11], 0 }
   0xb   :  { %17 = vsyncpa [#allocation14], 0 }
   0xc   :  { %18 = vsyncpa [#allocation6], 0 }
   0xd   :  { %20 = vsyncpa [#allocation6 + $0x1], 0  ;;  %s4913_s24 = smov 0   ;;  %s4915_s25 = smov 0  }
   0xe   :  { %s4917_s26 = smov 0   ;;  %s4919_s27 = smov 0  }
   0xf   :  { %s4921_s28 = smov 0   ;;  %s4923_s29 = smov 0  }
  0x10   :  { %s4925_s30 = smov 0   ;;  %s4927_s8 = smov 0  }
  0x11   :  { %s4929_s9 = smov 0   ;;  %s4931_s10 = smov 0  }
  0x12   :  { %s4933_s11 = smov 0  }
  0x13 LB: > { %6281 = sst [smem:[#allocation22_spill]] %s4815_s24  ;;  %s3722_s12 = sadd.s32 4294967295, %s4855_s11   ;;  %s4855_s11 = sphi %s4933_s11, %s26_s11   ;;  %s4851_s10 = sphi %s4931_s10, %s6352_s10   ;;  %s4847_s9 = sphi %s4929_s9, %s6351_s9   ;;  %s4843_s8 = sphi %s4927_s8, %s6350_s8   ;;  %s4839_s30 = sphi %s4925_s30, %s6349_s30   ;;  %s4835_s29 = sphi %s4923_s29, %s6348_s29   ;;  %s4831_s28 = sphi %s4921_s28, %s6347_s28   ;;  %s4827_s27 = sphi %s4919_s27, %s6346_s27   ;;  %s4823_s26 = sphi %s4917_s26, %s6345_s26   ;;  %s4819_s25 = sphi %s4915_s25, %s6344_s25   ;;  %s4815_s24 = sphi %s4913_s24, %s6343_s24  }
  0x14   : > { %6282 = sst [smem:[#allocation23_spill]] %s4839_s30  ;;  %p3724_p0 = scmp.ge.s32.totalorder %s4855_s11, 1 }
  0x15   : > { %6283 = sst [smem:[#allocation24_spill]] %s4843_s8  ;;  %p4970_p1 = scmp.eq.s32.totalorder %s3722_s12, 0 }
  0x16   : > { %p4974_p2 = scmp.eq.s32.totalorder %s3722_s12, 3  ;;  %p223_p3 = scmp.lt.s32.totalorder %s4855_s11, 5 }
  0x17   : > { %s6284_s13 = scalar_select %p4970_p1, 1, 0 }
  0x18   : > { %s6285_s14 = scalar_select %p4974_p2, 1, 0 }
  0x19   : > { %p4979_p4 = pnand %p3724_p0, %p223_p3  ;;  %s4857_s16 = smov [#allocation7]  }
  0x1a   : > { %6286 = sst [smem:[#allocation25_spill]] %s6285_s14  ;;  %s235_s17 = sshll.u32 %s4857_s16, 4  ;;  %s4983_s17 = int_to_ptr.vmem [resolvable:$true] %s235_s17 }
  0x1b   : > { %s6287_s15 = scalar_select %p4979_p4, 1, 0 }
  0x1c   : > { %p4290_p5 = pneg %p4979_p4  ;;  %s4858_s19 = smov [#allocation10]  }
  0x1d   : > { %6288 = sst [smem:[#allocation26_spill]] %s6287_s15  ;;  %s260_s20 = sshll.u32 %s4858_s19, 4  ;;  %s4993_s20 = int_to_ptr.vmem [resolvable:$true] %s260_s20 }
  0x1e   : > { %p4989_p6 = pnand %p4290_p5, %p4970_p1  ;;  %s4859_s21 = smov [#allocation13]  }
  0x1f   : > { %s284_s22 = sshll.u32 %s4859_s21, 4  ;;  %s6290_s1 = sld [smem:[#allocation28_spill]]  ;;  %s4995_s22 = int_to_ptr.vmem [resolvable:$true] %s284_s22 }
  0x20   : > { %p5005_p8 = pneg %p4989_p6 }
  0x25   : > { %s4523_s16 = scalar_lea.hbm %s6290_s1, 1024 }
  0x26   : > { %p4524_p7 = scmp.ne.s32.totalorder %s6290_s1, %s4523_s16  ;;  %p4530_p11 = scmp.lt.u32.totalorder %s4523_s16, %s6290_s1 }
  0x28   : > { %p4526_p9 = pnand %p5005_p8, %p4524_p7 }
  0x2a   : > { %p4527_p10 = pneg %p4526_p9 }
  0x2c   : > { %p4532_p12 = pnand %p4530_p11, %p4527_p10 }
  0x2e   : > { %4535 = shalt.err (!%p4532_p12)
}
  0x2f   : > { %s4536_s7 = scalar_lea.vmem %s4983_s17, 1024  ;;  %p4544_p5 = scmp.lt.s32.totalorder %s4983_s17, %s4983_s17 }
  0x30   : > { %p4537_p13 = scmp.ne.s32.totalorder %s4983_s17, %s4536_s7  ;;  %p4545_p4 = scmp.lt.s32.totalorder %s4536_s7, %s4536_s7 }
  0x32   : > { %p4539_p0 = pnand %p4537_p13, %p5005_p8  ;;  %p4546_p7 = por %p4545_p4, %p4544_p5 }
  0x34   : > { %p4540_p3 = pneg %p4539_p0 }
  0x36   : > { %p4547_p9 = pnand %p4546_p7, %p4540_p3 }
  0x38   : > { %4550 = shalt.err (!%p4547_p9)
}
  0x39   : > { %s6268_s8 = smov 64   ;;  %s6269_s23 = smov 4  }
  0x3a   : > { %4293 = dma.hbm_to_vmem [thread:$0]  (!%p4989_p6), %s6290_s1, 1024, %s4983_s17, [#allocation8], %s6268_s8, %s6268_s8, %s6269_s23  }
  0x3b   : > { %s6292_s3 = sld [smem:[#allocation30_spill]] }
  0x41   : > { %s4551_s7 = scalar_lea.hbm %s6292_s3, 16 }
  0x42   : > { %p4552_p4 = scmp.ne.s32.totalorder %s6292_s3, %s4551_s7  ;;  %p4558_p12 = scmp.lt.u32.totalorder %s4551_s7, %s6292_s3 }
  0x44   : > { %p4554_p10 = pnand %p4552_p4, %p5005_p8 }
  0x46   : > { %p4555_p11 = pneg %p4554_p10 }
  0x48   : > { %p4560_p13 = pnand %p4558_p12, %p4555_p11 }
  0x4a   : > { %4563 = shalt.err (!%p4560_p13)
}
  0x4b   : > { %s4564_s17 = scalar_lea.vmem %s4993_s20, 16  ;;  %s4571_s0 = scalar_lea.vmem %s4993_s20, 32 }
  0x4c   : > { %p4565_p0 = scmp.ne.s32.totalorder %s4993_s20, %s4564_s17  ;;  %p4572_p7 = scmp.lt.s32.totalorder %s4993_s20, %s4993_s20 }
  0x4d   : > { %p4573_p9 = scmp.lt.s32.totalorder %s4571_s0, %s4564_s17 }
  0x4e   : > { %p4567_p3 = pnand %p4565_p0, %p5005_p8 }
  0x4f   : > { %p4574_p4 = por %p4573_p9, %p4572_p7 }
  0x50   : > { %p4568_p5 = pneg %p4567_p3 }
  0x52   : > { %p4575_p10 = pnand %p4574_p4, %p4568_p5 }
  0x54   : > { %4578 = shalt.err (!%p4575_p10)
}
  0x55   : > { %4299 = dma.hbm_to_vmem [thread:$0]  (!%p4989_p6), %s6292_s3, 16, %s4993_s20, [#allocation11]  }
  0x56   : > { %s4579_s16 = scalar_lea.hbm %s6256_s5, 16 }
  0x57   : > { %p4580_p11 = scmp.ne.s32.totalorder %s6256_s5, %s4579_s16  ;;  %p4586_p0 = scmp.lt.u32.totalorder %s4579_s16, %s6256_s5 }
  0x59   : > { %p4582_p12 = pnand %p4580_p11, %p5005_p8 }
  0x5b   : > { %p4583_p13 = pneg %p4582_p12 }
  0x5d   : > { %p4588_p3 = pnand %p4586_p0, %p4583_p13 }
  0x5f   : > { %4591 = shalt.err (!%p4588_p3)
}
  0x60   : > { %s4592_s20 = scalar_lea.vmem %s4995_s22, 16  ;;  %s4599_s0 = scalar_lea.vmem %s4995_s22, 32 }
  0x61   : > { %p4593_p5 = scmp.ne.s32.totalorder %s4995_s22, %s4592_s20  ;;  %p4600_p4 = scmp.lt.s32.totalorder %s4995_s22, %s4995_s22 }
  0x62   : > { %p4601_p10 = scmp.lt.s32.totalorder %s4599_s0, %s4592_s20 }
  0x63   : > { %p4595_p7 = pnand %p4593_p5, %p5005_p8 }
  0x64   : > { %p4602_p11 = por %p4601_p10, %p4600_p4 }
  0x65   : > { %p4596_p9 = pneg %p4595_p7 }
  0x67   : > { %p4603_p12 = pnand %p4602_p11, %p4596_p9 }
  0x69   : > { %4606 = shalt.err (!%p4603_p12)
}
  0x6a   : > { %4305 = dma.hbm_to_vmem [thread:$0]  (!%p4989_p6), %s6256_s5, 16, %s4995_s22, [#allocation14]  }
  0x6b   : > { %s4862_s15 = smov [#allocation9]   ;;  %s4863_s16 = smov [#allocation12]  }
  0x6c   : > { %s249_s12 = sshll.u32 %s4862_s15, 4  ;;  %s270_s19 = sshll.u32 %s4863_s16, 4  ;;  %s250_s12 = int_to_ptr.vmem [resolvable:$true] %s249_s12  ;;  %s5077_s19 = int_to_ptr.vmem [resolvable:$true] %s270_s19 }
  0x6d   : > { %s6293_s2 = sld [smem:[#allocation29_spill]] }
  0x73   : > { %s4607_s17 = scalar_lea.hbm %s6293_s2, 16 }
  0x74   : > { %p4608_p13 = scmp.ne.s32.totalorder %s6293_s2, %s4607_s17  ;;  %p4614_p5 = scmp.lt.u32.totalorder %s4607_s17, %s6293_s2 }
  0x76   : > { %p4610_p0 = pnand %p4608_p13, %p5005_p8 }
  0x78   : > { %p4611_p3 = pneg %p4610_p0 }
  0x7a   : > { %p4616_p7 = pnand %p4614_p5, %p4611_p3 }
  0x7c   : > { %4619 = shalt.err (!%p4616_p7)
}
  0x7d   : > { %s4620_s14 = scalar_lea.vmem %s250_s12, 16  ;;  %s4627_s15 = scalar_lea.vmem %s250_s12, 32 }
  0x7e   : > { %p4621_p9 = scmp.ne.s32.totalorder %s250_s12, %s4620_s14  ;;  %p4628_p11 = scmp.lt.s32.totalorder %s250_s12, %s250_s12 }
  0x7f   : > { %p4629_p12 = scmp.lt.s32.totalorder %s4627_s15, %s4620_s14 }
  0x80   : > { %p4623_p4 = pnand %p4621_p9, %p5005_p8 }
  0x81   : > { %p4630_p2 = por %p4629_p12, %p4628_p11 }
  0x82   : > { %p4624_p10 = pneg %p4623_p4 }
  0x84   : > { %p4631_p1 = pnand %p4630_p2, %p4624_p10 }
  0x86   : > { %4634 = shalt.err (!%p4631_p1)
}
  0x87   : > { %4296 = dma.hbm_to_vmem [thread:$0]  (!%p4989_p6), %s6293_s2, 16, %s250_s12, [#allocation8]  }
  0x88   : > { %s6294_s4 = sld [smem:[#allocation31_spill]] }
  0x8e   : > { %s4635_s20 = scalar_lea.hbm %s6294_s4, 9216 }
  0x8f   : > { %p4636_p13 = scmp.ne.s32.totalorder %s6294_s4, %s4635_s20  ;;  %p4642_p1 = scmp.lt.u32.totalorder %s4635_s20, %s6294_s4 }
  0x91   : > { %p4638_p0 = pnand %p4636_p13, %p5005_p8 }
  0x93   : > { %p4639_p3 = pneg %p4638_p0 }
  0x95   : > { %p4644_p2 = pnand %p4642_p1, %p4639_p3 }
  0x97   : > { %4647 = shalt.err (!%p4644_p2)
}
  0x98   : > { %s4648_s12 = scalar_lea.vmem %s5077_s19, 9216  ;;  %p4656_p4 = scmp.lt.s32.totalorder %s5077_s19, %s5077_s19 }
  0x99   : > { %p4649_p5 = scmp.ne.s32.totalorder %s5077_s19, %s4648_s12  ;;  %p4657_p10 = scmp.lt.s32.totalorder %s4648_s12, %s4648_s12 }
  0x9b   : > { %p4651_p7 = pnand %p4649_p5, %p5005_p8  ;;  %p4658_p11 = por %p4657_p10, %p4656_p4 }
  0x9d   : > { %p4652_p9 = pneg %p4651_p7 }
  0x9f   : > { %p4659_p12 = pnand %p4658_p11, %p4652_p9 }
  0xa1   : > { %4662 = shalt.err (!%p4659_p12)
}
  0xa2   : > { %4302 = dma.hbm_to_vmem [thread:$0]  (!%p4989_p6), %s6294_s4, 9216, %s5077_s19, [#allocation11], %s6268_s8, %s6268_s8, %s6269_s23  }
  0xa3   : > { %s4864_s21 = smov [#allocation15]   ;;  %s4663_s0 = scalar_lea.hbm %s6257_s6, 16 }
  0xa4   : > { %s295_s7 = sshll.u32 %s4864_s21, 4  ;;  %p4664_p13 = scmp.ne.s32.totalorder %s6257_s6, %s4663_s0  ;;  %s296_s7 = int_to_ptr.vmem [resolvable:$true] %s295_s7 }
  0xa5   : > { %p4670_p1 = scmp.lt.u32.totalorder %s4663_s0, %s6257_s6 }
  0xa6   : > { %p4666_p0 = pnand %p4664_p13, %p5005_p8 }
  0xa8   : > { %p4667_p3 = pneg %p4666_p0 }
  0xaa   : > { %p4672_p2 = pnand %p4670_p1, %p4667_p3 }
  0xac   : > { %4675 = shalt.err (!%p4672_p2)
}
  0xad   : > { %s4676_s19 = scalar_lea.vmem %s296_s7, 16  ;;  %s4683_s15 = scalar_lea.vmem %s296_s7, 32 }
  0xae   : > { %p4677_p5 = scmp.ne.s32.totalorder %s296_s7, %s4676_s19  ;;  %p4684_p4 = scmp.lt.s32.totalorder %s296_s7, %s296_s7 }
  0xaf   : > { %p4685_p10 = scmp.lt.s32.totalorder %s4683_s15, %s4676_s19 }
  0xb0   : > { %p4679_p7 = pnand %p4677_p5, %p5005_p8 }
  0xb1   : > { %p4686_p11 = por %p4685_p10, %p4684_p4 }
  0xb2   : > { %p4680_p9 = pneg %p4679_p7 }
  0xb4   : > { %p4687_p12 = pnand %p4686_p11, %p4680_p9 }
  0xb6   : > { %4690 = shalt.err (!%p4687_p12)
}
  0xb7   : > { %4308 = dma.hbm_to_vmem [thread:$0]  (!%p4989_p6), %s6257_s6, 16, %s296_s7, [#allocation14]  }
  0xb8   : > { %s3723_s30 = sadd.s32 4294967294, %s4855_s11   ;;  %s35_s18 = sadd.s32 1, %s4847_s9 }
  0xb9   : > { %s6295_s17 = sld [smem:[#allocation22_spill]]  ;;  %s38_s20 = sadd.s32 1, %s4851_s10 }
  0xba   : > { %p36_p8 = scmp.ge.s32.totalorder %s35_s18, 2  ;;  %s45_s0 = sadd.s32 1, %s4835_s29 }
  0xbb   : > { %p52_p13 = scmp.ne.s32.totalorder %s4835_s29, %s4831_s28  ;;  %p53_p0 = scmp.eq.s32.totalorder %s4855_s11, 0 }
  0xbc   : > { %s6354_s18 = smov (%p36_p8, %s35_s18), 0  ;;  %s6296_s24 = sld [smem:[#allocation25_spill]] }
  0xbd   : > { %s6356_s20 = smov (!%p36_p8, %s38_s20), %s4851_s10  ;;  %p5151_p3 = por %p53_p0, %p52_p13 }
  0xbe   : > { %p58_p6 = scmp.ne.s32.totalorder %s4831_s28, %s4827_s27  ;;  %p40_p1 = scmp.ge.s32.totalorder %s6356_s20, 2 }
  0xbf   : > { %s195_s22 = ssub.s32 %s4847_s9, %s6354_s18  ;;  %p6298_p2 = scmp.ne.s32.totalorder %s6284_s13, 0 }
  0xc0   : > { %s199_s12 = sadd.s32 1, %s4823_s26  ;;  %s6358_s20 = smov (%p40_p1, %s6356_s20), 0 }
  0xc1   : > { %p5161_p5 = por %p6298_p2, %p58_p6  ;;  %p209_p7 = scmp.ne.s32.totalorder %s4823_s26, %s4819_s25 }
  0xc2   : > { %p215_p9 = scmp.ne.s32.totalorder %s4819_s25, %s6295_s17  ;;  %s42_s19 = ssub.s32 %s4851_s10, %s6358_s20 }
  0xc3   : > { %p216_p4 = scmp.eq.s32.totalorder %s3723_s30, 3  ;;  %p43_p10 = scmp.eq.s32.totalorder %s42_s19, 0 }
  0xc4   : > { %s196_s27 = sor.u32 %s195_s22, %s42_s19  ;;  %p6300_p12 = scmp.ne.s32.totalorder %s6296_s24, 0 }
  0xc5   : > { %p197_p11 = scmp.eq.s32.totalorder %s196_s27, 0  ;;  %p5186_p13 = por %p216_p4, %p215_p9 }
  0xc6   : > { %p5176_p8 = por %p6300_p12, %p209_p7  ;;  %p4323_p0 = scmp.lt.s32.totalorder %s4855_s11, 4 }
  0xc7   : > { %s5181_s16 = scalar_select %p43_p10, %s4835_s29, %s45_s0  }
  0xc8   : > { %s6301_s15 = scalar_select %p5176_p8, 1, 0 }
  0xc9   : > { %s5184_s21 = scalar_select %p197_p11, %s4823_s26, %s199_s12  }
  0xca   : > { %s6302_s8 = scalar_select %p5186_p13, 1, 0 }
  0xcb   : > { %s306_s17 = sand.u32 1, %s4835_s29   ;;  %s4260_s23 = smul.u32 2304, %s4851_s10 }
  0xcc   : > { %s4259_s30 = smul.u32 144, %s306_s17  ;;  %p5195_p6 = pnand %p4323_p0, %p5151_p3 }
  0xcd   : > { %s6304_s27 = sld [smem:[#allocation27_spill]]  ;;  %s5206_s7 = scalar_lea.sflag [#allocation5], %s306_s17 }
  0xce   : > { %s310_s12 = scalar_lea.vmem [#allocation4], %s4259_s30  ;;  %p4693_p1 = pneg %p5195_p6 }
  0xcf   : > { %s317_s2 = sshll.u32 %s310_s12, 4  ;;  %s5204_s2 = int_to_ptr.vmem [resolvable:$true] %s317_s2 }
  0xd3   : > { %s6305_s1 = smov %s6304_s27  ;;  %s5202_s0 = scalar_lea.hbm %s6304_s27, %s4260_s23 }
  0xd4   : > { %s4691_s3 = scalar_lea.hbm %s5202_s0, 2304  ;;  %s4696_s19 = scalar_lea.hbm %s6305_s1, 4608 }
  0xd5   : > { %p4692_p3 = scmp.ne.s32.totalorder %s5202_s0, %s4691_s3  ;;  %p4697_p9 = scmp.lt.u32.totalorder %s5202_s0, %s6305_s1 }
  0xd6   : > { %p4698_p4 = scmp.lt.u32.totalorder %s4696_s19, %s4691_s3  ;;  %p4700_p11 = scmp.lt.u32.totalorder %s4691_s3, %s5202_s0 }
  0xd7   : > { %p4694_p2 = pnand %p4693_p1, %p4692_p3 }
  0xd8   : > { %p4699_p10 = por %p4698_p4, %p4697_p9 }
  0xd9   : > { %p4695_p7 = pneg %p4694_p2 }
  0xda   : > { %p4701_p12 = por %p4700_p11, %p4699_p10 }
  0xdc   : > { %p4702_p0 = pnand %p4701_p12, %p4695_p7 }
  0xde   : > { %4705 = shalt.err (!%p4702_p0)
}
  0xdf   : > { %s4706_s17 = scalar_lea.vmem %s5204_s2, 2304  ;;  %s4865_s30 = smov [#allocation4]  }
  0xe0   : > { %p4707_p3 = scmp.ne.s32.totalorder %s5204_s2, %s4706_s17  ;;  %s4711_s12 = sshll.u32 %s4865_s30, 4  ;;  %s4712_s12 = int_to_ptr.vmem [resolvable:$false] %s4711_s12 }
  0xe1   : > { %s4713_s4 = scalar_lea.vmem %s4712_s12, 4608  ;;  %p4714_p8 = scmp.lt.s32.totalorder %s5204_s2, %s4712_s12 }
  0xe2   : > { %p4709_p2 = pnand %p4707_p3, %p4693_p1  ;;  %p4715_p9 = scmp.lt.s32.totalorder %s4713_s4, %s4706_s17 }
  0xe4   : > { %p4710_p13 = pneg %p4709_p2  ;;  %p4716_p4 = por %p4715_p9, %p4714_p8 }
  0xe6   : > { %p4717_p10 = pnand %p4716_p4, %p4710_p13 }
  0xe8   : > { %4720 = shalt.err (!%p4717_p10)
}
  0xe9   : > { %s6306_s3 = smov 4   ;;  %s6307_s23 = smov 64  }
  0xea   : > { %4312 = dma.hbm_to_vmem [thread:$0]  (!%p5195_p6), %s5202_s0, 2304, %s5204_s2, %s5206_s7, %s6307_s23, %s6307_s23, %s6306_s3  }
  0xeb   : > { %s6308_s24 = sld [smem:[#allocation26_spill]] }
  0xf1   : > { %p6309_p1 = scmp.ne.s32.totalorder %s6308_s24, 0 }
  0xf2   : > { %s331_s19 = sand.u32 (!%p6309_p1), 1, %s4831_s28  }
  0xf3   : > { %329 = sbr.rel (%p6309_p1) target bundleno = 1017 (0x3f9), region = 48  ;;  %s332_s17 = scalar_lea.sflag (!%p6309_p1), [#allocation5], %s331_s19 }
  0xf4   : > { %s5240_s27 = smul.u32 (!%p6309_p1), 144, %s331_s19 }
  0xf6   : > { %s335_s30 = scalar_lea.vmem (!%p6309_p1), [#allocation4], %s5240_s27 }
  0xfa   : > { %4794 = dma.done.wait (%p5161_p5), %s332_s17, 2304  }
  0xfb   : > { %4796 = vsyncadd (%p5161_p5), %s332_s17, 4294964992  ;;  %p6310_p8 = scmp.ne.s32.totalorder %s6284_s13, 0 }
  0xfd   : > { %4798 = dma.done.wait (%p6310_p8), [#allocation8], 1040  }
  0xfe   : > { %4800 = vsyncadd (%p6310_p8), [#allocation8], 4294966256 }
  0xff   : > { %4802 = dma.done.wait (%p6310_p8), [#allocation11], 9232  }
 0x100   : > { %4804 = vsyncadd (%p6310_p8), [#allocation11], 4294958064 }
 0x101   : > { %4806 = dma.done.wait (%p6310_p8), [#allocation14], 32  }
 0x102   : > { %4808 = vsyncadd (%p6310_p8), [#allocation14], 4294967264  ;;  %s6311_s2 = sld [smem:[#allocation23_spill]]  ;;  %s387_s14 = sand.u32 1, %s4819_s25   ;;  %v4866_v0 = vmov 0   ;;  %v4433_v1 = vld [vmem:[#allocation7] sm:$0xff]  }
 0x103   : > { %832 = vst [vmem:[#allocation2] sm:$0xf] %v4866_v0  ;;  %833 = vst [vmem:[#allocation2 + $0x50] sm:$0xf0] %v4866_v0  ;;  %s5264_s22 = sshll.u32 %s387_s14, 7  ;;  %v4434_v2 = vld [vmem:[#allocation7 + $0x8] sm:$0xff]   ;;  %4191 = vmatprep.subr.bf16.mxu0 %v4433_v1 }
 0x104   : > { %4192 = vmatpush3.bf16.msra.mxu0 %v4433_v1  ;;  %v4435_v3 = vld [vmem:[#allocation7 + $0x10] sm:$0xff]   ;;  %v4436_v4 = vld [vmem:[#allocation7 + $0x18] sm:$0xff]   ;;  %v4437_v6 = vld [vmem:[#allocation7 + $0x20] sm:$0xff]   ;;  %vm790_vm4 = vcmask 1043456   ;;  %s5337_s4 = scalar_lea.vmem [#allocation16], %s5264_s22 }
 0x105   : > { %4193 = vmatprep.subr.bf16.mxu0 %v4434_v2  ;;  %v4438_v7 = vld [vmem:[#allocation7 + $0x28] sm:$0xff]   ;;  %v4439_v8 = vld [vmem:[#allocation7 + $0x30] sm:$0xff]   ;;  %v4440_v9 = vld [vmem:[#allocation7 + $0x38] sm:$0xff]  }
 0x106   : > { %v5283_v19 = vld [vmem:[#allocation9] ss:$0 sm:$0xff]  ;;  %v5285_v21 = vld [vmem:[#allocation10] ss:$0 sm:$0xff] }
 0x108   : > { %s3741_s0 = sshll.u32 %s6311_s2, 7  ;;  %4194 = vmatpush3.bf16.msra.mxu0 %v4434_v2  ;;  %p3763_p5 = scmp.ne.s32.totalorder %s6311_s2, 0 }
 0x109   : > { %s395_s7 = sshra.s32 %s3741_s0, 3  ;;  %4195 = vmatprep.subr.bf16.mxu0 %v4435_v3 }
 0x10a   : > { %s3742_s13 = sshll.u32 %s395_s7, 2 }
 0x10b   : > { %s5271_s12 = scalar_lea.vmem %s335_s30, %s3742_s13 [#allocation4] }
 0x10c   : > { %v4441_v5 = vld [vmem:[%s5271_s12] sm:$0xff]   ;;  %4196 = vmatpush3.bf16.msra.mxu0 %v4435_v3  ;;  %v4442_v10 = vld [vmem:[%s5271_s12 + $0x8] sm:$0xff]   ;;  %v4443_v11 = vld [vmem:[%s5271_s12 + $0x10] sm:$0xff]  }
 0x10d   : > { %4207 = vmatprep.mubr.bf16.mxu0 %v4441_v5  ;;  %4197 = vmatprep.subr.bf16.mxu0 %v4436_v4  ;;  %v4444_v12 = vld [vmem:[%s5271_s12 + $0x18] sm:$0xff]   ;;  %v4445_v13 = vld [vmem:[%s5271_s12 + $0x20] sm:$0xff]   ;;  %v4446_v14 = vld [vmem:[%s5271_s12 + $0x28] sm:$0xff]  }
 0x10e   : > { %v4447_v15 = vld [vmem:[%s5271_s12 + $0x30] sm:$0xff]   ;;  %v4448_v16 = vld [vmem:[%s5271_s12 + $0x38] sm:$0xff]   ;;  %v4449_v17 = vld [vmem:[%s5271_s12 + $0x40] sm:$0xff]  }
 0x10f   : > { %v4450_v18 = vld [vmem:[%s5271_s12 + $0x48] sm:$0xff]  }
 0x110   : > { %4198 = vmatpush3.bf16.msra.mxu0 %v4436_v4 }
 0x111   : > { %4199 = vmatprep.subr.bf16.mxu0 %v4437_v6 }
 0x114   : > { %4200 = vmatpush3.bf16.msra.mxu0 %v4437_v6 }
 0x115   : > { %4201 = vmatprep.subr.bf16.mxu0 %v4438_v7 }
 0x118   : > { %4202 = vmatpush3.bf16.msra.mxu0 %v4438_v7 }
 0x119   : > { %4203 = vmatprep.subr.bf16.mxu0 %v4439_v8 }
 0x11c   : > { %4204 = vmatpush3.bf16.msra.mxu0 %v4439_v8 }
 0x11d   : > { %4205 = vmatprep.subr.bf16.mxu0 %v4440_v9 }
 0x120   : > { %4206 = vmatpush3.bf16.msra.mxu0 %v4440_v9 }
 0x123   : > { %4208 = vmatmul.mubr.bf16.vlgmr.msra.gmra.mrb[0].mxu0 %v4442_v10 }
 0x124   : > { %4211 = vmatprep.mubr.bf16.mxu0 %v4443_v11 }
 0x12b   : > { %4212 = vmatmul.mubr.bf16.gmra.mrb[4].mxu0 %v4444_v12 }
 0x12c   : > { %4215 = vmatprep.mubr.bf16.mxu0 %v4445_v13 }
 0x133   : > { %4216 = vmatmul.mubr.bf16.gmra.mrb[8].mxu0 %v4446_v14 }
 0x134   : > { %4219 = vmatprep.mubr.bf16.mxu0 %v4447_v15 }
 0x13b   : > { %4220 = vmatmul.mubr.bf16.gmra.mrb[12].mxu0 %v4448_v16 }
 0x13c   : > { %4223 = vmatprep.mubr.bf16.mxu0 %v4449_v17 }
 0x143   : > { %4224 = vmatmul.mubr.bf16.gmra.mrb[16].mxu0 %v4450_v18 }
 0x1f6   : > { %v4209_v20 = vpop.f32.mrb[0].mxu0 }
 0x1f7   : > { %v665_v22 = vmul.f32 %v4209_v20, %v5283_v19  ;;  %v577_v23 = vpop.f32.mrb[1].mxu0 }
 0x1f8   : > { %v663_v24 = vmul.f32 %v5283_v19, %v577_v23  ;;  %v4210_v25 = vpop.f32.mrb[2].mxu0 }
 0x1f9   : > { %v692_v26 = vadd.f32 %v5285_v21, %v665_v22  ;;  %v666_v27 = vmul.f32 %v4210_v25, %v5283_v19  ;;  %v580_v28 = vpop.f32.mrb[3].mxu0 }
 0x1fa   : > { %v690_v29 = vadd.f32 %v5285_v21, %v663_v24  ;;  %v664_v30 = vmul.f32 %v5283_v19, %v580_v28 }
 0x1fb   : > { %v732_v31 = vmul.f32 0.1, %v692_v26  ;;  %v693_v32 = vadd.f32 %v5285_v21, %v666_v27  ;;  %vm712_vm0 = vcmp.ge.f32.partialorder %v692_v26, 0.0 }
 0x1fc   : > { %v730_v33 = vmul.f32 0.1, %v690_v29  ;;  %v691_v34 = vadd.f32 %v5285_v21, %v664_v30  ;;  %vm710_vm1 = vcmp.ge.f32.partialorder %v690_v29, 0.0 }
 0x1fd   : > { %vm713_vm2 = vcmp.ge.f32.partialorder %v693_v32, 0.0  ;;  %v733_v35 = vmul.f32 0.1, %v693_v32  ;;  %v752_v38 = vsel %vm712_vm0, %v692_v26, %v732_v31 }
 0x1fe   : > { %vm711_vm3 = vcmp.ge.f32.partialorder %v691_v34, 0.0  ;;  %v731_v36 = vmul.f32 0.1, %v691_v34  ;;  %v4213_v37 = vpop.f32.mrb[4].mxu0  ;;  %v750_v42 = vsel %vm710_vm1, %v690_v29, %v730_v33 }
 0x1ff   : > { %v753_v39 = vsel %vm713_vm2, %v693_v32, %v733_v35  ;;  %v669_v40 = vmul.f32 %v4213_v37, %v5283_v19  ;;  %v593_v41 = vpop.f32.mrb[5].mxu0 }
 0x200   : > { %v771_v43 = vpack.c.bf16 %v753_v39, %v752_v38  ;;  %v751_v44 = vsel %vm711_vm3, %v691_v34, %v731_v36  ;;  %v667_v45 = vmul.f32 %v5283_v19, %v593_v41  ;;  %v4214_v46 = vpop.f32.mrb[6].mxu0 }
 0x201   : > { %v770_v47 = vpack.c.bf16 %v751_v44, %v750_v42  ;;  %v696_v48 = vadd.f32 %v5285_v21, %v669_v40  ;;  %v670_v49 = vmul.f32 %v4214_v46, %v5283_v19  ;;  %v596_v50 = vpop.f32.mrb[7].mxu0 }
 0x202   : > { %v792_v51 = vrot.slane %v771_v43, 4  ;;  %v694_v52 = vadd.f32 %v5285_v21, %v667_v45  ;;  %v668_v53 = vmul.f32 %v5283_v19, %v596_v50 }
 0x203   : > { %v791_v54 = vrot.slane %v770_v47, 4  ;;  %v736_v55 = vmul.f32 0.1, %v696_v48  ;;  %v697_v56 = vadd.f32 %v5285_v21, %v670_v49  ;;  %vm716_vm5 = vcmp.ge.f32.partialorder %v696_v48, 0.0 }
 0x204   : > { %v734_v57 = vmul.f32 0.1, %v694_v52  ;;  %v695_v58 = vadd.f32 %v5285_v21, %v668_v53  ;;  %vm714_vm6 = vcmp.ge.f32.partialorder %v694_v52, 0.0 }
 0x205   : > { %v793_v59 = vsel %vm790_vm4, %v791_v54, %v792_v51  ;;  %821 = vst [vmem:[#allocation2] sm:$0xf0] %v791_v54  ;;  %vm717_vm7 = vcmp.ge.f32.partialorder %v697_v56, 0.0  ;;  %v737_v60 = vmul.f32 0.1, %v697_v56  ;;  %v756_v63 = vsel %vm716_vm5, %v696_v48, %v736_v55 }
 0x206   : > { %822 = vst [vmem:[#allocation2 + $0x8] sm:$0xff] %v793_v59  ;;  %vm715_vm8 = vcmp.ge.f32.partialorder %v695_v58, 0.0  ;;  %v735_v61 = vmul.f32 0.1, %v695_v58  ;;  %v4217_v62 = vpop.f32.mrb[8].mxu0  ;;  %v754_v4 = vsel %vm714_vm6, %v694_v52, %v734_v57 }
 0x207   : > { %v757_v1 = vsel %vm717_vm7, %v697_v56, %v737_v60  ;;  %v673_v2 = vmul.f32 %v4217_v62, %v5283_v19  ;;  %v609_v3 = vpop.f32.mrb[9].mxu0 }
 0x208   : > { %v773_v5 = vpack.c.bf16 %v757_v1, %v756_v63  ;;  %v755_v6 = vsel %vm715_vm8, %v695_v58, %v735_v61  ;;  %v671_v7 = vmul.f32 %v5283_v19, %v609_v3  ;;  %v4218_v8 = vpop.f32.mrb[10].mxu0 }
 0x209   : > { %v772_v9 = vpack.c.bf16 %v755_v6, %v754_v4  ;;  %v700_v10 = vadd.f32 %v5285_v21, %v673_v2  ;;  %v674_v11 = vmul.f32 %v4218_v8, %v5283_v19  ;;  %v612_v12 = vpop.f32.mrb[11].mxu0 }
 0x20a   : > { %v796_v13 = vrot.slane %v773_v5, 4  ;;  %v698_v14 = vadd.f32 %v5285_v21, %v671_v7  ;;  %v672_v15 = vmul.f32 %v5283_v19, %v612_v12 }
 0x20b   : > { %v794_v16 = vrot.slane %v772_v9, 4  ;;  %v740_v17 = vmul.f32 0.1, %v700_v10  ;;  %v701_v18 = vadd.f32 %v5285_v21, %v674_v11  ;;  %vm720_vm9 = vcmp.ge.f32.partialorder %v700_v10, 0.0 }
 0x20c   : > { %v738_v20 = vmul.f32 0.1, %v698_v14  ;;  %v699_v22 = vadd.f32 %v5285_v21, %v672_v15  ;;  %vm718_vm10 = vcmp.ge.f32.partialorder %v698_v14, 0.0 }
 0x20d   : > { %v795_v23 = vsel %vm790_vm4, %v792_v51, %v794_v16  ;;  %v797_v24 = vsel %vm790_vm4, %v794_v16, %v796_v13  ;;  %vm721_vm11 = vcmp.ge.f32.partialorder %v701_v18, 0.0  ;;  %v741_v25 = vmul.f32 0.1, %v701_v18 }
 0x20e   : > { %823 = vst [vmem:[#allocation2 + $0x10] sm:$0xff] %v795_v23  ;;  %824 = vst [vmem:[#allocation2 + $0x18] sm:$0xff] %v797_v24  ;;  %vm719_vm12 = vcmp.ge.f32.partialorder %v699_v22, 0.0  ;;  %v739_v26 = vmul.f32 0.1, %v699_v22  ;;  %v4221_v27 = vpop.f32.mrb[12].mxu0  ;;  %v760_v28 = vsel %vm720_vm9, %v700_v10, %v740_v17  ;;  %v758_v31 = vsel %vm718_vm10, %v698_v14, %v738_v20 }
 0x20f   : > { %v677_v29 = vmul.f32 %v4221_v27, %v5283_v19  ;;  %v625_v30 = vpop.f32.mrb[13].mxu0  ;;  %v761_v32 = vsel %vm721_vm11, %v701_v18, %v741_v25 }
 0x210   : > { %v759_v33 = vsel %vm719_vm12, %v699_v22, %v739_v26  ;;  %v675_v34 = vmul.f32 %v5283_v19, %v625_v30  ;;  %v4222_v35 = vpop.f32.mrb[14].mxu0  ;;  %v775_v36 = vpack.c.bf16 %v761_v32, %v760_v28  ;;  %v4867_v26 = vmov (!%p3763_p5), 0  }
 0x211   : > { %v774_v37 = vpack.c.bf16 %v759_v33, %v758_v31  ;;  %v704_v38 = vadd.f32 %v5285_v21, %v677_v29  ;;  %v678_v39 = vmul.f32 %v4222_v35, %v5283_v19  ;;  %v628_v40 = vpop.f32.mrb[15].mxu0  ;;  %838 = vst [vmem:[#allocation2] sm:$0xf0] (!%p3763_p5), %v4867_v26  ;;  %839 = vst [vmem:[#allocation2 + $0x8] sm:$0xf] (!%p3763_p5), %v4867_v26 }
 0x212   : > { %v702_v41 = vadd.f32 %v5285_v21, %v675_v34  ;;  %v676_v42 = vmul.f32 %v5283_v19, %v628_v40  ;;  %v800_v43 = vrot.slane %v775_v36, 4 }
 0x213   : > { %v798_v44 = vrot.slane %v774_v37, 4  ;;  %v744_v45 = vmul.f32 0.1, %v704_v38  ;;  %v705_v47 = vadd.f32 %v5285_v21, %v678_v39  ;;  %vm724_vm13 = vcmp.ge.f32.partialorder %v704_v38, 0.0 }
 0x214   : > { %v742_v46 = vmul.f32 0.1, %v702_v41  ;;  %v703_v48 = vadd.f32 %v5285_v21, %v676_v42  ;;  %vm722_vm14 = vcmp.ge.f32.partialorder %v702_v41, 0.0 }
 0x215   : > { %v799_v49 = vsel %vm790_vm4, %v796_v13, %v798_v44  ;;  %v801_v50 = vsel %vm790_vm4, %v798_v44, %v800_v43  ;;  %vm725_vm15 = vcmp.ge.f32.partialorder %v705_v47, 0.0  ;;  %v745_v51 = vmul.f32 0.1, %v705_v47 }
 0x216   : > { %825 = vst [vmem:[#allocation2 + $0x20] sm:$0xff] %v799_v49  ;;  %826 = vst [vmem:[#allocation2 + $0x28] sm:$0xff] %v801_v50  ;;  %vm723_vm0 = vcmp.ge.f32.partialorder %v703_v48, 0.0  ;;  %v4225_v52 = vpop.f32.mrb[16].mxu0  ;;  %v743_v53 = vmul.f32 0.1, %v703_v48  ;;  %v764_v56 = vsel %vm724_vm13, %v704_v38, %v744_v45  ;;  %v762_v57 = vsel %vm722_vm14, %v702_v41, %v742_v46 }
 0x217   : > { %v681_v54 = vmul.f32 %v4225_v52, %v5283_v19  ;;  %v641_v55 = vpop.f32.mrb[17].mxu0  ;;  %v765_v58 = vsel %vm725_vm15, %v705_v47, %v745_v51 }
 0x218   : > { %v679_v59 = vmul.f32 %v5283_v19, %v641_v55  ;;  %v4226_v60 = vpop.f32.mrb[18].mxu0  ;;  %v777_v61 = vpack.c.bf16 %v765_v58, %v764_v56  ;;  %v763_v62 = vsel %vm723_vm0, %v703_v48, %v743_v53 }
 0x219   : > { %v708_v63 = vadd.f32 %v5285_v21, %v681_v54  ;;  %v682_v1 = vmul.f32 %v4226_v60, %v5283_v19  ;;  %v644_v2 = vpop.f32.mrb[19].mxu0  ;;  %v776_v3 = vpack.c.bf16 %v763_v62, %v762_v57 }
 0x21a   : > { %v706_v4 = vadd.f32 %v5285_v21, %v679_v59  ;;  %v680_v5 = vmul.f32 %v5283_v19, %v644_v2  ;;  %v804_v6 = vrot.slane %v777_v61, 4 }
 0x21b   : > { %v748_v7 = vmul.f32 0.1, %v708_v63  ;;  %v709_v8 = vadd.f32 %v5285_v21, %v682_v1  ;;  %v802_v9 = vrot.slane %v776_v3, 4  ;;  %vm728_vm1 = vcmp.ge.f32.partialorder %v708_v63, 0.0 }
 0x21c   : > { %v707_v10 = vadd.f32 %v5285_v21, %v680_v5  ;;  %v746_v11 = vmul.f32 0.1, %v706_v4  ;;  %vm726_vm3 = vcmp.ge.f32.partialorder %v706_v4, 0.0 }
 0x21d   : > { %vm729_vm2 = vcmp.ge.f32.partialorder %v709_v8, 0.0  ;;  %v749_v12 = vmul.f32 0.1, %v709_v8  ;;  %v803_v13 = vsel %vm790_vm4, %v800_v43, %v802_v9  ;;  %v805_v14 = vsel %vm790_vm4, %v802_v9, %v804_v6 }
 0x21e   : > { %vm727_vm5 = vcmp.ge.f32.partialorder %v707_v10, 0.0  ;;  %827 = vst [vmem:[#allocation2 + $0x30] sm:$0xff] %v803_v13  ;;  %828 = vst [vmem:[#allocation2 + $0x38] sm:$0xff] %v805_v14  ;;  %v768_v19 = vsel %vm728_vm1, %v708_v63, %v748_v7  ;;  %v747_v16 = vmul.f32 0.1, %v707_v10  ;;  %v766_v18 = vsel %vm726_vm3, %v706_v4, %v746_v11 }
 0x21f   : > { %v769_v15 = vsel %vm729_vm2, %v709_v8, %v749_v12 }
 0x220   : > { %v779_v17 = vpack.c.bf16 %v769_v15, %v768_v19  ;;  %v767_v20 = vsel %vm727_vm5, %v707_v10, %v747_v16  ;;  %837 = sbr.rel (%p3763_p5) target bundleno = 551 (0x227), region = 80 }
 0x221   : > { %v778_v21 = vpack.c.bf16 %v767_v20, %v766_v18 }
 0x222   : > { %v808_v22 = vrot.slane %v779_v17, 4 }
 0x223   : > { %v806_v23 = vrot.slane %v778_v21, 4 }
 0x224   : > { %831 = vst [vmem:[#allocation2 + $0x50] sm:$0xf] %v808_v22 }
 0x225   : > { %v807_v24 = vsel %vm790_vm4, %v804_v6, %v806_v23  ;;  %v809_v25 = vsel %vm790_vm4, %v806_v23, %v808_v22 }
 0x226   : > { %829 = vst [vmem:[#allocation2 + $0x40] sm:$0xff] %v807_v24  ;;  %830 = vst [vmem:[#allocation2 + $0x48] sm:$0xff] %v809_v25 }
 0x227 PF: > { %s6312_s3 = sld [smem:[#allocation23_spill]] }
 0x22d   : > { %p3764_p13 = scmp.ne.s32.totalorder %s6312_s3, 1 }
 0x22e   : > { %v4868_v27 = vmov (!%p3764_p13), 0  }
 0x22f   : > { %843 = sbr.rel (%p3764_p13) target bundleno = 566 (0x236), region = 84  ;;  %844 = vst [vmem:[#allocation2 + $0x48] sm:$0xf0] (!%p3764_p13), %v4868_v27  ;;  %845 = vst [vmem:[#allocation2 + $0x50] sm:$0xf] (!%p3764_p13), %v4868_v27 }
 0x236 PF: > { %v4451_v28 = vld [vmem:[#allocation12 + $0x40] sm:$0xff]   ;;  %v4455_v32 = vld [vmem:[#allocation12 + $0x48] sm:$0xff]   ;;  %v846_v36 = vlaneseq  ;;  %v4459_v37 = vld [vmem:[#allocation12 + $0x50] sm:$0xff]   ;;  %vm4869_vm13 = vmmov 1   ;;  %vm1184_vm0 = vsmask.f32 3328 }
 0x237   : > { %v4452_v29 = vld [vmem:[#allocation12 + $0xc0] sm:$0xff]   ;;  %3919 = vmatprep.subr.bf16.mxu1 %v4451_v28  ;;  %v4456_v33 = vld [vmem:[#allocation12 + $0xc8] sm:$0xff]   ;;  %v4460_v38 = vld [vmem:[#allocation12 + $0xd0] sm:$0xff]   ;;  %s6337_s23 = sld [smem:[#allocation23_spill]]  ;;  %s3489_s24 = sadd.s32 16, %s3741_s0 }
 0x238   : > { %v4453_v30 = vld [vmem:[#allocation12] sm:$0xff]   ;;  %3983 = vmatprep.subr.bf16.mxu0 %v4452_v29  ;;  %v4457_v34 = vld [vmem:[#allocation12 + $0x8] sm:$0xff]   ;;  %v4461_v39 = vld [vmem:[#allocation12 + $0x10] sm:$0xff]   ;;  %v5341_v41 = vshrl.u32 %v846_v36, 7  ;;  %s3490_s19 = sshra.s32 %s3489_s24, 3  ;;  %s6338_s27 = sld [smem:[#allocation24_spill]] }
 0x239   : > { %v4454_v31 = vld [vmem:[#allocation12 + $0x80] sm:$0xff]   ;;  %3920 = vmatpush3.bf16.msra.mxu1 %v4453_v30  ;;  %v4458_v35 = vld [vmem:[#allocation12 + $0x88] sm:$0xff]   ;;  %v4462_v40 = vld [vmem:[#allocation12 + $0x90] sm:$0xff]   ;;  %s3855_s17 = sshll.u32 %s3490_s19, 2  ;;  %s3574_s7 = sshll.u32 %s5337_s4, 4  ;;  %s6178_s7 = int_to_ptr.vmem [resolvable:$true] %s3574_s7 }
 0x23a   : > { %3984 = vmatpush3.bf16.msra.mxu0 %v4454_v31  ;;  %3921 = vmatprep.subr.bf16.mxu1 %v4455_v32  ;;  %v4463_v42 = vld [vmem:[#allocation12 + $0x58] sm:$0xff]   ;;  %v849_v46 = vadd.s32 16, %v5341_v41  ;;  %v4467_v47 = vld [vmem:[#allocation12 + $0x60] sm:$0xff]   ;;  %v867_v48 = vand.u32 15, %v5341_v41  ;;  %v848_v50 = vadd.s32 8, %v5341_v41  ;;  %v4471_v54 = vld [vmem:[#allocation12 + $0x68] sm:$0xff]   ;;  %s6094_s2 = scalar_lea.vmem %s335_s30, %s3855_s17 [#allocation4] }
 0x23b   : > { %3985 = vmatprep.subr.bf16.mxu0 %v4456_v33  ;;  %v4464_v43 = vld [vmem:[#allocation12 + $0xd8] sm:$0xff]   ;;  %v4468_v49 = vld [vmem:[#allocation12 + $0xe0] sm:$0xff]   ;;  %v850_v55 = vadd.s32 24, %v5341_v41  ;;  %v4472_v56 = vld [vmem:[#allocation12 + $0xe8] sm:$0xff]   ;;  %v851_v60 = vadd.s32 32, %v5341_v41  ;;  %v852_v63 = vadd.s32 40, %v5341_v41 }
 0x23c   : > { %v4465_v44 = vld [vmem:[#allocation12 + $0x18] sm:$0xff]   ;;  %v4469_v51 = vld [vmem:[#allocation12 + $0x20] sm:$0xff]   ;;  %v881_v53 = vand.u32 15, %v849_v46  ;;  %vm5347_vm6 = vcmp.ge.s32.totalorder %v867_v48, 1  ;;  %v874_v58 = vand.u32 15, %v848_v50  ;;  %v4473_v59 = vld [vmem:[#allocation12 + $0x28] sm:$0xff]  }
 0x23d   : > { %3922 = vmatpush3.bf16.msra.mxu1 %v4457_v34  ;;  %v4466_v45 = vld [vmem:[#allocation12 + $0x98] sm:$0xff]   ;;  %v4470_v52 = vld [vmem:[#allocation12 + $0xa0] sm:$0xff]   ;;  %v4474_v61 = vld [vmem:[#allocation12 + $0xa8] sm:$0xff]   ;;  %v888_v2 = vand.u32 15, %v850_v55  ;;  %v895_v6 = vand.u32 15, %v851_v60  ;;  %v902_v8 = vand.u32 15, %v852_v63 }
 0x23e   : > { %3986 = vmatpush3.bf16.msra.mxu0 %v4458_v35  ;;  %3923 = vmatprep.subr.bf16.mxu1 %v4459_v37  ;;  %vm5352_vm7 = vcmp.ge.s32.totalorder %v881_v53, 1  ;;  %v4475_v1 = vld [vmem:[#allocation12 + $0x70] sm:$0xff]   ;;  %vm5357_vm8 = vcmp.lt.s32.totalorder %v874_v58, 15  ;;  %v4479_v9 = vld [vmem:[#allocation12 + $0x78] sm:$0xff]   ;;  %v5362_v10 = vadd.s32 48, %v5341_v41  ;;  %v5365_v12 = vadd.s32 56, %v5341_v41  ;;  %vm1128_vm10 = vmpackc.low %vm5347_vm6, %vm5347_vm6 }
 0x23f   : > { %3987 = vmatprep.subr.bf16.mxu0 %v4460_v38  ;;  %v4476_v3 = vld [vmem:[#allocation12 + $0xf0] sm:$0xff]   ;;  %v4480_v11 = vld [vmem:[#allocation12 + $0xf8] sm:$0xff]   ;;  %v5368_v14 = vadd.s32 64, %v5341_v41  ;;  %vm5370_vm9 = vcmp.lt.s32.totalorder %v888_v2, 15  ;;  %v1371_v16 = vld [vmem:[#allocation2] sm:$0xf0] }
 0x240   : > { %v4477_v5 = vld [vmem:[#allocation12 + $0x30] sm:$0xff]   ;;  %v4481_v13 = vld [vmem:[#allocation12 + $0x38] sm:$0xff]   ;;  %vm5379_vm11 = vcmp.ge.s32.totalorder %v895_v6, 1  ;;  %vm5383_vm12 = vcmp.lt.s32.totalorder %v902_v8, 15  ;;  %v5388_v22 = vadd.s32 72, %v5341_v41  ;;  %v1389_v21 = vrot.slane %v1371_v16, 4  ;;  %vm1129_vm14 = vmpackc.low %vm4869_vm13, %vm4869_vm13 }
 0x241   : > { %3924 = vmatpush3.bf16.msra.mxu1 %v4461_v39  ;;  %v4478_v7 = vld [vmem:[#allocation12 + $0xb0] sm:$0xff]   ;;  %v4482_v19 = vld [vmem:[#allocation12 + $0xb8] sm:$0xff]   ;;  %v1144_v24 = vsel %vm1128_vm10, 65537, %v4866_v0  ;;  %v909_v26 = vand.u32 15, %v5362_v10  ;;  %vm1130_vm15 = vmpackc.low %vm5352_vm7, %vm5352_vm7  ;;  %v5399_v27 = vsel %vm1129_vm14, 65537, %v4866_v0  ;;  %v916_v29 = vand.u32 15, %v5365_v12 }
 0x242   : > { %3988 = vmatpush3.bf16.msra.mxu0 %v4462_v40  ;;  %3925 = vmatprep.subr.bf16.mxu1 %v4463_v42  ;;  %v5374_v17 = vld [vmem:[#allocation2 + $0x8] sm:$0xff]  ;;  %v5392_v25 = vld [vmem:[#allocation2 + $0x10] sm:$0xff]  ;;  %v923_v30 = vand.u32 15, %v5368_v14  ;;  %v1146_v32 = vsel %vm1130_vm15, 65537, %v4866_v0  ;;  %v3765_v33 = vcombine.low %v1144_v24, %v5399_v27  ;;  %v5407_v34 = vld [vmem:[#allocation2 + $0x18] sm:$0xff]  ;;  %v930_v37 = vand.u32 15, %v5388_v22 }
 0x243   : > { %3989 = vmatprep.subr.bf16.mxu0 %v4464_v43  ;;  %v1390_v23 = vrot.slane %v5374_v17, 4  ;;  %v1392_v28 = vrot.slane %v5392_v25, 4  ;;  %v3766_v35 = vcombine.low %v1146_v32, %v5399_v27  ;;  %vm1464_vm1 = vmpackc.low %vm5357_vm8, %vm5357_vm8  ;;  %v1394_v36 = vrot.slane %v5407_v34, 4  ;;  %v4483_v42 = vld [vmem:[#allocation12 + $0x140] sm:$0xff]   ;;  %v1704_v50 = vld [vmem:[#allocation2 + $0x8] sm:$0xf8] }
 0x244   : > { %v1186_v38 = vshrl.u32 %v3765_v33, 16  ;;  %v1189_v39 = vshll.u32 %v3765_v33, 16  ;;  %vm1466_vm2 = vmpackc.low %vm5370_vm9, %vm5370_vm9  ;;  %v1480_v40 = vsel %vm1464_vm1, 65537, %v4866_v0  ;;  %vm1274_vm6 = vsmask.f32 4352  ;;  %s3857_s30 = sshll.u32 %s6337_s23, 4 }
 0x245   : > { %3926 = vmatpush3.bf16.msra.mxu1 %v4465_v44  ;;  %v1391_v31 = vsel %vm790_vm4, %v1389_v21, %v1390_v23  ;;  %v5422_v43 = vsel %vm790_vm4, %v1390_v23, %v1392_v28  ;;  %v1194_v44 = vshrl.u32 %v3766_v35, 16  ;;  %v1482_v46 = vsel %vm1466_vm2, 65537, %v4866_v0  ;;  %vm1132_vm3 = vmpackc.low %vm5379_vm11, %vm5379_vm11  ;;  %s3858_s22 = sshll.u32 %s6338_s27, 5  ;;  %s6339_s23 = sld [smem:[#allocation32_spill]] }
 0x246   : > { %3990 = vmatpush3.bf16.msra.mxu0 %v4466_v45  ;;  %3927 = vmatprep.subr.bf16.mxu1 %v4467_v47  ;;  %v1197_v45 = vshll.u32 %v3766_v35, 16  ;;  %v3773_v47 = vcombine.low %v5399_v27, %v1480_v40  ;;  %v1188_v48 = vrot.slane %v1186_v38, 4  ;;  %v1148_v53 = vsel %vm1132_vm3, 65537, %v4866_v0  ;;  %vm1468_vm5 = vmpackc.low %vm5383_vm12, %vm5383_vm12  ;;  %s3571_s0 = sadd.s32 %s3858_s22, %s3857_s30  ;;  %s6190_s19 = scalar_lea.sflag [#allocation6], %s387_s14 }
 0x247   : > { %3991 = vmatprep.subr.bf16.mxu0 %v4468_v49  ;;  %2942 = vmatprep.mubr.bf16.mxu1 %v1391_v31  ;;  %v1191_v49 = vrot.slane %v1189_v39, 5  ;;  %v5440_v2 = vadd.s32 80, %v5341_v41  ;;  %vm5444_vm8 = vcmp.ge.s32.totalorder %v909_v26, 1  ;;  %vm5455_vm9 = vcmp.lt.s32.totalorder %v916_v29, 15  ;;  %v1422_v29 = vld [vmem:[#allocation2] sm:$0xf0] }
 0x248   : > { %v1199_v55 = vrot.slane %v1197_v45, 5  ;;  %v1523_v57 = vshll.u32 %v3773_v47, 16  ;;  %vm5486_vm13 = vcmp.ge.s32.totalorder %v923_v30, 1  ;;  %vm1134_vm14 = vmpackc.low %vm5444_vm8, %vm5444_vm8  ;;  %vm5500_vm15 = vcmp.lt.s32.totalorder %v930_v37, 15  ;;  %v5510_v37 = vld [vmem:[#allocation2 + $0x20] sm:$0xff]  ;;  %s3859_s13 = sshll.u32 %s3571_s0, 7 }
 0x249   : > { %3928 = vmatpush3.bf16.msra.mxu1 %v4469_v51  ;;  %v1087_v51 = vld [vmem:[#allocation2] sm:$0xf8]  ;;  %v5434_v58 = vor.u32 %v1191_v49, %v1188_v48  ;;  %vm1470_vm1 = vmpackc.low %vm5455_vm9, %vm5455_vm9  ;;  %s4721_s17 = scalar_lea.vmem %s6178_s7, 2048  ;;  %p6340_p7 = scmp.ne.s32.totalorder %s6301_s15, 0 }
 0x24a   : > { %3992 = vmatpush3.bf16.msra.mxu0 %v4470_v52  ;;  %3929 = vmatprep.subr.bf16.mxu1 %v4471_v54  ;;  %v3774_v52 = vcombine.low %v5399_v27, %v1482_v46  ;;  %v1196_v54 = vrot.slane %v1194_v44, 4  ;;  %v4491_v48 = vld [vmem:[#allocation12 + $0x1c0] sm:$0xff]   ;;  %vm1472_vm8 = vmpackc.low %vm5500_vm15, %vm5500_vm15  ;;  %p4722_p6 = scmp.ne.s32.totalorder %s6178_s7, %s4721_s17 }
 0x24b   : > { %3993 = vmatprep.subr.bf16.mxu0 %v4472_v56  ;;  %v1520_v56 = vshrl.u32 %v3773_v47, 16  ;;  %vm1256_vm7 = vcmp.ne.s16.totalorder %v5434_v58, 0  ;;  %s6184_s24 = scalar_lea.hbm %s6339_s23, %s3859_s13 }
 0x24c   : > { %v1531_v60 = vshll.u32 %v3774_v52, 16  ;;  %v5437_v62 = vor.u32 %v1199_v55, %v1196_v54  ;;  %v1713_v8 = vsel %vm1256_vm7, %v1704_v50, 0  ;;  %v4484_v55 = vld [vmem:[#allocation12 + $0x100] sm:$0xff]   ;;  %p4723_p11 = pnand %p4722_p6, %p6340_p7 }
 0x24d   : > { %3930 = vmatpush3.bf16.msra.mxu1 %v4473_v59  ;;  %v1528_v59 = vshrl.u32 %v3774_v52, 16  ;;  %v1522_v63 = vrot.slane %v1520_v56, 3  ;;  %v1723_v12 = vshrl.u32 %v1713_v8, 16 }
 0x24e   : > { %3994 = vmatpush3.bf16.msra.mxu0 %v4474_v61  ;;  %3931 = vmatprep.subr.bf16.mxu1 %v4475_v1  ;;  %v3767_v61 = vcombine.low %v1148_v53, %v5399_v27  ;;  %v1525_v1 = vrot.slane %v1523_v57, 4  ;;  %v1533_v4 = vrot.slane %v1531_v60, 4  ;;  %p4724_p12 = pneg %p4723_p11 }
 0x24f   : > { %3995 = vmatprep.subr.bf16.mxu0 %v4476_v3  ;;  %v1530_v3 = vrot.slane %v1528_v59, 3  ;;  %v1725_v21 = vrot.slane %v1723_v12, 3 }
 0x250   : > { %v1203_v10 = vshrl.u32 %v3767_v61, 16 }
 0x251   : > { %3932 = vmatpush3.bf16.msra.mxu1 %v4477_v5  ;;  %v1484_v5 = vsel %vm1468_vm5, 65537, %v4866_v0  ;;  %v5466_v47 = vor.u32 %v1533_v4, %v1530_v3  ;;  %vm1136_vm5 = vmpackc.low %vm5486_vm13, %vm5486_vm13 }
 0x252   : > { %3996 = vmatpush3.bf16.msra.mxu0 %v4478_v7  ;;  %3933 = vmatprep.subr.bf16.mxu1 %v4479_v9  ;;  %v1201_v7 = vsel %vm1184_vm0, %v5434_v58, %v5437_v62  ;;  %v1265_v9 = vsel %vm1256_vm7, %v1087_v51, 0  ;;  %v1205_v50 = vrot.slane %v1203_v10, 4  ;;  %v1206_v51 = vshll.u32 %v3767_v61, 16  ;;  %v4485_v61 = vld [vmem:[#allocation12 + $0x148] sm:$0xff]  }
 0x253   : > { %3997 = vmatprep.subr.bf16.mxu0 %v4480_v11  ;;  %vm1257_vm10 = vcmp.ne.s16.totalorder %v1201_v7, 0  ;;  %v1279_v20 = vshll.u32 %v1265_v9, 16  ;;  %v3775_v56 = vcombine.low %v5399_v27, %v1484_v5  ;;  %v4486_v7 = vld [vmem:[#allocation12 + $0x108] sm:$0xff]  }
 0x254   : > { %v1714_v15 = vsel %vm1257_vm10, %v5392_v25, 0  ;;  %v5461_v16 = vsel %vm1257_vm10, %v5407_v34, 0  ;;  %v1266_v18 = vsel %vm1257_vm10, %v5374_v17, 0  ;;  %v1208_v4 = vrot.slane %v1206_v51, 5 }
 0x255   : > { %3934 = vmatpush3.bf16.msra.mxu1 %v4481_v13  ;;  %v1726_v13 = vshll.u32 %v1713_v8, 16  ;;  %v1731_v24 = vshrl.u32 %v1714_v15, 16  ;;  %v1734_v26 = vshll.u32 %v1714_v15, 16  ;;  %v1281_v32 = vrot.slane %v1279_v20, 4  ;;  %v4487_v20 = vld [vmem:[#allocation12 + $0x150] sm:$0xff]  }
 0x256   : > { %3998 = vmatpush3.bf16.msra.mxu0 %v4482_v19  ;;  %4047 = vmatprep.subr.bf16.mxu1 %v4483_v42  ;;  %v1276_v19 = vshrl.u32 %v1265_v9, 16  ;;  %v1284_v33 = vshrl.u32 %v1266_v18, 16  ;;  %v1287_v35 = vshll.u32 %v1266_v18, 16  ;;  %v5464_v42 = vor.u32 %v1525_v1, %v1522_v63  ;;  %v4501_v63 = vld [vmem:[#allocation12 + $0x1d8] sm:$0xff]  }
 0x257   : > { %v1728_v23 = vrot.slane %v1726_v13, 4  ;;  %v1733_v39 = vrot.slane %v1731_v24, 3  ;;  %v1736_v40 = vrot.slane %v1734_v26, 4  ;;  %4111 = vmatprep.subr.bf16.mxu0 %v4491_v48  ;;  %v1537_v5 = vshrl.u32 %v3775_v56, 16 }
 0x258   : > { %v1278_v31 = vrot.slane %v1276_v19, 3  ;;  %v1286_v45 = vrot.slane %v1284_v33, 3  ;;  %v1289_v46 = vrot.slane %v1287_v35, 4  ;;  %vm6273_vm11 = vcmp.ne.s16.totalorder %v5464_v42, 0 }
 0x259   : > { %v1729_v38 = vor.u32 %v1728_v23, %v1725_v21  ;;  %v5468_v49 = vor.u32 %v1736_v40, %v1733_v39  ;;  %v5476_v53 = vsel %vm1274_vm6, %v5464_v42, %v5466_v47  ;;  %v1599_v54 = vsel %vm6273_vm11, %v1422_v29, 0  ;;  %v4488_v29 = vld [vmem:[#allocation12 + $0x110] sm:$0xff]  }
 0x25a   : > { %v1282_v44 = vor.u32 %v1281_v32, %v1278_v31  ;;  %v5471_v52 = vor.u32 %v1289_v46, %v1286_v45  ;;  %vm1591_vm12 = vcmp.ne.s16.totalorder %v5476_v53, 0  ;;  %v1609_v59 = vshrl.u32 %v1599_v54, 16  ;;  %v4492_v31 = vld [vmem:[#allocation12 + $0x180] sm:$0xff]   ;;  %v4489_v46 = vld [vmem:[#allocation12 + $0x158] sm:$0xff]  }
 0x25b   : > { %v1738_v57 = vsel %vm1274_vm6, %v1729_v38, %v5468_v49  ;;  %v1612_v60 = vshll.u32 %v1599_v54, 16  ;;  %v1600_v3 = vsel %vm1591_vm12, %v5374_v17, 0  ;;  %v5508_v17 = vor.u32 %v1208_v4, %v1205_v50  ;;  %v4495_v38 = vld [vmem:[#allocation12 + $0x1c8] sm:$0xff]  }
 0x25c   : > { %3039 = vmatprep.mubr.bf16.mxu0 %v1738_v57  ;;  %v1291_v1 = vsel %vm1274_vm6, %v1282_v44, %v5471_v52  ;;  %v1611_v30 = vrot.slane %v1609_v59, 4  ;;  %v1617_v9 = vshrl.u32 %v1600_v3, 16  ;;  %v1620_v10 = vshll.u32 %v1600_v3, 16 }
 0x25d   : > { %2943 = vmatmul.mubr.bf16.vlgmr.msra.gmra.mrb[0].mxu1 %v1291_v1  ;;  %v1614_v8 = vrot.slane %v1612_v60, 5  ;;  %v1539_v12 = vrot.slane %v1537_v5, 3  ;;  %v1540_v22 = vshll.u32 %v3775_v56, 16  ;;  %v1150_v18 = vsel %vm1134_vm14, 65537, %v4866_v0  ;;  %v4496_v56 = vld [vmem:[#allocation12 + $0x188] sm:$0xff]  }
 0x25e   : > { %4048 = vmatpush3.bf16.msra.mxu1 %v4484_v55  ;;  %2950 = vmatprep.mubr.bf16.mxu1 %v5422_v43  ;;  %v1619_v19 = vrot.slane %v1617_v9, 4  ;;  %v1622_v15 = vrot.slane %v1620_v10, 5  ;;  %v5521_v43 = vsel %vm1184_vm0, %v5437_v62, %v5508_v17  ;;  %v3768_v23 = vcombine.low %v1150_v18, %v5399_v27  ;;  %v4490_v55 = vld [vmem:[#allocation12 + $0x118] sm:$0xff]  }
 0x25f   : > { %v1615_v13 = vor.u32 %v1614_v8, %v1611_v30  ;;  %4049 = vmatprep.subr.bf16.mxu1 %v4485_v61  ;;  %v1542_v21 = vrot.slane %v1540_v22, 4  ;;  %v1486_v24 = vsel %vm1470_vm1, 65537, %v4866_v0  ;;  %vm1258_vm2 = vcmp.ne.s16.totalorder %v5521_v43, 0  ;;  %v4493_v8 = vld [vmem:[#allocation12 + $0x160] sm:$0xff]  }
 0x260   : > { %v5530_v26 = vor.u32 %v1622_v15, %v1619_v19  ;;  %v3776_v6 = vcombine.low %v5399_v27, %v1486_v24  ;;  %v5535_v62 = vrot.slane %v5510_v37, 4  ;;  %v1715_v32 = vsel %vm1258_vm2, %v5407_v34, 0  ;;  %v4499_v19 = vld [vmem:[#allocation12 + $0x1d0] sm:$0xff]   ;;  %v4497_v24 = vld [vmem:[#allocation12 + $0x168] sm:$0xff]  }
 0x261   : > { %v1267_v11 = vsel %vm1258_vm2, %v5392_v25, 0  ;;  %v5543_v33 = vor.u32 %v1542_v21, %v1539_v12  ;;  %v1212_v35 = vshrl.u32 %v3768_v23, 16  ;;  %v1740_v40 = vshrl.u32 %v1715_v32, 16 }
 0x262   : > { %4050 = vmatpush3.bf16.msra.mxu1 %v4486_v7  ;;  %v1624_v39 = vsel %vm1184_vm0, %v1615_v13, %v5530_v26  ;;  %v1743_v44 = vshll.u32 %v1715_v32, 16  ;;  %v1293_v45 = vshrl.u32 %v1267_v11, 16  ;;  %v1296_v48 = vshll.u32 %v1267_v11, 16  ;;  %v4494_v13 = vld [vmem:[#allocation12 + $0x120] sm:$0xff]  }
 0x263   : > { %4051 = vmatprep.subr.bf16.mxu1 %v4487_v20  ;;  %3040 = vmatmul.mubr.bf16.vlgmr.msra.gmra.mrb[20].mxu0 %v1624_v39  ;;  %v5550_v50 = vsel %vm1274_vm6, %v5466_v47, %v5543_v33  ;;  %v1214_v51 = vrot.slane %v1212_v35, 4  ;;  %v1215_v54 = vshll.u32 %v3768_v23, 16  ;;  %v1742_v57 = vrot.slane %v1740_v40, 3  ;;  %v5576_v23 = vld [vmem:[#allocation2 + $0x28] sm:$0xff]  ;;  %v4502_v39 = vld [vmem:[#allocation12 + $0x198] sm:$0xff]  }
 0x264   : > { %v1745_v59 = vrot.slane %v1743_v44, 4  ;;  %v1295_v60 = vrot.slane %v1293_v45, 3  ;;  %vm1592_vm3 = vcmp.ne.s16.totalorder %v5550_v50, 0  ;;  %4112 = vmatpush3.bf16.msra.mxu0 %v4492_v31  ;;  %v1298_v61 = vrot.slane %v1296_v48, 4  ;;  %v4503_v48 = vld [vmem:[#allocation12 + $0x170] sm:$0xff]  }
 0x265   : > { %v1601_v1 = vsel %vm1592_vm3, %v5392_v25, 0  ;;  %v1217_v3 = vrot.slane %v1215_v54, 5  ;;  %v1546_v4 = vshrl.u32 %v3776_v6, 16  ;;  %4113 = vmatprep.subr.bf16.mxu0 %v4495_v38  ;;  %v1549_v30 = vshll.u32 %v3776_v6, 16  ;;  %v4500_v6 = vld [vmem:[#allocation12 + $0x190] sm:$0xff]   ;;  %v4498_v38 = vld [vmem:[#allocation12 + $0x128] sm:$0xff]  }
 0x266   : > { %4052 = vmatpush3.bf16.msra.mxu1 %v4488_v29  ;;  %v5559_v47 = vor.u32 %v1745_v59, %v1742_v57  ;;  %v1626_v5 = vshrl.u32 %v1601_v1, 16  ;;  %v1629_v7 = vshll.u32 %v1601_v1, 16  ;;  %v5564_v9 = vor.u32 %v1298_v61, %v1295_v60  ;;  %v4505_v57 = vld [vmem:[#allocation12 + $0x1e0] sm:$0xff]  }
 0x267   : > { %4053 = vmatprep.subr.bf16.mxu1 %v4489_v46  ;;  %v1395_v10 = vsel %vm790_vm4, %v1392_v28, %v1394_v36  ;;  %v5571_v12 = vor.u32 %v1217_v3, %v1214_v51  ;;  %v1548_v22 = vrot.slane %v1546_v4, 3  ;;  %v1551_v21 = vrot.slane %v1549_v30, 4 }
 0x268   : > { %v1747_v15 = vsel %vm1274_vm6, %v5468_v49, %v5559_v47  ;;  %v1628_v18 = vrot.slane %v1626_v5, 4  ;;  %v1631_v20 = vrot.slane %v1629_v7, 5  ;;  %4114 = vmatpush3.bf16.msra.mxu0 %v4496_v56  ;;  %v1300_v25 = vsel %vm1274_vm6, %v5471_v52, %v5564_v9 }
 0x269   : > { %3047 = vmatprep.mubr.bf16.mxu0 %v1747_v15  ;;  %v5584_v28 = vsel %vm1184_vm0, %v5508_v17, %v5571_v12  ;;  %v1152_v49 = vsel %vm1136_vm5, 65537, %v4866_v0  ;;  %v1488_v29 = vsel %vm1472_vm8, 65537, %v4866_v0  ;;  %2951 = vmatmul.mubr.bf16.gmra.mrb[4].mxu1 %v1300_v25  ;;  %v5601_v17 = vor.u32 %v1551_v21, %v1548_v22  ;;  %v4504_v15 = vld [vmem:[#allocation12 + $0x130] sm:$0xff]  }
 0x26a   : > { %4054 = vmatpush3.bf16.msra.mxu1 %v4490_v55  ;;  %v5598_v52 = vor.u32 %v1631_v20, %v1628_v18  ;;  %vm6271_vm9 = vcmp.ne.s16.totalorder %v5584_v28, 0  ;;  %v3769_v31 = vcombine.low %v1152_v49, %v5399_v27  ;;  %2958 = vmatprep.mubr.bf16.mxu1 %v1395_v10  ;;  %v3777_v11 = vcombine.low %v5399_v27, %v1488_v29  ;;  %v5646_v29 = vld [vmem:[#allocation2 + $0x30] sm:$0xff] }
 0x26b   : > { %4055 = vmatprep.subr.bf16.mxu1 %v4493_v8  ;;  %v1716_v32 = vsel %vm6271_vm9, %v5510_v37, 0  ;;  %v1268_v14 = vsel %vm6271_vm9, %v5407_v34, 0  ;;  %v1398_v35 = vrot.slane %v5576_v23, 4  ;;  %4115 = vmatprep.subr.bf16.mxu0 %v4499_v19  ;;  %v5618_v54 = vsel %vm1274_vm6, %v5543_v33, %v5601_v17  ;;  %v4506_v8 = vld [vmem:[#allocation12 + $0x1a0] sm:$0xff]  }
 0x26c   : > { %v1633_v40 = vsel %vm1184_vm0, %v5530_v26, %v5598_v52  ;;  %v1749_v44 = vshrl.u32 %v1716_v32, 16  ;;  %v1752_v45 = vshll.u32 %v1716_v32, 16  ;;  %v1302_v46 = vshrl.u32 %v1268_v14, 16  ;;  %4116 = vmatpush3.bf16.msra.mxu0 %v4500_v6  ;;  %v4507_v6 = vld [vmem:[#allocation12 + $0x1e8] sm:$0xff]   ;;  %v4509_v32 = vld [vmem:[#allocation12 + $0x178] sm:$0xff]  }
 0x26d   : > { %3048 = vmatmul.mubr.bf16.gmra.mrb[24].mxu0 %v1633_v40  ;;  %v1305_v51 = vshll.u32 %v1268_v14, 16  ;;  %v1221_v55 = vshrl.u32 %v3769_v31, 16  ;;  %v1224_v56 = vshll.u32 %v3769_v31, 16  ;;  %vm1593_vm10 = vcmp.ne.s16.totalorder %v5618_v54, 0  ;;  %4117 = vmatprep.subr.bf16.mxu0 %v4501_v63 }
 0x26e   : > { %4056 = vmatpush3.bf16.msra.mxu1 %v4494_v13  ;;  %v1751_v59 = vrot.slane %v1749_v44, 3  ;;  %v1754_v60 = vrot.slane %v1752_v45, 4  ;;  %v1304_v61 = vrot.slane %v1302_v46, 3  ;;  %v1602_v1 = vsel %vm1593_vm10, %v5407_v34, 0  ;;  %v4511_v45 = vld [vmem:[#allocation12 + $0x1f0] sm:$0xff]  }
 0x26f   : > { %4057 = vmatprep.subr.bf16.mxu1 %v4497_v24  ;;  %v1307_v26 = vrot.slane %v1305_v51, 4  ;;  %v1223_v3 = vrot.slane %v1221_v55, 4  ;;  %v1226_v4 = vrot.slane %v1224_v56, 5  ;;  %v1635_v5 = vshrl.u32 %v1602_v1, 16  ;;  %v4512_v56 = vld [vmem:[#allocation12 + $0x1b0] sm:$0xff]  }
 0x270   : > { %v5624_v33 = vor.u32 %v1754_v60, %v1751_v59  ;;  %v1638_v7 = vshll.u32 %v1602_v1, 16  ;;  %v1555_v30 = vshrl.u32 %v3777_v11, 16  ;;  %4118 = vmatpush3.bf16.msra.mxu0 %v4502_v39  ;;  %v1397_v22 = vsel %vm790_vm4, %v1394_v36, %v5535_v62 }
 0x271   : > { %v5626_v10 = vor.u32 %v1307_v26, %v1304_v61  ;;  %v5632_v13 = vor.u32 %v1226_v4, %v1223_v3  ;;  %v1558_v19 = vshll.u32 %v3777_v11, 16  ;;  %4119 = vmatprep.subr.bf16.mxu0 %v4505_v57  ;;  %v1637_v20 = vrot.slane %v1635_v5, 4  ;;  %v4510_v11 = vld [vmem:[#allocation12 + $0x138] sm:$0xff]  }
 0x272   : > { %4058 = vmatpush3.bf16.msra.mxu1 %v4498_v38  ;;  %v1756_v18 = vsel %vm1274_vm6, %v5559_v47, %v5624_v33  ;;  %v1640_v21 = vrot.slane %v1638_v7, 5  ;;  %v1557_v24 = vrot.slane %v1555_v30, 3  ;;  %v937_v49 = vand.u32 15, %v5440_v2  ;;  %v4508_v47 = vld [vmem:[#allocation12 + $0x1a8] sm:$0xff]  }
 0x273   : > { %4059 = vmatprep.subr.bf16.mxu1 %v4503_v48  ;;  %3055 = vmatprep.mubr.bf16.mxu0 %v1756_v18  ;;  %v1309_v34 = vsel %vm1274_vm6, %v5564_v9, %v5626_v10  ;;  %v5643_v36 = vsel %vm1184_vm0, %v5571_v12, %v5632_v13  ;;  %v1560_v25 = vrot.slane %v1558_v19, 4  ;;  %v858_v63 = vadd.s32 88, %v5341_v41 }
 0x274   : > { %2959 = vmatmul.mubr.bf16.gmra.mrb[8].mxu1 %v1309_v34  ;;  %v5648_v31 = vor.u32 %v1640_v21, %v1637_v20  ;;  %vm6272_vm13 = vcmp.ne.s16.totalorder %v5643_v36, 0  ;;  %v1400_v9 = vrot.slane %v5646_v29, 4  ;;  %4120 = vmatpush3.bf16.msra.mxu0 %v4506_v8  ;;  %vm1065_vm14 = vcmp.ge.s32.totalorder %v937_v49, 1  ;;  %v5690_v21 = vld [vmem:[#allocation2 + $0x38] sm:$0xff] }
 0x275   : > { %2966 = vmatprep.mubr.bf16.mxu1 %v1397_v22  ;;  %v1717_v12 = vsel %vm6272_vm13, %v5576_v23, 0  ;;  %v1269_v2 = vsel %vm6272_vm13, %v5510_v37, 0  ;;  %v5659_v14 = vor.u32 %v1560_v25, %v1557_v24  ;;  %vm1138_vm15 = vmpackc.low %vm1065_vm14, %vm1065_vm14  ;;  %4121 = vmatprep.subr.bf16.mxu0 %v4507_v6  ;;  %v944_v55 = vand.u32 15, %v858_v63  ;;  %v4514_v49 = vld [vmem:[#allocation12 + $0x1b8] sm:$0xff]  }
 0x276   : > { %4060 = vmatpush3.bf16.msra.mxu1 %v4504_v15  ;;  %v1642_v38 = vsel %vm1184_vm0, %v5598_v52, %v5648_v31  ;;  %v1758_v39 = vshrl.u32 %v1717_v12, 16  ;;  %v1761_v40 = vshll.u32 %v1717_v12, 16  ;;  %v1311_v44 = vshrl.u32 %v1269_v2, 16  ;;  %v5699_v12 = vld [vmem:[#allocation12 + $0x200] sm:$0xff]  }
 0x277   : > { %4061 = vmatprep.subr.bf16.mxu1 %v4509_v32  ;;  %3056 = vmatmul.mubr.bf16.gmra.mrb[28].mxu0 %v1642_v38  ;;  %v1314_v46 = vshll.u32 %v1269_v2, 16  ;;  %v5667_v48 = vsel %vm1274_vm6, %v5601_v17, %v5659_v14  ;;  %v1154_v51 = vsel %vm1138_vm15, 65537, %v4866_v0  ;;  %vm1082_vm5 = vcmp.lt.s32.totalorder %v944_v55, 15  ;;  %v4513_v17 = vld [vmem:[#allocation12 + $0x1f8] sm:$0xff]  }
 0x278   : > { %v1760_v57 = vrot.slane %v1758_v39, 3  ;;  %v1763_v52 = vrot.slane %v1761_v40, 4  ;;  %v1313_v59 = vrot.slane %v1311_v44, 3  ;;  %vm1594_vm1 = vcmp.ne.s16.totalorder %v5667_v48, 0  ;;  %4122 = vmatpush3.bf16.msra.mxu0 %v4508_v47  ;;  %vm1474_vm8 = vmpackc.low %vm1082_vm5, %vm1082_vm5 }
 0x279   : > { %v1316_v60 = vrot.slane %v1314_v46, 4  ;;  %v1603_v61 = vsel %vm1594_vm1, %v5510_v37, 0  ;;  %v3770_v26 = vcombine.low %v1154_v51, %v5399_v27  ;;  %4123 = vmatprep.subr.bf16.mxu0 %v4511_v45  ;;  %v5681_v5 = vsel %vm790_vm4, %v5535_v62, %v1398_v35 }
 0x27a   : > { %4062 = vmatpush3.bf16.msra.mxu1 %v4510_v11  ;;  %v5675_v1 = vor.u32 %v1763_v52, %v1760_v57  ;;  %v1644_v3 = vshrl.u32 %v1603_v61, 16  ;;  %v1647_v4 = vshll.u32 %v1603_v61, 16  ;;  %v1490_v22 = vsel %vm1474_vm8, 65537, %v4866_v0 }
 0x27b   : > { %v5683_v7 = vor.u32 %v1316_v60, %v1313_v59  ;;  %v1230_v30 = vshrl.u32 %v3770_v26, 16  ;;  %v1233_v8 = vshll.u32 %v3770_v26, 16  ;;  %v3778_v20 = vcombine.low %v5399_v27, %v1490_v22  ;;  %4227 = vmatprep.subr.bf16.mxu1 %v5699_v12 }
 0x27c   : > { %v1765_v19 = vsel %vm1274_vm6, %v5624_v33, %v5675_v1  ;;  %v1646_v15 = vrot.slane %v1644_v3, 4  ;;  %v1649_v18 = vrot.slane %v1647_v4, 5  ;;  %4124 = vmatpush3.bf16.msra.mxu0 %v4512_v56  ;;  %v859_v25 = vadd.s32 96, %v5341_v41 }
 0x27d   : > { %3063 = vmatprep.mubr.bf16.mxu0 %v1765_v19  ;;  %v1318_v24 = vsel %vm1274_vm6, %v5626_v10, %v5683_v7  ;;  %v1232_v6 = vrot.slane %v1230_v30, 4  ;;  %v1235_v34 = vrot.slane %v1233_v8, 5  ;;  %4125 = vmatprep.subr.bf16.mxu0 %v4513_v17  ;;  %v1564_v47 = vshrl.u32 %v3778_v20, 16 }
 0x27e   : > { %2967 = vmatmul.mubr.bf16.gmra.mrb[12].mxu1 %v1318_v24  ;;  %v5696_v33 = vor.u32 %v1649_v18, %v1646_v15  ;;  %v1567_v63 = vshll.u32 %v3778_v20, 16  ;;  %v860_v32 = vadd.s32 104, %v5341_v41  ;;  %v951_v10 = vand.u32 15, %v859_v25 }
 0x27f   : > { %2974 = vmatprep.mubr.bf16.mxu1 %v5681_v5  ;;  %v5702_v2 = vor.u32 %v1235_v34, %v1232_v6  ;;  %v5705_v11 = vrot.slane %v5690_v21, 4  ;;  %v861_v38 = vadd.s32 112, %v5341_v41  ;;  %v1566_v40 = vrot.slane %v1564_v47, 3 }
 0x280   : > { %v1651_v39 = vsel %vm1184_vm0, %v5648_v31, %v5696_v33  ;;  %v1569_v44 = vrot.slane %v1567_v63, 4  ;;  %v958_v45 = vand.u32 15, %v860_v32  ;;  %4126 = vmatpush3.bf16.msra.mxu0 %v4514_v49  ;;  %v5722_v51 = vsel %vm790_vm4, %v1398_v35, %v1400_v9 }
 0x281   : > { %3064 = vmatmul.mubr.bf16.gmra.mrb[32].mxu0 %v1651_v39  ;;  %v5715_v46 = vsel %vm1184_vm0, %v5632_v13, %v5702_v2  ;;  %vm1067_vm14 = vcmp.ge.s32.totalorder %v951_v10, 1  ;;  %v965_v31 = vand.u32 15, %v861_v38  ;;  %v862_v56 = vadd.s32 120, %v5341_v41  ;;  %v5759_v39 = vld [vmem:[#allocation2 + $0x40] sm:$0xf] }
 0x282   : > { %vm1261_vm15 = vcmp.ne.s16.totalorder %v5715_v46, 0  ;;  %v5725_v55 = vor.u32 %v1569_v44, %v1566_v40  ;;  %vm1140_vm5 = vmpackc.low %vm1067_vm14, %vm1067_vm14  ;;  %vm1084_vm8 = vcmp.lt.s32.totalorder %v958_v45, 15 }
 0x283   : > { %v1718_v13 = vsel %vm1261_vm15, %v5646_v29, 0  ;;  %v1270_v57 = vsel %vm1261_vm15, %v5576_v23, 0  ;;  %v1156_v35 = vsel %vm1140_vm5, 65537, %v4866_v0  ;;  %vm1476_vm9 = vmpackc.low %vm1084_vm8, %vm1084_vm8  ;;  %vm1069_vm13 = vcmp.ge.s32.totalorder %v965_v31, 1 }
 0x284   : > { %v1767_v52 = vshrl.u32 %v1718_v13, 16  ;;  %v1770_v59 = vshll.u32 %v1718_v13, 16  ;;  %v1320_v60 = vshrl.u32 %v1270_v57, 16  ;;  %v1323_v61 = vshll.u32 %v1270_v57, 16  ;;  %vm1142_vm14 = vmpackc.low %vm1069_vm13, %vm1069_vm13 }
 0x285   : > { %v5738_v41 = vsel %vm1274_vm6, %v5659_v14, %v5725_v55  ;;  %v3771_v26 = vcombine.low %v1156_v35, %v5399_v27  ;;  %v1492_v17 = vsel %vm1476_vm9, 65537, %v4866_v0  ;;  %v1158_v3 = vsel %vm1142_vm14, 65537, %v4866_v0 }
 0x286   : > { %v1769_v4 = vrot.slane %v1767_v52, 3  ;;  %v1772_v30 = vrot.slane %v1770_v59, 4  ;;  %v1322_v8 = vrot.slane %v1320_v60, 3  ;;  %v1325_v22 = vrot.slane %v1323_v61, 4 }
 0x287   : > { %vm1595_vm5 = vcmp.ne.s16.totalorder %v5738_v41, 0  ;;  %v1239_v19 = vshrl.u32 %v3771_v26, 16  ;;  %v1242_v15 = vshll.u32 %v3771_v26, 16  ;;  %v3779_v18 = vcombine.low %v5399_v27, %v1492_v17 }
 0x288   : > { %v5745_v20 = vor.u32 %v1772_v30, %v1769_v4  ;;  %v5747_v14 = vor.u32 %v1325_v22, %v1322_v8  ;;  %v1604_v24 = vsel %vm1595_vm5, %v5576_v23, 0  ;;  %v3772_v6 = vcombine.low %v1158_v3, %v5399_v27 }
 0x289   : > { %v1653_v34 = vshrl.u32 %v1604_v24, 16  ;;  %v1656_v25 = vshll.u32 %v1604_v24, 16  ;;  %v1241_v49 = vrot.slane %v1239_v19, 4  ;;  %v1244_v47 = vrot.slane %v1242_v15, 5 }
 0x28a   : > { %v1774_v63 = vsel %vm1274_vm6, %v5675_v1, %v5745_v20  ;;  %v1327_v32 = vsel %vm1274_vm6, %v5683_v7, %v5747_v14  ;;  %v1573_v10 = vshrl.u32 %v3779_v18, 16  ;;  %v1576_v38 = vshll.u32 %v3779_v18, 16 }
 0x28b   : > { %3071 = vmatprep.mubr.bf16.mxu0 %v1774_v63  ;;  %2975 = vmatmul.mubr.bf16.gmra.mrb[16].mxu1 %v1327_v32  ;;  %v1655_v40 = vrot.slane %v1653_v34, 4  ;;  %v1658_v44 = vrot.slane %v1656_v25, 5  ;;  %v1245_v45 = vor.u32 %v1244_v47, %v1241_v49  ;;  %v1248_v31 = vshrl.u32 %v3772_v6, 16  ;;  %v5799_v49 = vld [vmem:[#allocation2 + $0x40] sm:$0xff] }
 0x28c   : > { %2982 = vmatprep.mubr.bf16.mxu1 %v5722_v51  ;;  %v1575_v13 = vrot.slane %v1573_v10, 3  ;;  %v1578_v57 = vrot.slane %v1576_v38, 4  ;;  %v1251_v35 = vshll.u32 %v3772_v6, 16  ;;  %v972_v1 = vand.u32 15, %v862_v56  ;;  %v1869_v56 = vld [vmem:[#allocation2 + $0x8] sm:$0xf0] }
 0x28d   : > { %v5762_v52 = vor.u32 %v1658_v44, %v1655_v40  ;;  %v5766_v7 = vsel %vm1184_vm0, %v5702_v2, %v1245_v45  ;;  %v5772_v59 = vsel %vm790_vm4, %v1400_v9, %v5705_v11  ;;  %v1250_v60 = vrot.slane %v1248_v31, 4 }
 0x28e   : > { %vm1262_vm9 = vcmp.ne.s16.totalorder %v5766_v7, 0  ;;  %v5775_v61 = vor.u32 %v1578_v57, %v1575_v13  ;;  %v1253_v26 = vrot.slane %v1251_v35, 5  ;;  %vm1086_vm13 = vcmp.lt.s32.totalorder %v972_v1, 15  ;;  %v1712_v13 = vld [vmem:[#allocation2 + $0x48] sm:$0xf] }
 0x28f   : > { %v1660_v17 = vsel %vm1184_vm0, %v5696_v33, %v5762_v52  ;;  %v1719_v2 = vsel %vm1262_vm9, %v5690_v21, 0  ;;  %v1271_v9 = vsel %vm1262_vm9, %v5646_v29, 0  ;;  %vm1478_vm8 = vmpackc.low %vm1086_vm13, %vm1086_vm13  ;;  %v1404_v3 = vrot.slane %v5759_v39, 4 }
 0x290   : > { %3072 = vmatmul.mubr.bf16.gmra.mrb[36].mxu0 %v1660_v17  ;;  %v1776_v4 = vshrl.u32 %v1719_v2, 16  ;;  %v1779_v30 = vshll.u32 %v1719_v2, 16  ;;  %v1329_v8 = vshrl.u32 %v1271_v9, 16  ;;  %v1332_v22 = vshll.u32 %v1271_v9, 16  ;;  %v1095_v9 = vld [vmem:[#allocation2 + $0x40] sm:$0xf] }
 0x291   : > { %v5790_v33 = vsel %vm1274_vm6, %v5725_v55, %v5775_v61  ;;  %v5792_v19 = vor.u32 %v1253_v26, %v1250_v60  ;;  %v1494_v15 = vsel %vm1478_vm8, 65537, %v4866_v0  ;;  %v5797_v18 = vsel %vm6273_vm11, %v1869_v56, 0 }
 0x292   : > { %v1778_v24 = vrot.slane %v1776_v4, 3  ;;  %v1781_v6 = vrot.slane %v1779_v30, 4  ;;  %v1331_v34 = vrot.slane %v1329_v8, 3  ;;  %v1334_v25 = vrot.slane %v1332_v22, 4 }
 0x293   : > { %vm1596_vm14 = vcmp.ne.s16.totalorder %v5790_v33, 0  ;;  %v5804_v55 = vsel %vm1184_vm0, %v1245_v45, %v5792_v19  ;;  %v3780_v47 = vcombine.low %v5399_v27, %v1494_v15  ;;  %vm6274_vm13 = vcmp.ne.s16.totalorder %v5792_v19, 0 }
 0x294   : > { %v1782_v0 = vor.u32 %v1781_v6, %v1778_v24  ;;  %v1335_v63 = vor.u32 %v1334_v25, %v1331_v34  ;;  %v1605_v32 = vsel %vm1596_vm14, %v5646_v29, 0  ;;  %vm1263_vm8 = vcmp.ne.s16.totalorder %v5804_v55, 0 }
 0x295   : > { %v1662_v10 = vshrl.u32 %v1605_v32, 16  ;;  %v1665_v38 = vshll.u32 %v1605_v32, 16  ;;  %v1720_v39 = vsel %vm1263_vm8, %v5799_v49, 0  ;;  %v1272_v27 = vsel %vm1263_vm8, %v5690_v21, 0 }
 0x296   : > { %v1783_v40 = vsel %vm1274_vm6, %v5745_v20, %v1782_v0  ;;  %v1336_v44 = vsel %vm1274_vm6, %v5747_v14, %v1335_v63  ;;  %v1785_v45 = vshrl.u32 %v1720_v39, 16  ;;  %v1788_v31 = vshll.u32 %v1720_v39, 16 }
 0x297   : > { %3079 = vmatprep.mubr.bf16.mxu0 %v1783_v40  ;;  %2983 = vmatmul.mubr.bf16.gmra.mrb[20].mxu1 %v1336_v44  ;;  %v1664_v57 = vrot.slane %v1662_v10, 4  ;;  %v1667_v35 = vrot.slane %v1665_v38, 5  ;;  %v1338_v1 = vshrl.u32 %v1272_v27, 16  ;;  %v1341_v60 = vshll.u32 %v1272_v27, 16  ;;  %v1430_v27 = vld [vmem:[#allocation2 + $0x40] sm:$0x1f] }
 0x298   : > { %2990 = vmatprep.mubr.bf16.mxu1 %v5772_v59  ;;  %v1787_v26 = vrot.slane %v1785_v45, 3  ;;  %v1790_v56 = vrot.slane %v1788_v31, 4  ;;  %v1582_v17 = vshrl.u32 %v3780_v47, 16  ;;  %v1585_v2 = vshll.u32 %v3780_v47, 16  ;;  %v5837_v40 = vld [vmem:[#allocation2 + $0x10] sm:$0xff] }
 0x299   : > { %v5823_v20 = vor.u32 %v1667_v35, %v1664_v57  ;;  %v1340_v4 = vrot.slane %v1338_v1, 3  ;;  %v1343_v14 = vrot.slane %v1341_v60, 4  ;;  %v1721_v30 = vsel %vm6274_vm13, %v1712_v13, 0  ;;  %v1983_v44 = vld [vmem:[#allocation2 + $0x10] sm:$0xf8] }
 0x29a   : > { %v1791_v8 = vor.u32 %v1790_v56, %v1787_v26  ;;  %v1584_v22 = vrot.slane %v1582_v17, 3  ;;  %v1587_v15 = vrot.slane %v1585_v2, 4  ;;  %v1794_v24 = vshrl.u32 %v1721_v30, 16 }
 0x29b   : > { %v1669_v6 = vsel %vm1184_vm0, %v5762_v52, %v5823_v20  ;;  %v1344_v34 = vor.u32 %v1343_v14, %v1340_v4  ;;  %v1797_v25 = vshll.u32 %v1721_v30, 16  ;;  %v1273_v47 = vsel %vm6274_vm13, %v1095_v9, 0 }
 0x29c   : > { %3080 = vmatmul.mubr.bf16.gmra.mrb[40].mxu0 %v1669_v6  ;;  %v1792_v32 = vsel %vm1274_vm6, %v1782_v0, %v1791_v8  ;;  %v5833_v10 = vor.u32 %v1587_v15, %v1584_v22  ;;  %v1405_v38 = vsel %vm790_vm4, %v5705_v11, %v1404_v3  ;;  %v1347_v39 = vshrl.u32 %v1273_v47, 16 }
 0x29d   : > { %3087 = vmatprep.mubr.bf16.mxu0 %v1792_v32  ;;  %v1345_v52 = vsel %vm1274_vm6, %v1335_v63, %v1344_v34  ;;  %v1796_v45 = vrot.slane %v1794_v24, 3  ;;  %v1799_v31 = vrot.slane %v1797_v25, 4  ;;  %v1350_v13 = vshll.u32 %v1273_v47, 16 }
 0x29e   : > { %v5843_v0 = vsel %vm1274_vm6, %v5775_v61, %v5833_v10  ;;  %v1349_v57 = vrot.slane %v1347_v39, 3  ;;  %vm1598_vm11 = vcmp.ne.s16.totalorder %v5833_v10, 0  ;;  %v1888_v3 = vshrl.u32 %v5797_v18, 16 }
 0x29f   : > { %2991 = vmatmul.mubr.bf16.gmra.mrb[24].mxu1 %v1345_v52  ;;  %vm1597_vm13 = vcmp.ne.s16.totalorder %v5843_v0, 0  ;;  %v1352_v35 = vrot.slane %v1350_v13, 4  ;;  %v1607_v63 = vsel %vm1598_vm11, %v1430_v27, 0  ;;  %v1879_v1 = vsel %vm1591_vm12, %v5837_v40, 0  ;;  %v5861_v13 = vld [vmem:[#allocation2 + $0x18] sm:$0xff] }
 0x2a0   : > { %v1992_v61 = vsel %vm1256_vm7, %v1983_v44, 0  ;;  %v1606_v60 = vsel %vm1597_vm13, %v5690_v21, 0  ;;  %2998 = vmatprep.mubr.bf16.mxu1 %v1405_v38  ;;  %v1680_v26 = vshrl.u32 %v1607_v63, 16  ;;  %v1683_v56 = vshll.u32 %v1607_v63, 16  ;;  %v1818_v38 = vld [vmem:[#allocation2 + $0x8] sm:$0xf0] }
 0x2a1   : > { %v1671_v17 = vshrl.u32 %v1606_v60, 16  ;;  %v1674_v2 = vshll.u32 %v1606_v60, 16  ;;  %v1800_v9 = vor.u32 %v1799_v31, %v1796_v45  ;;  %v1353_v4 = vor.u32 %v1352_v35, %v1349_v57  ;;  %v2097_v31 = vld [vmem:[#allocation2 + $0x10] sm:$0xf0] }
 0x2a2   : > { %v1682_v14 = vrot.slane %v1680_v26, 4  ;;  %v1890_v30 = vrot.slane %v1888_v3, 4  ;;  %v1891_v22 = vshll.u32 %v5797_v18, 16  ;;  %v1896_v15 = vshrl.u32 %v1879_v1, 16 }
 0x2a3   : > { %v1673_v24 = vrot.slane %v1671_v17, 4  ;;  %v1676_v6 = vrot.slane %v1674_v2, 5  ;;  %v1685_v58 = vrot.slane %v1683_v56, 5  ;;  %v1899_v25 = vshll.u32 %v1879_v1, 16 }
 0x2a4   : > { %v1354_v47 = vsel %vm1274_vm6, %v1344_v34, %v1353_v4  ;;  %v1893_v32 = vrot.slane %v1891_v22, 5  ;;  %v1898_v39 = vrot.slane %v1896_v15, 4  ;;  %v1801_v52 = vsel %vm1274_vm6, %v1791_v8, %v1800_v9 }
 0x2a5   : > { %v1677_v27 = vor.u32 %v1676_v6, %v1673_v24  ;;  %v1901_v44 = vrot.slane %v1899_v25, 5  ;;  %v2002_v57 = vshrl.u32 %v1992_v61, 16  ;;  %v2005_v18 = vshll.u32 %v1992_v61, 16 }
 0x2a6   : > { %v1894_v45 = vor.u32 %v1893_v32, %v1890_v30  ;;  %v1686_v35 = vor.u32 %v1685_v58, %v1682_v14  ;;  %v1836_v34 = vrot.slane %v1818_v38, 4  ;;  %v1837_v1 = vrot.slane %v5837_v40, 4 }
 0x2a7   : > { %v1678_v3 = vsel %vm1184_vm0, %v5823_v20, %v1677_v27  ;;  %2999 = vmatmul.mubr.bf16.gmra.mrb[28].mxu1 %v1354_v47  ;;  %v1902_v63 = vor.u32 %v1901_v44, %v1898_v39  ;;  %v2004_v60 = vrot.slane %v2002_v57, 3  ;;  %v2007_v26 = vrot.slane %v2005_v18, 4  ;;  %v4516_v44 = vld [vmem:[#allocation12 + $0x208] sm:$0xff]  }
 0x2a8   : > { %3088 = vmatmul.mubr.bf16.gmra.mrb[44].mxu0 %v1678_v3  ;;  %v2010_v8 = vshrl.u32 %v5461_v16, 16  ;;  %v2115_v17 = vrot.slane %v2097_v31, 4  ;;  %v2013_v61 = vshll.u32 %v5461_v16, 16  ;;  %v1880_v20 = vsel %vm1592_vm3, %v5861_v13, 0  ;;  %v4517_v3 = vld [vmem:[#allocation12 + $0x210] sm:$0xff]  }
 0x2a9   : > { %3095 = vmatprep.mubr.bf16.mxu0 %v1801_v52  ;;  %v1903_v56 = vsel %vm1184_vm0, %v1894_v45, %v1902_v63  ;;  %v2116_v2 = vrot.slane %v5861_v13, 4  ;;  %v1905_v4 = vshrl.u32 %v1880_v20, 16  ;;  %v1908_v40 = vshll.u32 %v1880_v20, 16 }
 0x2aa   : > { %3136 = vmatprep.mubr.bf16.mxu1 %v1903_v56  ;;  %v2012_v9 = vrot.slane %v2010_v8, 3  ;;  %v2008_v14 = vor.u32 %v2007_v26, %v2004_v60  ;;  %v2015_v30 = vrot.slane %v2013_v61, 4  ;;  %v1994_v22 = vsel %vm1258_vm2, %v5510_v37, 0 }
 0x2ab   : > { %v1881_v16 = vsel %vm1593_vm10, %v5510_v37, 0  ;;  %v1838_v15 = vsel %vm790_vm4, %v1836_v34, %v1837_v1  ;;  %v1907_v24 = vrot.slane %v1905_v4, 4  ;;  %v1910_v6 = vrot.slane %v1908_v40, 5 }
 0x2ac   : > { %v1687_v58 = vsel %vm1184_vm0, %v1677_v27, %v1686_v35  ;;  %v5881_v25 = vor.u32 %v2015_v30, %v2012_v9  ;;  %v1914_v47 = vshrl.u32 %v1881_v16, 16  ;;  %v1917_v32 = vshll.u32 %v1881_v16, 16 }
 0x2ad   : > { %v2117_v39 = vsel %vm790_vm4, %v2115_v17, %v2116_v2  ;;  %v1911_v38 = vor.u32 %v1910_v6, %v1907_v24  ;;  %v2019_v43 = vshrl.u32 %v1994_v22, 16  ;;  %v2022_v37 = vshll.u32 %v1994_v22, 16 }
 0x2ae   : > { %v2017_v52 = vsel %vm1274_vm6, %v2008_v14, %v5881_v25  ;;  %v1916_v45 = vrot.slane %v1914_v47, 4  ;;  %v1919_v31 = vrot.slane %v1917_v32, 5  ;;  %v1882_v57 = vsel %vm1594_vm1, %v5576_v23, 0  ;;  %v4518_v14 = vld [vmem:[#allocation12 + $0x218] sm:$0xff]  }
 0x2af   : > { %3137 = vmatmul.mubr.bf16.vlgmr.msra.gmra.mrb[32].mxu1 %v1838_v15  ;;  %v1912_v27 = vsel %vm1184_vm0, %v1902_v63, %v1911_v38  ;;  %v1923_v35 = vshrl.u32 %v1882_v57, 16  ;;  %v1926_v34 = vshll.u32 %v1882_v57, 16  ;;  %v1840_v60 = vsel %vm790_vm4, %v1837_v1, %v2116_v2 }
 0x2b0   : > { %3096 = vmatmul.mubr.bf16.gmra.mrb[48].mxu0 %v1687_v58  ;;  %4228 = vmatpush3.bf16.msra.mxu1 %v5699_v12  ;;  %v1920_v18 = vor.u32 %v1919_v31, %v1916_v45  ;;  %vm6333_vm7 = vcmp.ne.s16.totalorder %v5643_v36, 0  ;;  %v1997_v12 = vsel %vm1261_vm15, %v5690_v21, 0  ;;  %v2119_v63 = vsel %vm790_vm4, %v2116_v2, %v5535_v62 }
 0x2b1   : > { %3233 = vmatprep.mubr.bf16.mxu0 %v2117_v39  ;;  %3144 = vmatprep.mubr.bf16.mxu1 %v1912_v27  ;;  %v1996_v26 = vsel %vm6333_vm7, %v5646_v29, 0  ;;  %v2021_v8 = vrot.slane %v2019_v43, 3  ;;  %v2024_v56 = vrot.slane %v2022_v37, 4  ;;  %vm6334_vm2 = vcmp.ne.s16.totalorder %v5584_v28, 0  ;;  %v5915_v43 = vld [vmem:[#allocation2 + $0x48] sm:$0xff] }
 0x2b2   : > { %4229 = vmatprep.subr.bf16.mxu1 %v4516_v44  ;;  %v1995_v17 = vsel %vm6334_vm2, %v5576_v23, 0  ;;  %v1925_v1 = vrot.slane %v1923_v35, 4  ;;  %v1928_v61 = vrot.slane %v1926_v34, 5  ;;  %v2037_v20 = vshrl.u32 %v1996_v26, 16 }
 0x2b3   : > { %v2040_v9 = vshll.u32 %v1996_v26, 16  ;;  %v1921_v36 = vsel %vm1184_vm0, %v1911_v38, %v1920_v18  ;;  %v1883_v46 = vsel %vm1595_vm5, %v5646_v29, 0  ;;  %v2046_v4 = vshrl.u32 %v1997_v12, 16  ;;  %v4520_v26 = vld [vmem:[#allocation12 + $0x228] sm:$0xff]  }
 0x2b4   : > { %4230 = vmatpush3.bf16.msra.mxu1 %v4516_v44  ;;  %v2049_v62 = vshll.u32 %v1997_v12, 16  ;;  %v2028_v2 = vshrl.u32 %v1995_v17, 16  ;;  %v2031_v40 = vshll.u32 %v1995_v17, 16  ;;  %v2039_v30 = vrot.slane %v2037_v20, 3  ;;  %v4519_v44 = vld [vmem:[#allocation12 + $0x220] sm:$0xff]  }
 0x2b5   : > { %4231 = vmatprep.subr.bf16.mxu1 %v4517_v3  ;;  %v2042_v28 = vrot.slane %v2040_v9, 4  ;;  %v2048_v23 = vrot.slane %v2046_v4, 3  ;;  %v2025_v16 = vor.u32 %v2024_v56, %v2021_v8  ;;  %v1929_v15 = vor.u32 %v1928_v61, %v1925_v1  ;;  %v1991_v1 = vld [vmem:[#allocation2 + $0x50] sm:$0xf] }
 0x2b6   : > { %v2051_v22 = vrot.slane %v2049_v62, 4  ;;  %v1932_v24 = vshrl.u32 %v1883_v46, 16  ;;  %v1935_v6 = vshll.u32 %v1883_v46, 16  ;;  %v5910_v47 = vrot.slane %v5799_v49, 4 }
 0x2b7   : > { %3145 = vmatmul.mubr.bf16.gmra.mrb[36].mxu1 %v1840_v60  ;;  %v5907_v58 = vor.u32 %v2042_v28, %v2039_v30  ;;  %v1998_v32 = vsel %vm1262_vm9, %v5799_v49, 0  ;;  %v2030_v39 = vrot.slane %v2028_v2, 3  ;;  %v2033_v38 = vrot.slane %v2031_v40, 4 }
 0x2b8   : > { %3234 = vmatmul.mubr.bf16.vlgmr.msra.gmra.mrb[52].mxu0 %v2017_v52  ;;  %3152 = vmatprep.mubr.bf16.mxu1 %v1921_v36  ;;  %v2052_v29 = vor.u32 %v2051_v22, %v2048_v23  ;;  %v5924_v37 = vsel %vm790_vm4, %v5705_v11, %v5910_v47  ;;  %v2055_v45 = vshrl.u32 %v1998_v32, 16  ;;  %v2058_v31 = vshll.u32 %v1998_v32, 16  ;;  %v4522_v22 = vld [vmem:[#allocation12 + $0x238] sm:$0xff]   ;;  %v1877_v32 = vld [vmem:[#allocation2 + $0x48] sm:$0x1f] }
 0x2b9   : > { %3241 = vmatprep.mubr.bf16.mxu0 %v2119_v63  ;;  %4232 = vmatpush3.bf16.msra.mxu1 %v4517_v3  ;;  %v2026_v7 = vsel %vm1274_vm6, %v5881_v25, %v2025_v16  ;;  %v1930_v27 = vsel %vm1184_vm0, %v1920_v18, %v1929_v15  ;;  %v1934_v57 = vrot.slane %v1932_v24, 4  ;;  %v1937_v3 = vrot.slane %v1935_v6, 5 }
 0x2ba   : > { %4233 = vmatprep.subr.bf16.mxu1 %v4518_v14  ;;  %v5919_v52 = vsel %vm1274_vm6, %v5907_v58, %v2052_v29  ;;  %v1884_v35 = vsel %vm1596_vm14, %v5690_v21, 0  ;;  %v2057_v34 = vrot.slane %v2055_v45, 3  ;;  %v2060_v60 = vrot.slane %v2058_v31, 4 }
 0x2bb   : > { %v1999_v11 = vsel %vm1263_vm8, %v5915_v43, 0  ;;  %v2034_v18 = vor.u32 %v2033_v38, %v2030_v39  ;;  %v1938_v56 = vor.u32 %v1937_v3, %v1934_v57  ;;  %v1941_v17 = vshrl.u32 %v1884_v35, 16  ;;  %v2156_v3 = vld [vmem:[#allocation2 + $0x50] sm:$0x1f] }
 0x2bc   : > { %v2061_v12 = vor.u32 %v2060_v60, %v2057_v34  ;;  %v2064_v25 = vshrl.u32 %v1999_v11, 16  ;;  %v2067_v8 = vshll.u32 %v1999_v11, 16  ;;  %v1944_v61 = vshll.u32 %v1884_v35, 16 }
 0x2bd   : > { %4234 = vmatpush3.bf16.msra.mxu1 %v4518_v14  ;;  %vm6335_vm15 = vcmp.ne.s16.totalorder %v5792_v19, 0  ;;  %v2035_v4 = vsel %vm1274_vm6, %v2025_v16, %v2034_v18  ;;  %v1885_v62 = vsel %vm1597_vm13, %v5799_v49, 0  ;;  %v1939_v14 = vsel %vm1184_vm0, %v1929_v15, %v1938_v56 }
 0x2be   : > { %4235 = vmatprep.subr.bf16.mxu1 %v4519_v44  ;;  %v5937_v20 = vsel %vm1274_vm6, %v2052_v29, %v2061_v12  ;;  %v2066_v55 = vrot.slane %v2064_v25, 3  ;;  %v2069_v9 = vrot.slane %v2067_v8, 4  ;;  %v2000_v46 = vsel %vm6335_vm15, %v1991_v1, 0  ;;  %v2148_v25 = vld [vmem:[#allocation2 + $0x10] sm:$0xf0] }
 0x2bf   : > { %3153 = vmatmul.mubr.bf16.gmra.mrb[40].mxu1 %v2119_v63  ;;  %v4521_v63 = vld [vmem:[#allocation12 + $0x230] sm:$0xff]   ;;  %v2073_v2 = vshrl.u32 %v2000_v46, 16  ;;  %v2076_v40 = vshll.u32 %v2000_v46, 16  ;;  %v1943_v30 = vrot.slane %v1941_v17, 4  ;;  %v1946_v28 = vrot.slane %v1944_v61, 5 }
 0x2c0   : > { %3242 = vmatmul.mubr.bf16.gmra.mrb[56].mxu0 %v2026_v7  ;;  %3160 = vmatprep.mubr.bf16.mxu1 %v1930_v27  ;;  %v2070_v36 = vor.u32 %v2069_v9, %v2066_v55  ;;  %v1950_v16 = vshrl.u32 %v1885_v62, 16  ;;  %v1953_v6 = vshll.u32 %v1885_v62, 16  ;;  %v2044_v45 = vsel %vm1274_vm6, %v2034_v18, %v5907_v58 }
 0x2c1   : > { %3249 = vmatprep.mubr.bf16.mxu0 %v5681_v5  ;;  %4236 = vmatpush3.bf16.msra.mxu1 %v4519_v44  ;;  %v2075_v19 = vrot.slane %v2073_v2, 3  ;;  %v2078_v24 = vrot.slane %v2076_v40, 4  ;;  %v1947_v15 = vor.u32 %v1946_v28, %v1943_v30  ;;  %v1886_v7 = vsel %vm1598_vm11, %v1877_v32, 0  ;;  %v2151_v30 = vld [vmem:[#allocation2 + $0x28] sm:$0xff] }
 0x2c2   : > { %4237 = vmatprep.subr.bf16.mxu1 %v4520_v26  ;;  %v5947_v23 = vsel %vm1274_vm6, %v2061_v12, %v2070_v36  ;;  %v1952_v38 = vrot.slane %v1950_v16, 4  ;;  %v1955_v44 = vrot.slane %v1953_v6, 5  ;;  %v2164_v35 = vsel %vm1597_vm13, %v5915_v43, 0 }
 0x2c3   : > { %v2079_v29 = vor.u32 %v2078_v24, %v2075_v19  ;;  %v1948_v31 = vsel %vm1184_vm0, %v1938_v56, %v1947_v15  ;;  %v1962_v58 = vshll.u32 %v1886_v7, 16  ;;  %v2229_v34 = vshrl.u32 %v2164_v35, 16  ;;  %v1826_v19 = vld [vmem:[#allocation2 + $0x48] sm:$0xf] }
 0x2c4   : > { %v1956_v33 = vor.u32 %v1955_v44, %v1952_v38  ;;  %v2165_v12 = vsel %vm1598_vm11, %v2156_v3, 0  ;;  %v2158_v10 = vsel %vm1591_vm12, %v5861_v13, 0  ;;  %v2150_v13 = vld [vmem:[#allocation2 + $0x20] sm:$0xff]  ;;  %v1851_v32 = vrot.slane %v1826_v19, 4 }
 0x2c5   : > { %4238 = vmatpush3.bf16.msra.mxu1 %v4520_v26  ;;  %v5952_v39 = vsel %vm1274_vm6, %v2070_v36, %v2079_v29  ;;  %v2232_v26 = vshll.u32 %v2164_v35, 16  ;;  %v2238_v8 = vshrl.u32 %v2165_v12, 16  ;;  %v2241_v0 = vshll.u32 %v2165_v12, 16 }
 0x2c6   : > { %4239 = vmatprep.subr.bf16.mxu1 %v4521_v63  ;;  %v1957_v56 = vsel %vm1184_vm0, %v1947_v15, %v1956_v33  ;;  %v1964_v1 = vrot.slane %v1962_v58, 5  ;;  %vm6336_vm6 = vcmp.ne.s16.totalorder %v5464_v42, 0  ;;  %v2175_v40 = vshrl.u32 %v2158_v10, 16 }
 0x2c7   : > { %3161 = vmatmul.mubr.bf16.gmra.mrb[44].mxu1 %v5681_v5  ;;  %v2163_v5 = vsel %vm1596_vm14, %v5799_v49, 0  ;;  %v1959_v49 = vshrl.u32 %v1886_v7, 16  ;;  %v2234_v18 = vrot.slane %v2232_v26, 5  ;;  %v2240_v61 = vrot.slane %v2238_v8, 4 }
 0x2c8   : > { %3250 = vmatmul.mubr.bf16.gmra.mrb[60].mxu0 %v2035_v4  ;;  %3168 = vmatprep.mubr.bf16.mxu1 %v1939_v14  ;;  %v2220_v27 = vshrl.u32 %v2163_v5, 16  ;;  %v2223_v57 = vshll.u32 %v2163_v5, 16  ;;  %v2157_v55 = vsel %vm6336_vm6, %v2148_v25, 0  ;;  %v2243_v36 = vrot.slane %v2241_v0, 5 }
 0x2c9   : > { %3257 = vmatprep.mubr.bf16.mxu0 %v5722_v51  ;;  %4240 = vmatpush3.bf16.msra.mxu1 %v4521_v63  ;;  %v1961_v17 = vrot.slane %v1959_v49, 4  ;;  %v2167_v62 = vshrl.u32 %v2157_v55, 16  ;;  %v2170_v2 = vshll.u32 %v2157_v55, 16  ;;  %v2178_v14 = vshll.u32 %v2158_v10, 16 }
 0x2ca   : > { %4241 = vmatprep.subr.bf16.mxu1 %v4522_v22  ;;  %v2222_v60 = vrot.slane %v2220_v27, 4  ;;  %v2225_v11 = vrot.slane %v2223_v57, 5  ;;  %v2244_v4 = vor.u32 %v2243_v36, %v2240_v61  ;;  %v2177_v24 = vrot.slane %v2175_v40, 4  ;;  %v2152_v27 = vld [vmem:[#allocation2 + $0x30] sm:$0xff] }
 0x2cb   : > { %v1965_v42 = vor.u32 %v1964_v1, %v1961_v17  ;;  %v2180_v16 = vrot.slane %v2178_v14, 5  ;;  %v2159_v6 = vsel %vm1592_vm3, %v2150_v13, 0  ;;  %v2160_v15 = vsel %vm1593_vm10, %v2151_v30, 0 }
 0x2cc   : > { %v5972_v9 = vor.u32 %v2225_v11, %v2222_v60  ;;  %v2184_v38 = vshrl.u32 %v2159_v6, 16  ;;  %v2187_v44 = vshll.u32 %v2159_v6, 16  ;;  %v2193_v50 = vshrl.u32 %v2160_v15, 16 }
 0x2cd   : > { %4242 = vmatpush3.bf16.msra.mxu1 %v4522_v22  ;;  %v1966_v28 = vsel %vm1184_vm0, %v1956_v33, %v1965_v42  ;;  %v2169_v22 = vrot.slane %v2167_v62, 4  ;;  %v1852_v54 = vsel %vm790_vm4, %v5910_v47, %v1851_v32  ;;  %v2161_v33 = vsel %vm1594_vm1, %v2152_v27, 0 }
 0x2ce   : > { %v2186_v57 = vrot.slane %v2184_v38, 4  ;;  %v2189_v3 = vrot.slane %v2187_v44, 5  ;;  %v2195_v35 = vrot.slane %v2193_v50, 4  ;;  %v2162_v58 = vsel %vm1595_vm5, %v5690_v21, 0 }
 0x2cf   : > { %3169 = vmatmul.mubr.bf16.gmra.mrb[48].mxu1 %v5722_v51  ;;  %v2231_v51 = vrot.slane %v2229_v34, 4  ;;  %v2202_v34 = vshrl.u32 %v2161_v33, 16  ;;  %v2205_v60 = vshll.u32 %v2161_v33, 16  ;;  %v2211_v26 = vshrl.u32 %v2162_v58, 16 }
 0x2d0   : > { %3258 = vmatmul.mubr.bf16.gmra.mrb[64].mxu0 %v2044_v45  ;;  %3176 = vmatprep.mubr.bf16.mxu1 %v1948_v31  ;;  %v2181_v45 = vor.u32 %v2180_v16, %v2177_v24  ;;  %v2196_v31 = vshll.u32 %v2160_v15, 16  ;;  %v2214_v12 = vshll.u32 %v2162_v58, 16 }
 0x2d1   : > { %3265 = vmatprep.mubr.bf16.mxu0 %v5772_v59  ;;  %v2235_v63 = vor.u32 %v2234_v18, %v2231_v51  ;;  %v2204_v25 = vrot.slane %v2202_v34, 4  ;;  %v2207_v51 = vrot.slane %v2205_v60, 5  ;;  %v2213_v18 = vrot.slane %v2211_v26, 4 }
 0x2d2   : > { %v2216_v41 = vrot.slane %v2214_v12, 5 }
 0x2d3   : > { %v5980_v46 = vsel %vm1184_vm0, %v5972_v9, %v2235_v63  ;;  %v5985_v53 = vsel %vm1184_vm0, %v2235_v63, %v2244_v4  ;;  %v2208_v21 = vor.u32 %v2207_v51, %v2204_v25 }
 0x2d7   : > { %3177 = vmatmul.mubr.bf16.gmra.mrb[52].mxu1 %v5772_v59  ;;  %v2128_v59 = vrot.slane %v5915_v43, 4  ;;  %v2105_v43 = vld [vmem:[#allocation2 + $0x50] sm:$0xf] }
 0x2d8   : > { %3266 = vmatmul.mubr.bf16.gmra.mrb[68].mxu0 %v5919_v52  ;;  %3184 = vmatprep.mubr.bf16.mxu1 %v1957_v56  ;;  %v2172_v52 = vrot.slane %v2170_v2, 5  ;;  %v2130_v7 = vrot.slane %v2105_v43, 4 }
 0x2d9   : > { %3273 = vmatprep.mubr.bf16.mxu0 %v5924_v37  ;;  %v2129_v29 = vsel %vm790_vm4, %v5910_v47, %v2128_v59  ;;  %v2190_v47 = vor.u32 %v2189_v3, %v2186_v57 }
 0x2da   : > { %v2173_v5 = vor.u32 %v2172_v52, %v2169_v22  ;;  %v2131_v49 = vsel %vm790_vm4, %v2128_v59, %v2130_v7 }
 0x2db   : > { %v2191_v48 = vsel %vm1184_vm0, %v2181_v45, %v2190_v47 }
 0x2df   : > { %3185 = vmatmul.mubr.bf16.gmra.mrb[56].mxu1 %v5924_v37  ;;  %v2182_v37 = vsel %vm1184_vm0, %v2173_v5, %v2181_v45 }
 0x2e0   : > { %3274 = vmatmul.mubr.bf16.gmra.mrb[72].mxu0 %v5937_v20  ;;  %3192 = vmatprep.mubr.bf16.mxu1 %v1966_v28  ;;  %v2198_v20 = vrot.slane %v2196_v31, 5 }
 0x2e1   : > { %3281 = vmatprep.mubr.bf16.mxu0 %v2129_v29 }
 0x2e2   : > { %v2199_v11 = vor.u32 %v2198_v20, %v2195_v35 }
 0x2e4   : > { %v2200_v8 = vsel %vm1184_vm0, %v2190_v47, %v2199_v11  ;;  %v2209_v0 = vsel %vm1184_vm0, %v2199_v11, %v2208_v21 }
 0x2e7   : > { %3193 = vmatmul.mubr.bf16.gmra.mrb[60].mxu1 %v1852_v54 }
 0x2e8   : > { %3282 = vmatmul.mubr.bf16.gmra.mrb[76].mxu0 %v5947_v23  ;;  %4243 = vmatprep.mubr.bf16.mxu1 %v2182_v37  ;;  %v2217_v23 = vor.u32 %v2216_v41, %v2213_v18 }
 0x2e9   : > { %3289 = vmatprep.mubr.bf16.mxu0 %v2131_v49 }
 0x2ea   : > { %v2218_v56 = vsel %vm1184_vm0, %v2208_v21, %v2217_v23  ;;  %v2227_v17 = vsel %vm1184_vm0, %v2217_v23, %v5972_v9 }
 0x2ef   : > { %4244 = vmatmul.mubr.bf16.vlgmr.msra.gmra.mrb[64].mxu1 %v2191_v48 }
 0x2f0   : > { %3290 = vmatmul.mubr.bf16.gmra.mrb[80].mxu0 %v5952_v39  ;;  %4247 = vmatprep.mubr.bf16.mxu1 %v2200_v8 }
 0x2f7   : > { %4248 = vmatmul.mubr.bf16.gmra.mrb[68].mxu1 %v2209_v0 }
 0x2f8   : > { %4251 = vmatprep.mubr.bf16.mxu1 %v2218_v56 }
 0x2ff   : > { %4252 = vmatmul.mubr.bf16.gmra.mrb[72].mxu1 %v2227_v17 }
 0x300   : > { %4255 = vmatprep.mubr.bf16.mxu1 %v5980_v46 }
 0x307   : > { %4256 = vmatmul.mubr.bf16.gmra.mrb[76].mxu1 %v5985_v53 }
 0x330   : > { %v3935_v1 = vpop.f32.mrb[0].mxu1 }
 0x331   : > { %v3936_v61 = vpop.f32.mrb[1].mxu1 }
 0x332   : > { %v3937_v39 = vadd.f32 %v3936_v61, %v3935_v1  ;;  %v3938_v55 = vpop.f32.mrb[2].mxu1 }
 0x333   : > { %v3939_v63 = vpop.f32.mrb[3].mxu1 }
 0x334   : > { %v3940_v36 = vadd.f32 %v3939_v63, %v3938_v55 }
 0x336   : > { %v3999_v10 = vpop.f32.mrb[20].mxu0 }
 0x337   : > { %v4000_v4 = vpop.f32.mrb[21].mxu0 }
 0x338   : > { %v4001_v42 = vadd.f32 %v4000_v4, %v3999_v10  ;;  %v4002_v62 = vpop.f32.mrb[22].mxu0 }
 0x339   : > { %v4003_v2 = vpop.f32.mrb[23].mxu0 }
 0x33a   : > { %v6016_v40 = vadd.f32 %v4001_v42, %v3937_v39  ;;  %v4004_v14 = vadd.f32 %v4003_v2, %v4002_v62 }
 0x33c   : > { %v6018_v9 = vadd.f32 %v4004_v14, %v3940_v36  ;;  %v3941_v59 = vpop.f32.mrb[4].mxu1 }
 0x33d   : > { %v3942_v46 = vpop.f32.mrb[5].mxu1 }
 0x33e   : > { %v3943_v13 = vadd.f32 %v3942_v46, %v3941_v59  ;;  %v3944_v53 = vpop.f32.mrb[6].mxu1 }
 0x33f   : > { %v3945_v28 = vpop.f32.mrb[7].mxu1 }
 0x340   : > { %v4005_v30 = vpop.f32.mrb[24].mxu0  ;;  %v3946_v19 = vadd.f32 %v3945_v28, %v3944_v53 }
 0x341   : > { %v4006_v22 = vpop.f32.mrb[25].mxu0 }
 0x342   : > { %v4007_v52 = vadd.f32 %v4006_v22, %v4005_v30  ;;  %v4008_v24 = vpop.f32.mrb[26].mxu0 }
 0x343   : > { %v4009_v16 = vpop.f32.mrb[27].mxu0 }
 0x344   : > { %v6020_v6 = vadd.f32 %v4007_v52, %v3943_v13  ;;  %v4010_v29 = vadd.f32 %v4009_v16, %v4008_v24 }
 0x346   : > { %v6022_v15 = vadd.f32 %v4010_v29, %v3946_v19 }
 0x347   : > { %v3947_v43 = vpop.f32.mrb[8].mxu1 }
 0x348   : > { %v3948_v32 = vpop.f32.mrb[9].mxu1 }
 0x349   : > { %v3949_v38 = vadd.f32 %v3948_v32, %v3947_v43  ;;  %v3950_v44 = vpop.f32.mrb[10].mxu1 }
 0x34a   : > { %v4011_v5 = vpop.f32.mrb[28].mxu0  ;;  %v3951_v45 = vpop.f32.mrb[11].mxu1 }
 0x34b   : > { %v4012_v50 = vpop.f32.mrb[29].mxu0  ;;  %v3952_v31 = vadd.f32 %v3951_v45, %v3950_v44 }
 0x34c   : > { %v4013_v7 = vadd.f32 %v4012_v50, %v4011_v5  ;;  %v4014_v27 = vpop.f32.mrb[30].mxu0 }
 0x34d   : > { %v4015_v54 = vpop.f32.mrb[31].mxu0 }
 0x34e   : > { %v6024_v57 = vadd.f32 %v4013_v7, %v3949_v38  ;;  %v4016_v3 = vadd.f32 %v4015_v54, %v4014_v27 }
 0x350   : > { %v6026_v37 = vadd.f32 %v4016_v3, %v3952_v31 }
 0x351   : > { %v3953_v35 = vpop.f32.mrb[12].mxu1 }
 0x352   : > { %v3954_v20 = vpop.f32.mrb[13].mxu1 }
 0x353   : > { %v3955_v33 = vadd.f32 %v3954_v20, %v3953_v35  ;;  %v3956_v49 = vpop.f32.mrb[14].mxu1 }
 0x354   : > { %v4017_v58 = vpop.f32.mrb[32].mxu0  ;;  %v3957_v47 = vpop.f32.mrb[15].mxu1 }
 0x355   : > { %v4018_v34 = vpop.f32.mrb[33].mxu0  ;;  %v3958_v60 = vadd.f32 %v3957_v47, %v3956_v49 }
 0x356   : > { %v4019_v11 = vadd.f32 %v4018_v34, %v4017_v58  ;;  %v4020_v26 = vpop.f32.mrb[34].mxu0 }
 0x357   : > { %v4021_v12 = vpop.f32.mrb[35].mxu0 }
 0x358   : > { %v6028_v48 = vadd.f32 %v4019_v11, %v3955_v33  ;;  %v4022_v25 = vadd.f32 %v4021_v12, %v4020_v26 }
 0x35a   : > { %v6030_v51 = vadd.f32 %v4022_v25, %v3958_v60 }
 0x35e   : > { %v3959_v8 = vpop.f32.mrb[16].mxu1 }
 0x35f   : > { %v3960_v18 = vpop.f32.mrb[17].mxu1 }
 0x360   : > { %v3961_v41 = vadd.f32 %v3960_v18, %v3959_v8  ;;  %v3962_v21 = vpop.f32.mrb[18].mxu1 }
 0x361   : > { %v3963_v23 = vpop.f32.mrb[19].mxu1 }
 0x362   : > { %v3964_v0 = vadd.f32 %v3963_v23, %v3962_v21 }
 0x363   : > { %v4023_v56 = vpop.f32.mrb[36].mxu0 }
 0x364   : > { %v4024_v17 = vpop.f32.mrb[37].mxu0 }
 0x365   : > { %v4025_v1 = vadd.f32 %v4024_v17, %v4023_v56  ;;  %v4026_v61 = vpop.f32.mrb[38].mxu0 }
 0x366   : > { %v4027_v39 = vpop.f32.mrb[39].mxu0 }
 0x367   : > { %v6032_v55 = vadd.f32 %v4025_v1, %v3961_v41  ;;  %v4028_v63 = vadd.f32 %v4027_v39, %v4026_v61 }
 0x369   : > { %v6034_v36 = vadd.f32 %v4028_v63, %v3964_v0 }
 0x36a   : > { %v3965_v10 = vpop.f32.mrb[20].mxu1 }
 0x36b   : > { %v3966_v4 = vpop.f32.mrb[21].mxu1 }
 0x36c   : > { %v3967_v42 = vadd.f32 %v3966_v4, %v3965_v10  ;;  %v3968_v62 = vpop.f32.mrb[22].mxu1 }
 0x36d   : > { %v3969_v2 = vpop.f32.mrb[23].mxu1 }
 0x36e   : > { %v3970_v14 = vadd.f32 %v3969_v2, %v3968_v62 }
 0x36f   : > { %v4029_v59 = vpop.f32.mrb[40].mxu0 }
 0x370   : > { %v4030_v46 = vpop.f32.mrb[41].mxu0 }
 0x371   : > { %v4031_v13 = vadd.f32 %v4030_v46, %v4029_v59  ;;  %v4032_v53 = vpop.f32.mrb[42].mxu0 }
 0x372   : > { %v4033_v30 = vpop.f32.mrb[43].mxu0  ;;  %v3971_v28 = vpop.f32.mrb[24].mxu1 }
 0x373   : > { %v6036_v22 = vadd.f32 %v4031_v13, %v3967_v42  ;;  %v4034_v19 = vadd.f32 %v4033_v30, %v4032_v53  ;;  %v3972_v52 = vpop.f32.mrb[25].mxu1 }
 0x374   : > { %v3973_v24 = vadd.f32 %v3972_v52, %v3971_v28  ;;  %v3974_v16 = vpop.f32.mrb[26].mxu1 }
 0x375   : > { %v6038_v29 = vadd.f32 %v4034_v19, %v3970_v14  ;;  %v3975_v43 = vpop.f32.mrb[27].mxu1 }
 0x376   : > { %v3976_v32 = vadd.f32 %v3975_v43, %v3974_v16 }
 0x37a   : > { %v3977_v38 = vpop.f32.mrb[28].mxu1 }
 0x37b   : > { %v4035_v44 = vpop.f32.mrb[44].mxu0  ;;  %v3978_v5 = vpop.f32.mrb[29].mxu1 }
 0x37c   : > { %v4036_v45 = vpop.f32.mrb[45].mxu0  ;;  %v3979_v50 = vadd.f32 %v3978_v5, %v3977_v38  ;;  %v3980_v31 = vpop.f32.mrb[30].mxu1 }
 0x37d   : > { %v4037_v7 = vadd.f32 %v4036_v45, %v4035_v44  ;;  %v4038_v27 = vpop.f32.mrb[46].mxu0  ;;  %v3981_v54 = vpop.f32.mrb[31].mxu1 }
 0x37e   : > { %v4039_v3 = vpop.f32.mrb[47].mxu0  ;;  %v3982_v35 = vadd.f32 %v3981_v54, %v3980_v31 }
 0x37f   : > { %v6040_v20 = vadd.f32 %v4037_v7, %v3973_v24  ;;  %v4040_v33 = vadd.f32 %v4039_v3, %v4038_v27 }
 0x381   : > { %v6042_v49 = vadd.f32 %v4040_v33, %v3976_v32 }
 0x382   : > { %v4063_v58 = vpop.f32.mrb[32].mxu1 }
 0x383   : > { %v4041_v47 = vpop.f32.mrb[48].mxu0  ;;  %v4064_v34 = vpop.f32.mrb[33].mxu1 }
 0x384   : > { %v4042_v60 = vpop.f32.mrb[49].mxu0  ;;  %v4065_v11 = vadd.f32 %v4064_v34, %v4063_v58  ;;  %v4066_v26 = vpop.f32.mrb[34].mxu1 }
 0x385   : > { %v4043_v12 = vadd.f32 %v4042_v60, %v4041_v47  ;;  %v4044_v25 = vpop.f32.mrb[50].mxu0  ;;  %v4067_v8 = vpop.f32.mrb[35].mxu1 }
 0x386   : > { %v4045_v18 = vpop.f32.mrb[51].mxu0  ;;  %v3139_v41 = vadd.f32 %v4065_v11, %v6016_v40  ;;  %v4068_v21 = vadd.f32 %v4067_v8, %v4066_v26 }
 0x387   : > { %v6045_v23 = vadd.f32 %v4043_v12, %v3979_v50  ;;  %v4046_v0 = vadd.f32 %v4045_v18, %v4044_v25 }
 0x388   : > { %v3142_v56 = vadd.f32 %v4068_v21, %v6018_v9 }
 0x389   : > { %v6048_v17 = vadd.f32 %v4046_v0, %v3982_v35 }
 0x38a   : > { %v4069_v1 = vpop.f32.mrb[36].mxu1 }
 0x38b   : > { %v4127_v61 = vpop.f32.mrb[52].mxu0  ;;  %v4070_v39 = vpop.f32.mrb[37].mxu1 }
 0x38c   : > { %v4128_v63 = vpop.f32.mrb[53].mxu0  ;;  %v4071_v10 = vadd.f32 %v4070_v39, %v4069_v1  ;;  %v4072_v4 = vpop.f32.mrb[38].mxu1 }
 0x38d   : > { %v4129_v42 = vadd.f32 %v4128_v63, %v4127_v61  ;;  %v4130_v62 = vpop.f32.mrb[54].mxu0  ;;  %v4073_v2 = vpop.f32.mrb[39].mxu1 }
 0x38e   : > { %v4131_v14 = vpop.f32.mrb[55].mxu0  ;;  %v3147_v40 = vadd.f32 %v4071_v10, %v6020_v6  ;;  %v4074_v59 = vadd.f32 %v4073_v2, %v4072_v4 }
 0x38f   : > { %v4132_v46 = vadd.f32 %v4131_v14, %v4130_v62  ;;  %v6051_v13 = vadd.f32 %v4129_v42, %v3139_v41 }
 0x390   : > { %v3150_v9 = vadd.f32 %v4074_v59, %v6022_v15 }
 0x391   : > { %v6054_v53 = vadd.f32 %v4132_v46, %v3142_v56 }
 0x392   : > { %v4075_v30 = vpop.f32.mrb[40].mxu1 }
 0x393   : > { %v4133_v28 = vpop.f32.mrb[56].mxu0  ;;  %v4076_v19 = vpop.f32.mrb[41].mxu1 }
 0x394   : > { %v4134_v52 = vpop.f32.mrb[57].mxu0  ;;  %v4077_v24 = vadd.f32 %v4076_v19, %v4075_v30  ;;  %v4078_v16 = vpop.f32.mrb[42].mxu1 }
 0x395   : > { %v4135_v43 = vadd.f32 %v4134_v52, %v4133_v28  ;;  %v4136_v32 = vpop.f32.mrb[58].mxu0  ;;  %v4079_v38 = vpop.f32.mrb[43].mxu1 }
 0x396   : > { %v4137_v44 = vpop.f32.mrb[59].mxu0  ;;  %v3155_v6 = vadd.f32 %v4077_v24, %v6024_v57  ;;  %v4080_v5 = vadd.f32 %v4079_v38, %v4078_v16 }
 0x397   : > { %v4138_v45 = vadd.f32 %v4137_v44, %v4136_v32  ;;  %v6057_v50 = vadd.f32 %v4135_v43, %v3147_v40 }
 0x398   : > { %v3158_v15 = vadd.f32 %v4080_v5, %v6026_v37 }
 0x399   : > { %v6060_v31 = vadd.f32 %v4138_v45, %v3150_v9 }
 0x39a   : > { %v4081_v7 = vpop.f32.mrb[44].mxu1 }
 0x39b   : > { %v4139_v27 = vpop.f32.mrb[60].mxu0  ;;  %v4082_v54 = vpop.f32.mrb[45].mxu1 }
 0x39c   : > { %v4140_v3 = vpop.f32.mrb[61].mxu0  ;;  %v4083_v35 = vadd.f32 %v4082_v54, %v4081_v7  ;;  %v4084_v33 = vpop.f32.mrb[46].mxu1 }
 0x39d   : > { %v4141_v58 = vadd.f32 %v4140_v3, %v4139_v27  ;;  %v4142_v47 = vpop.f32.mrb[62].mxu0  ;;  %v4085_v34 = vpop.f32.mrb[47].mxu1 }
 0x39e   : > { %v4143_v60 = vpop.f32.mrb[63].mxu0  ;;  %v3163_v57 = vadd.f32 %v4083_v35, %v6028_v48  ;;  %v4086_v11 = vadd.f32 %v4085_v34, %v4084_v33 }
 0x39f   : > { %v4144_v26 = vadd.f32 %v4143_v60, %v4142_v47  ;;  %v6063_v12 = vadd.f32 %v4141_v58, %v3155_v6 }
 0x3a0   : > { %v3166_v37 = vadd.f32 %v4086_v11, %v6030_v51 }
 0x3a1   : > { %v6066_v25 = vadd.f32 %v4144_v26, %v3158_v15 }
 0x3a2   : > { %v4087_v8 = vpop.f32.mrb[48].mxu1 }
 0x3a3   : > { %v4145_v18 = vpop.f32.mrb[64].mxu0  ;;  %v4088_v41 = vpop.f32.mrb[49].mxu1 }
 0x3a4   : > { %v4146_v21 = vpop.f32.mrb[65].mxu0  ;;  %v4089_v0 = vadd.f32 %v4088_v41, %v4087_v8  ;;  %v4090_v56 = vpop.f32.mrb[50].mxu1 }
 0x3a5   : > { %v4147_v1 = vadd.f32 %v4146_v21, %v4145_v18  ;;  %v4148_v61 = vpop.f32.mrb[66].mxu0  ;;  %v4091_v39 = vpop.f32.mrb[51].mxu1 }
 0x3a6   : > { %v4149_v63 = vpop.f32.mrb[67].mxu0  ;;  %v3171_v48 = vadd.f32 %v4089_v0, %v6032_v55  ;;  %v4092_v10 = vadd.f32 %v4091_v39, %v4090_v56 }
 0x3a7   : > { %v4150_v4 = vadd.f32 %v4149_v63, %v4148_v61  ;;  %v6069_v42 = vadd.f32 %v4147_v1, %v3163_v57  ;;  %v6098_v63 = vld [vmem:[#allocation13] ss:$0 sm:$0xff] }
 0x3a8   : > { %v3174_v51 = vadd.f32 %v4092_v10, %v6034_v36 }
 0x3a9   : > { %v6072_v62 = vadd.f32 %v4150_v4, %v3166_v37 }
 0x3aa   : > { %v4093_v2 = vpop.f32.mrb[52].mxu1 }
 0x3ab   : > { %v4151_v14 = vpop.f32.mrb[68].mxu0  ;;  %v4094_v40 = vpop.f32.mrb[53].mxu1 }
 0x3ac   : > { %v4152_v59 = vpop.f32.mrb[69].mxu0  ;;  %v4095_v46 = vadd.f32 %v4094_v40, %v4093_v2  ;;  %v4096_v9 = vpop.f32.mrb[54].mxu1  ;;  %v6102_v2 = vld [vmem:[#allocation15] ss:$0 sm:$0xff] }
 0x3ad   : > { %v4153_v30 = vadd.f32 %v4152_v59, %v4151_v14  ;;  %v4154_v28 = vpop.f32.mrb[70].mxu0  ;;  %v4097_v19 = vpop.f32.mrb[55].mxu1 }
 0x3ae   : > { %v4155_v52 = vpop.f32.mrb[71].mxu0  ;;  %v3179_v55 = vadd.f32 %v4095_v46, %v6036_v22  ;;  %v4098_v24 = vadd.f32 %v4097_v19, %v4096_v9  ;;  %v3863_v9 = vld [vmem:[%s6094_s2] sm:$0xff]  }
 0x3af   : > { %v4156_v16 = vadd.f32 %v4155_v52, %v4154_v28  ;;  %v6075_v43 = vadd.f32 %v4153_v30, %v3171_v48 }
 0x3b0   : > { %v3182_v36 = vadd.f32 %v4098_v24, %v6038_v29 }
 0x3b1   : > { %v6078_v32 = vadd.f32 %v4156_v16, %v3174_v51 }
 0x3b2   : > { %v4099_v38 = vpop.f32.mrb[56].mxu1 }
 0x3b3   : > { %v4157_v44 = vpop.f32.mrb[72].mxu0  ;;  %v4100_v6 = vpop.f32.mrb[57].mxu1 }
 0x3b4   : > { %v4158_v5 = vpop.f32.mrb[73].mxu0  ;;  %v4101_v45 = vadd.f32 %v4100_v6, %v4099_v38  ;;  %v4102_v15 = vpop.f32.mrb[58].mxu1 }
 0x3b5   : > { %v4159_v7 = vadd.f32 %v4158_v5, %v4157_v44  ;;  %v4160_v27 = vpop.f32.mrb[74].mxu0  ;;  %v4103_v54 = vpop.f32.mrb[59].mxu1  ;;  %v3864_v44 = vunpack.c.l.bf16 %v3863_v9 }
 0x3b6   : > { %v4161_v3 = vpop.f32.mrb[75].mxu0  ;;  %v3187_v22 = vadd.f32 %v4101_v45, %v6040_v20  ;;  %v4104_v35 = vadd.f32 %v4103_v54, %v4102_v15 }
 0x3b7   : > { %v4162_v33 = vadd.f32 %v4161_v3, %v4160_v27  ;;  %v6083_v58 = vadd.f32 %v4159_v7, %v3179_v55  ;;  %v3865_v27 = vunpack.c.h.bf16 %v3863_v9 }
 0x3b8   : > { %v3190_v29 = vadd.f32 %v4104_v35, %v6042_v49 }
 0x3b9   : > { %v6086_v47 = vadd.f32 %v4162_v33, %v3182_v36 }
 0x3ba   : > { %v4105_v34 = vpop.f32.mrb[60].mxu1 }
 0x3bb   : > { %v4163_v60 = vpop.f32.mrb[76].mxu0  ;;  %v4106_v57 = vpop.f32.mrb[61].mxu1 }
 0x3bc   : > { %v4164_v11 = vpop.f32.mrb[77].mxu0  ;;  %v4107_v26 = vadd.f32 %v4106_v57, %v4105_v34  ;;  %v4108_v37 = vpop.f32.mrb[62].mxu1 }
 0x3bd   : > { %v4165_v8 = vadd.f32 %v4164_v11, %v4163_v60  ;;  %v4166_v20 = vpop.f32.mrb[78].mxu0  ;;  %v4109_v18 = vpop.f32.mrb[63].mxu1 }
 0x3be   : > { %v4167_v41 = vpop.f32.mrb[79].mxu0  ;;  %v3195_v21 = vadd.f32 %v4107_v26, %v6045_v23  ;;  %v4110_v0 = vadd.f32 %v4109_v18, %v4108_v37  ;;  %v3894_v23 = vld [vmem:[%s6094_s2 + $0x8] sm:$0xff]  }
 0x3bf   : > { %v4168_v56 = vadd.f32 %v4167_v41, %v4166_v20  ;;  %v6089_v49 = vadd.f32 %v4165_v8, %v3187_v22  ;;  %v3868_v52 = vunpack.c.l.bf16 %v3894_v23  ;;  %v3869_v6 = vunpack.c.h.bf16 %v3894_v23  ;;  %v3896_v8 = vld [vmem:[%s6094_s2 + $0x18] sm:$0xff]  }
 0x3c0   : > { %v3198_v1 = vadd.f32 %v4110_v0, %v6048_v17 }
 0x3c1   : > { %v6096_v61 = vadd.f32 %v4168_v56, %v3190_v29 }
 0x3c2   : > { %v4245_v39 = vpop.f32.mrb[64].mxu1 }
 0x3c3   : > { %v4169_v48 = vpop.f32.mrb[80].mxu0  ;;  %v3341_v10 = vadd.f32 %v4245_v39, %v6057_v50  ;;  %v3332_v4 = vpop.f32.mrb[65].mxu1 }
 0x3c4   : > { %v4170_v51 = vpop.f32.mrb[81].mxu0  ;;  %v3333_v17 = vadd.f32 %v3332_v4, %v6051_v13  ;;  %v4246_v14 = vpop.f32.mrb[66].mxu1 }
 0x3c5   : > { %v4171_v40 = vadd.f32 %v4170_v51, %v4169_v48  ;;  %v4172_v59 = vpop.f32.mrb[82].mxu0  ;;  %v3404_v46 = vmul.f32 %v6098_v63, %v3341_v10  ;;  %v3344_v30 = vadd.f32 %v4246_v14, %v6060_v31  ;;  %v3335_v28 = vpop.f32.mrb[67].mxu1  ;;  %v3876_v10 = vunpack.c.l.bf16 %v3896_v8 }
 0x3c6   : > { %v4173_v19 = vpop.f32.mrb[83].mxu0  ;;  %v3402_v50 = vmul.f32 %v6098_v63, %v3333_v17  ;;  %v3336_v55 = vadd.f32 %v3335_v28, %v6054_v53  ;;  %v3877_v17 = vunpack.c.h.bf16 %v3896_v8 }
 0x3c7   : > { %v4174_v24 = vadd.f32 %v4173_v19, %v4172_v59  ;;  %v3427_v16 = vadd.f32 %v6102_v2, %v3404_v46  ;;  %v3405_v13 = vmul.f32 %v6098_v63, %v3344_v30  ;;  %v6112_v36 = vadd.f32 %v4171_v40, %v3195_v21  ;;  %v3895_v21 = vld [vmem:[%s6094_s2 + $0x10] sm:$0xff]  }
 0x3c8   : > { %v3425_v38 = vadd.f32 %v6102_v2, %v3402_v50  ;;  %v3403_v31 = vmul.f32 %v6098_v63, %v3336_v55  ;;  %v3873_v40 = vunpack.c.h.bf16 %v3895_v21 }
 0x3c9   : > { %vm3443_vm4 = vcmp.ge.f32.partialorder %v3427_v16, 0.0  ;;  %v3459_v5 = vmul.f32 0.1, %v3427_v16  ;;  %v3428_v45 = vadd.f32 %v6102_v2, %v3405_v13  ;;  %v6117_v15 = vadd.f32 %v4174_v24, %v3198_v1  ;;  %v3898_v13 = vld [vmem:[%s6094_s2 + $0x28] sm:$0xff]  }
 0x3ca   : > { %vm3441_vm0 = vcmp.ge.f32.partialorder %v3425_v38, 0.0  ;;  %v3457_v53 = vmul.f32 0.1, %v3425_v38  ;;  %v3426_v7 = vadd.f32 %v6102_v2, %v3403_v31  ;;  %v4249_v54 = vpop.f32.mrb[68].mxu1  ;;  %v3897_v31 = vld [vmem:[%s6094_s2 + $0x20] sm:$0xff]  }
 0x3cb   : > { %v3475_v3 = vsel %vm3443_vm4, %v3427_v16, %v3459_v5  ;;  %vm3444_vm11 = vcmp.ge.f32.partialorder %v3428_v45, 0.0  ;;  %v3460_v22 = vmul.f32 0.1, %v3428_v45  ;;  %v3357_v35 = vadd.f32 %v4249_v54, %v6069_v42  ;;  %v3348_v33 = vpop.f32.mrb[69].mxu1 }
 0x3cc   : > { %v3528_v29 = vadd.f32 %v3868_v52, %v3475_v3  ;;  %v3473_v34 = vsel %vm3441_vm0, %v3425_v38, %v3457_v53  ;;  %vm3442_vm12 = vcmp.ge.f32.partialorder %v3426_v7, 0.0  ;;  %v3458_v60 = vmul.f32 0.1, %v3426_v7  ;;  %v4250_v57 = vpop.f32.mrb[70].mxu1 }
 0x3cd   : > { %v3526_v11 = vadd.f32 %v3864_v44, %v3473_v34  ;;  %v3476_v26 = vsel %vm3444_vm11, %v3428_v45, %v3460_v22  ;;  %v3408_v37 = vmul.f32 %v6098_v63, %v3357_v35  ;;  %v3349_v20 = vadd.f32 %v3348_v33, %v6063_v12  ;;  %v3351_v18 = vpop.f32.mrb[71].mxu1 }
 0x3ce   : > { %3544 = vst [vmem:[%s5337_s4 + $0x10] sm:$0xff] %v3528_v29  ;;  %v3529_v42 = vadd.f32 %v3869_v6, %v3476_v26  ;;  %v3474_v41 = vsel %vm3442_vm12, %v3426_v7, %v3458_v60  ;;  %v3360_v0 = vadd.f32 %v4250_v57, %v6072_v62  ;;  %v3352_v56 = vadd.f32 %v3351_v18, %v6066_v25 }
 0x3cf   : > { %3542 = vst [vmem:[%s5337_s4] sm:$0xff] %v3526_v11  ;;  %v3527_v1 = vadd.f32 %v3865_v27, %v3474_v41  ;;  %v3431_v39 = vadd.f32 %v6102_v2, %v3408_v37  ;;  %v3406_v48 = vmul.f32 %v6098_v63, %v3349_v20  ;;  %v3872_v62 = vunpack.c.l.bf16 %v3895_v21 }
 0x3d0   : > { %3545 = vst [vmem:[%s5337_s4 + $0x18] sm:$0xff] %v3529_v42  ;;  %v3409_v12 = vmul.f32 %v6098_v63, %v3360_v0  ;;  %v3407_v23 = vmul.f32 %v6098_v63, %v3352_v56  ;;  %v3880_v29 = vunpack.c.l.bf16 %v3897_v31  ;;  %v3885_v34 = vunpack.c.h.bf16 %v3898_v13 }
 0x3d1   : > { %3543 = vst [vmem:[%s5337_s4 + $0x8] sm:$0xff] %v3527_v1  ;;  %vm3447_vm3 = vcmp.ge.f32.partialorder %v3431_v39, 0.0  ;;  %v3463_v4 = vmul.f32 0.1, %v3431_v39  ;;  %v3429_v51 = vadd.f32 %v6102_v2, %v3406_v48  ;;  %v3881_v57 = vunpack.c.h.bf16 %v3897_v31  ;;  %v3900_v1 = vld [vmem:[%s6094_s2 + $0x38] sm:$0xff]  }
 0x3d2   : > { %v3432_v25 = vadd.f32 %v6102_v2, %v3409_v12  ;;  %v3430_v14 = vadd.f32 %v6102_v2, %v3407_v23  ;;  %v4253_v59 = vpop.f32.mrb[72].mxu1 }
 0x3d3   : > { %v3479_v46 = vsel %vm3447_vm3, %v3431_v39, %v3463_v4  ;;  %vm3445_vm10 = vcmp.ge.f32.partialorder %v3429_v51, 0.0  ;;  %v3461_v9 = vmul.f32 0.1, %v3429_v51  ;;  %v3373_v30 = vadd.f32 %v4253_v59, %v6083_v58  ;;  %v3364_v28 = vpop.f32.mrb[73].mxu1 }
 0x3d4   : > { %v3532_v19 = vadd.f32 %v3876_v10, %v3479_v46  ;;  %vm3448_vm1 = vcmp.ge.f32.partialorder %v3432_v25, 0.0  ;;  %v3464_v52 = vmul.f32 0.1, %v3432_v25  ;;  %vm3446_vm5 = vcmp.ge.f32.partialorder %v3430_v14, 0.0  ;;  %v4254_v50 = vpop.f32.mrb[74].mxu1 }
 0x3d5   : > { %v3477_v55 = vsel %vm3445_vm10, %v3429_v51, %v3461_v9  ;;  %v3462_v24 = vmul.f32 0.1, %v3430_v14  ;;  %v3412_v16 = vmul.f32 %v6098_v63, %v3373_v30  ;;  %v3365_v38 = vadd.f32 %v3364_v28, %v6075_v43  ;;  %v3367_v44 = vpop.f32.mrb[75].mxu1 }
 0x3d6   : > { %3548 = vst [vmem:[%s5337_s4 + $0x30] sm:$0xff] %v3532_v19  ;;  %v3530_v6 = vadd.f32 %v3872_v62, %v3477_v55  ;;  %v3480_v58 = vsel %vm3448_vm1, %v3432_v25, %v3464_v52  ;;  %v3376_v5 = vadd.f32 %v4254_v50, %v6086_v47  ;;  %v3368_v45 = vadd.f32 %v3367_v44, %v6078_v32 }
 0x3d7   : > { %v3533_v53 = vadd.f32 %v3877_v17, %v3480_v58  ;;  %v3478_v7 = vsel %vm3446_vm5, %v3430_v14, %v3462_v24  ;;  %v3435_v27 = vadd.f32 %v6102_v2, %v3412_v16  ;;  %v3410_v54 = vmul.f32 %v6098_v63, %v3365_v38  ;;  %v3899_v17 = vld [vmem:[%s6094_s2 + $0x30] sm:$0xff]   ;;  %s4870_s2 = smov [#allocation16]  }
 0x3d8   : > { %3546 = vst [vmem:[%s5337_s4 + $0x20] sm:$0xff] %v3530_v6  ;;  %v3531_v3 = vadd.f32 %v3873_v40, %v3478_v7  ;;  %v3884_v43 = vunpack.c.l.bf16 %v3898_v13  ;;  %v3413_v22 = vmul.f32 %v6098_v63, %v3376_v5  ;;  %v3411_v35 = vmul.f32 %v6098_v63, %v3368_v45  ;;  %s4725_s27 = sshll.u32 %s4870_s2, 4  ;;  %s4726_s27 = int_to_ptr.vmem [resolvable:$false] %s4725_s27 }
 0x3d9   : > { %3549 = vst [vmem:[%s5337_s4 + $0x38] sm:$0xff] %v3533_v53  ;;  %vm3451_vm9 = vcmp.ge.f32.partialorder %v3435_v27, 0.0  ;;  %v3467_v33 = vmul.f32 0.1, %v3435_v27  ;;  %v3433_v47 = vadd.f32 %v6102_v2, %v3410_v54  ;;  %v3892_v14 = vunpack.c.l.bf16 %v3900_v1  ;;  %s4727_s30 = scalar_lea.vmem %s4726_s27, 4096  ;;  %p4728_p0 = scmp.lt.s32.totalorder %s6178_s7, %s4726_s27 }
 0x3da   : > { %3547 = vst [vmem:[%s5337_s4 + $0x28] sm:$0xff] %v3531_v3  ;;  %v3436_v32 = vadd.f32 %v6102_v2, %v3413_v22  ;;  %v3434_v60 = vadd.f32 %v6102_v2, %v3411_v35  ;;  %v4257_v11 = vpop.f32.mrb[76].mxu1  ;;  %v3888_v46 = vunpack.c.l.bf16 %v3899_v17  ;;  %v3893_v30 = vunpack.c.h.bf16 %v3900_v1  ;;  %p4729_p3 = scmp.lt.s32.totalorder %s4727_s30, %s4721_s17 }
 0x3db   : > { %v3483_v26 = vsel %vm3451_vm9, %v3435_v27, %v3467_v33  ;;  %vm3449_vm14 = vcmp.ge.f32.partialorder %v3433_v47, 0.0  ;;  %v3465_v37 = vmul.f32 0.1, %v3433_v47  ;;  %v3389_v8 = vadd.f32 %v4257_v11, %v6112_v36  ;;  %v3380_v20 = vpop.f32.mrb[77].mxu1 }
 0x3dc   : > { %v3536_v18 = vadd.f32 %v3884_v43, %v3483_v26  ;;  %vm3452_vm13 = vcmp.ge.f32.partialorder %v3436_v32, 0.0  ;;  %v3468_v42 = vmul.f32 0.1, %v3436_v32  ;;  %vm3450_vm8 = vcmp.ge.f32.partialorder %v3434_v60, 0.0  ;;  %v4258_v41 = vpop.f32.mrb[78].mxu1  ;;  %p4730_p2 = por %p4729_p3, %p4728_p0 }
 0x3dd   : > { %v3481_v21 = vsel %vm3449_vm14, %v3433_v47, %v3465_v37  ;;  %v3466_v0 = vmul.f32 0.1, %v3434_v60  ;;  %v3416_v56 = vmul.f32 %v6098_v63, %v3389_v8  ;;  %v3381_v39 = vadd.f32 %v3380_v20, %v6089_v49  ;;  %v3383_v48 = vpop.f32.mrb[79].mxu1 }
 0x3de   : > { %3552 = vst [vmem:[%s5337_s4 + $0x50] sm:$0xff] %v3536_v18  ;;  %v3534_v36 = vadd.f32 %v3880_v29, %v3481_v21  ;;  %v3484_v10 = vsel %vm3452_vm13, %v3436_v32, %v3468_v42  ;;  %v3392_v12 = vadd.f32 %v4258_v41, %v6117_v15  ;;  %v3384_v23 = vadd.f32 %v3383_v48, %v6096_v61  ;;  %p4731_p9 = pnand %p4730_p2, %p4724_p12 }
 0x3df   : > { %v3537_v4 = vadd.f32 %v3885_v34, %v3484_v10  ;;  %v3482_v51 = vsel %vm3450_vm8, %v3434_v60, %v3466_v0  ;;  %v3439_v62 = vadd.f32 %v6102_v2, %v3416_v56  ;;  %v3414_v25 = vmul.f32 %v6098_v63, %v3381_v39 }
 0x3e0   : > { %3550 = vst [vmem:[%s5337_s4 + $0x40] sm:$0xff] %v3534_v36  ;;  %v3535_v49 = vadd.f32 %v3881_v57, %v3482_v51  ;;  %v3417_v40 = vmul.f32 %v6098_v63, %v3392_v12  ;;  %v3415_v59 = vmul.f32 %v6098_v63, %v3384_v23  ;;  %v3889_v63 = vunpack.c.h.bf16 %v3899_v17 }
 0x3e1   : > { %3553 = vst [vmem:[%s5337_s4 + $0x58] sm:$0xff] %v3537_v4  ;;  %vm3455_vm7 = vcmp.ge.f32.partialorder %v3439_v62, 0.0  ;;  %v3471_v61 = vmul.f32 0.1, %v3439_v62  ;;  %v3437_v15 = vadd.f32 %v6102_v2, %v3414_v25 }
 0x3e2   : > { %3551 = vst [vmem:[%s5337_s4 + $0x48] sm:$0xff] %v3535_v49  ;;  %v3440_v9 = vadd.f32 %v6102_v2, %v3417_v40  ;;  %v3438_v28 = vadd.f32 %v6102_v2, %v3415_v59 }
 0x3e3   : > { %v3487_v19 = vsel %vm3455_vm7, %v3439_v62, %v3471_v61  ;;  %vm3453_vm2 = vcmp.ge.f32.partialorder %v3437_v15, 0.0  ;;  %v3469_v52 = vmul.f32 0.1, %v3437_v15 }
 0x3e4   : > { %v3540_v50 = vadd.f32 %v3892_v14, %v3487_v19  ;;  %vm3456_vm15 = vcmp.ge.f32.partialorder %v3440_v9, 0.0  ;;  %v3472_v55 = vmul.f32 0.1, %v3440_v9  ;;  %vm3454_vm6 = vcmp.ge.f32.partialorder %v3438_v28, 0.0 }
 0x3e5   : > { %v3485_v24 = vsel %vm3453_vm2, %v3437_v15, %v3469_v52  ;;  %v3470_v16 = vmul.f32 0.1, %v3438_v28 }
 0x3e6   : > { %3556 = vst [vmem:[%s5337_s4 + $0x70] sm:$0xff] %v3540_v50  ;;  %v3538_v2 = vadd.f32 %v3888_v46, %v3485_v24  ;;  %v3488_v13 = vsel %vm3456_vm15, %v3440_v9, %v3472_v55 }
 0x3e7   : > { %v3541_v38 = vadd.f32 %v3893_v30, %v3488_v13  ;;  %v3486_v44 = vsel %vm3454_vm6, %v3438_v28, %v3470_v16 }
 0x3e8   : > { %3554 = vst [vmem:[%s5337_s4 + $0x60] sm:$0xff] %v3538_v2  ;;  %v3539_v6 = vadd.f32 %v3889_v63, %v3486_v44 }
 0x3e9   : > { %3557 = vst [vmem:[%s5337_s4 + $0x78] sm:$0xff] %v3541_v38 }
 0x3ea   : > { %3555 = vst [vmem:[%s5337_s4 + $0x68] sm:$0xff] %v3539_v6 }
 0x3eb   : > { %4734 = shalt.err (!%p4731_p9)
}
 0x3ec   : > { %s4735_s14 = scalar_lea.hbm %s6184_s24, 2048  ;;  %s4739_s0 = scalar_lea.hbm %s6339_s23, 8192 }
 0x3ed   : > { %p4736_p4 = scmp.ne.s32.totalorder %s6184_s24, %s4735_s14  ;;  %p4740_p8 = scmp.lt.u32.totalorder %s6184_s24, %s6339_s23 }
 0x3ee   : > { %p4741_p5 = scmp.lt.u32.totalorder %s4739_s0, %s4735_s14  ;;  %p4743_p6 = scmp.lt.u32.totalorder %s4735_s14, %s6184_s24 }
 0x3ef   : > { %p4737_p10 = pnand %p4736_p4, %p6340_p7 }
 0x3f0   : > { %p4742_p13 = por %p4741_p5, %p4740_p8 }
 0x3f1   : > { %p4738_p1 = pneg %p4737_p10 }
 0x3f2   : > { %p4744_p11 = por %p4743_p6, %p4742_p13 }
 0x3f4   : > { %p4745_p12 = pnand %p4744_p11, %p4738_p1 }
 0x3f6   : > { %4748 = shalt.err (!%p4745_p12)
}
 0x3f7   : > { %s4871_s3 = smov 128   ;;  %s4872_s17 = smov 8  }
 0x3f8   : > { %4288 = dma.vmem_to_hbm [thread:$0]  (%p6340_p7), %s6178_s7, 2048, %s6184_s24, %s6190_s19, %s4871_s3, %s4871_s3, %s4872_s17  }
 0x3f9 PF: > { %s6341_s2 = sld [smem:[#allocation22_spill]]  ;;  %p4330_p0 = scmp.ge.s32.totalorder %s4855_s11, 2 }
 0x3fa   : > { %p6342_p3 = scmp.ne.s32.totalorder %s6302_s8, 0 }
 0x3fc   : > { %p4314_p2 = pnand %p4330_p0, %p6342_p3 }
 0x3ff   : > { %s3589_s27 = sand.u32 1, %s6341_s2  }
 0x400   : > { %s3590_s30 = scalar_lea.sflag [#allocation6], %s3589_s27 }
 0x401   : > { %4810 = dma.done.wait (!%p4314_p2), %s3590_s30, 2048  }
 0x402   : > { %4812 = vsyncadd (!%p4314_p2), %s3590_s30, 4294965248  ;;  %s26_s11 = sadd.s32 1, %s4855_s11   ;;  %s6343_s24 = smov %s4819_s25 }
 0x403   : > { %p23_p9 = scmp.ge.s32.totalorder %s26_s11, 6   ;;  %s6344_s25 = smov %s4823_s26 }
 0x404   : > { %s6345_s26 = smov %s5184_s21  ;;  %s6346_s27 = smov %s4831_s28 }
 0x405   : > { %s6347_s28 = smov %s4835_s29  ;;  %s6348_s29 = smov %s5181_s16 }
 0x406   : > { %s6349_s30 = smov %s4847_s9  ;;  %s6350_s8 = smov %s4851_s10 }
 0x407   : > { %s6351_s9 = smov %s6354_s18  ;;  %s6352_s10 = smov %s6358_s20 }
 0x408   :  { %25 = sbr.rel (!%p23_p9) target bundleno = 19 (0x13), region = 127 }
 0x40f   :  { %3595 = vsyncpa [#allocation5], 1 }
 0x410   :  { %3597 = vsyncpa [#allocation5 + $0x1], 1 }
 0x411   :  { %3598 = vsyncpa [#allocation8], 1 }
 0x412   :  { %3599 = vsyncpa [#allocation11], 1 }
 0x413   :  { %3600 = vsyncpa [#allocation14], 1 }
 0x414   :  { %3601 = vsyncpa [#allocation6], 1 }
 0x415   :  { %3603 = vsyncpa [#allocation6 + $0x1], 1 }

</bundles_post_ra>
